<compile_context>
chip_gen: v7x
topology: tpu7x:2x2x1
jax: 0.10.0
libtpu: 0.0.40
codegen_flags: <defaults>
</compile_context>

<pallas_src>
import jax
import jax.numpy as jnp
from jax.experimental import pallas as pl
from jax.experimental.pallas import tpu as pltpu


# --------------------------------------------------------------------------
# Fused kernel: encoder (on stacked & group-padded a/p/n batch) + triplet loss
# --------------------------------------------------------------------------
def make_fused_call(B, T, H, Bg, margin=0.1):
    Bpad = 3 * Bg          # stacked batch rows (multiple of 8)
    TB = T * Bpad          # flat time-major row count

    def kernel(x_ref,                                   # (T*Bpad, H) time-major embedded input
               wf0_ref, bf0_ref, hf0_ref,               # L0 fwd: (H,H), (1,H), (H,H)
               wb0_ref, bb0_ref, hb0_ref,               # L0 bwd: (H,H), (1,H), (H,H)
               wf1a_ref, wf1b_ref, bf1_ref, hf1_ref,    # L1 fwd: (H,H)x2, (1,H), (H,H)
               wb1a_ref, wb1b_ref, bb1_ref, hb1_ref,    # L1 bwd: (H,H)x2, (1,H), (H,H)
               lwa_ref, lwb_ref, lb_ref,                # Linear: (H,H)x2, (1,H)
               out_ref,                                 # (1,1) VMEM scalar loss
               l0f, l0b, l1f, l1b):                     # scratch: (T*Bpad, H) each
        f32 = jnp.float32

        # ---- layer 0: input projections for the whole sequence, per direction
        x = x_ref[...]
        l0f[...] = jnp.dot(x, wf0_ref[...], preferred_element_type=f32) + bf0_ref[...]
        l0b[...] = jnp.dot(x, wb0_ref[...], preferred_element_type=f32) + bb0_ref[...]

        def recur(lf, lb, whh_f, whh_b):
            # fwd/bwd recurrences interleaved, fully unrolled (T small & static
            # -> static, sublane-aligned pl.ds offsets). Overwrites the input
            # projection slab in place with the hidden states.
            h_f = jnp.zeros((Bpad, H), f32)
            h_b = jnp.zeros((Bpad, H), f32)
            for t in range(T):
                tb = T - 1 - t
                h_f = jnp.tanh(lf[pl.ds(t * Bpad, Bpad), :] +
                               jnp.dot(h_f, whh_f[...], preferred_element_type=f32))
                h_b = jnp.tanh(lb[pl.ds(tb * Bpad, Bpad), :] +
                               jnp.dot(h_b, whh_b[...], preferred_element_type=f32))
                lf[pl.ds(t * Bpad, Bpad), :] = h_f
                lb[pl.ds(tb * Bpad, Bpad), :] = h_b

        recur(l0f, l0b, hf0_ref, hb0_ref)

        # ---- layer 1: input = [fwd|bwd] of layer 0, expressed as two matmuls
        # per direction (weights pre-split on host -> no concats / lane slices)
        # TODO(synk): nn.RNN dropout=0.1 applies only in training mode -> omitted.
        f0 = l0f[...]
        b0 = l0b[...]
        l1f[...] = (jnp.dot(f0, wf1a_ref[...], preferred_element_type=f32) +
                    jnp.dot(b0, wf1b_ref[...], preferred_element_type=f32) + bf1_ref[...])
        l1b[...] = (jnp.dot(f0, wb1a_ref[...], preferred_element_type=f32) +
                    jnp.dot(b0, wb1b_ref[...], preferred_element_type=f32) + bb1_ref[...])
        recur(l1f, l1b, hf1_ref, hb1_ref)

        # ---- Linear(2H -> H) + running max-pool over time
        proj = (jnp.dot(l1f[...], lwa_ref[...], preferred_element_type=f32) +
                jnp.dot(l1b[...], lwb_ref[...], preferred_element_type=f32) +
                lb_ref[...])                              # (T*Bpad, H)
        enc = proj[0:Bpad]
        for t in range(1, T):
            enc = jnp.maximum(enc, proj[t * Bpad:(t + 1) * Bpad])

        # ---- triplet loss on cosine distance (a/p/n groups are 8-aligned)
        def l2norm(v):
            nrm = jnp.sqrt(jnp.sum(v * v, axis=-1, keepdims=True))
            return v / jnp.maximum(nrm, 1e-12)

        a = l2norm(enc[0:Bg])
        p = l2norm(enc[Bg:2 * Bg])
        n = l2norm(enc[2 * Bg:3 * Bg])
        ap = 1.0 - jnp.sum(a * p, axis=-1, keepdims=True)        # (Bg, 1)
        an = 1.0 - jnp.sum(a * n, axis=-1, keepdims=True)        # (Bg, 1)
        diff = ap - an + margin
        valid = jax.lax.broadcasted_iota(jnp.int32, (Bg, 1), 0) < B
        pos = jnp.logical_and(diff > 0.0, valid)
        s = jnp.sum(jnp.where(pos, diff, 0.0), axis=0, keepdims=True)   # (1,1)
        c = jnp.sum(pos.astype(f32), axis=0, keepdims=True)             # (1,1)
        # mean over positive entries; 0.0 when there are none (== mean(0*diff))
        out_ref[...] = jnp.where(c > 0.0, s / jnp.maximum(c, 1.0), jnp.zeros_like(s))

    vmem = pl.BlockSpec(memory_space=pltpu.MemorySpace.VMEM)
    return pl.pallas_call(
        kernel,
        out_shape=jax.ShapeDtypeStruct((1, 1), jnp.float32),
        in_specs=[vmem] * 18,
        out_specs=vmem,
        scratch_shapes=[pltpu.VMEM((TB, H), jnp.float32)] * 4,
    )


# --------------------------------------------------------------------------
# Parameter init (deterministic, synthetic — mirrors nn.Module shapes)
# --------------------------------------------------------------------------
def init_params(key, vocab_size, H):
    ks = jax.random.split(key, 16)
    scale = 1.0 / jnp.sqrt(H).astype(jnp.float32)

    def u(k, shape):
        return jax.random.uniform(k, shape, jnp.float32, -scale, scale)

    emb = u(ks[0], (vocab_size + 1, H)).at[0].set(0.0)   # padding_idx=0
    return {
        'emb': emb,
        'wih_f0': u(ks[1], (H, H)),      'whh_f0': u(ks[2], (H, H)),  'b_f0': u(ks[3], (1, H)),
        'wih_b0': u(ks[4], (H, H)),      'whh_b0': u(ks[5], (H, H)),  'b_b0': u(ks[6], (1, H)),
        'wih_f1': u(ks[7], (2 * H, H)),  'whh_f1': u(ks[8], (H, H)),  'b_f1': u(ks[9], (1, H)),
        'wih_b1': u(ks[10], (2 * H, H)), 'whh_b1': u(ks[11], (H, H)), 'b_b1': u(ks[12], (1, H)),
        'lin_w': u(ks[13], (2 * H, H)),  'lin_b': u(ks[14], (1, H)),
    }


def split_params(params):
    """Host-side one-time weight split: the (2H,*) weights are split into the
    halves that multiply the fwd / bwd hidden slabs, so the kernel never needs
    in-kernel concatenation or lane-offset slicing."""
    H = params['whh_f0'].shape[0]
    return {
        'wf1a': params['wih_f1'][:H], 'wf1b': params['wih_f1'][H:],
        'wb1a': params['wih_b1'][:H], 'wb1b': params['wih_b1'][H:],
        'lwa':  params['lin_w'][:H],  'lwb':  params['lin_w'][H:],
    }


# --------------------------------------------------------------------------
# Wrapper: embedding gather + time-major layout in JAX, one fused kernel call
# --------------------------------------------------------------------------
def sentence_match(params, sparams, x1, x2, x3, fused_call, Bg):
    B, T = x1.shape
    H = params['emb'].shape[1]
    pad = Bg - B

    def padb(x):
        return jnp.pad(x, ((0, pad), (0, 0))) if pad > 0 else x

    tokens = jnp.concatenate([padb(x1), padb(x2), padb(x3)], axis=0)     # (3*Bg, T)
    emb = params['emb'][tokens]                                          # gather (glue)
    x_tm = jnp.transpose(emb, (1, 0, 2)).reshape(T * 3 * Bg, H)          # time-major slab
    out = fused_call(
        x_tm,
        params['wih_f0'], params['b_f0'], params['whh_f0'],
        params['wih_b0'], params['b_b0'], params['whh_b0'],
        sparams['wf1a'], sparams['wf1b'], params['b_f1'], params['whh_f1'],
        sparams['wb1a'], sparams['wb1b'], params['b_b1'], params['whh_b1'],
        sparams['lwa'], sparams['lwb'], params['lin_b'])
    return out[0, 0]


# --------------------------------------------------------------------------
# Pure-JAX reference (correctness check only)
# --------------------------------------------------------------------------
def _ref_encoder(params, tokens):
    emb = params['emb'][tokens]

    def rnn_dir(x, wih, whh, b, reverse):
        Bb, Tt, _ = x.shape
        Hh = whh.shape[0]
        h = jnp.zeros((Bb, Hh), jnp.float32)
        outs = [None] * Tt
        order = range(Tt - 1, -1, -1) if reverse else range(Tt)
        for t in order:
            h = jnp.tanh(x[:, t, :] @ wih + b + h @ whh)
            outs[t] = h
        return jnp.stack(outs, axis=1)

    f0 = rnn_dir(emb, params['wih_f0'], params['whh_f0'], params['b_f0'][0], False)
    b0 = rnn_dir(emb, params['wih_b0'], params['whh_b0'], params['b_b0'][0], True)
    x1 = jnp.concatenate([f0, b0], axis=-1)
    f1 = rnn_dir(x1, params['wih_f1'], params['whh_f1'], params['b_f1'][0], False)
    b1 = rnn_dir(x1, params['wih_b1'], params['whh_b1'], params['b_b1'][0], True)
    out = jnp.concatenate([f1, b1], axis=-1) @ params['lin_w'] + params['lin_b'][0]
    return jnp.max(out, axis=1)


def _ref_match(params, x1, x2, x3, margin=0.1):
    def l2norm(v):
        return v / jnp.maximum(jnp.linalg.norm(v, axis=-1, keepdims=True), 1e-12)
    a = l2norm(_ref_encoder(params, x1))
    p = l2norm(_ref_encoder(params, x2))
    n = l2norm(_ref_encoder(params, x3))
    ap = 1.0 - jnp.sum(a * p, axis=-1)
    an = 1.0 - jnp.sum(a * n, axis=-1)
    diff = ap - an + margin
    pos = diff > 0
    s = jnp.sum(jnp.where(pos, diff, 0.0))
    c = jnp.sum(pos.astype(jnp.float32))
    return jnp.where(c > 0, s / jnp.maximum(c, 1.0), 0.0)


# --------------------------------------------------------------------------
if __name__ == "__main__":
    B, T, H, V = 2, 8, 32, 30                 # batch, seq, hidden, vocab
    Bg = ((B + 7) // 8) * 8                   # each a/p/n group padded to 8 sublanes

    key = jax.random.PRNGKey(0)
    kp, k1, k2, k3 = jax.random.split(key, 4)

    params = init_params(kp, V, H)
    sparams = split_params(params)
    x1 = jax.random.randint(k1, (B, T), 1, V + 1, dtype=jnp.int32)
    x2 = jax.random.randint(k2, (B, T), 1, V + 1, dtype=jnp.int32)
    x3 = jax.random.randint(k3, (B, T), 1, V + 1, dtype=jnp.int32)

    fused_call = make_fused_call(B, T, H, Bg)

    # jit the wrapper so the gather/transpose glue and the single pallas_call
    # dispatch as one XLA program.
    run = jax.jit(lambda p, sp, a, b, c: sentence_match(p, sp, a, b, c, fused_call, Bg))
    loss = jax.block_until_ready(run(params, sparams, x1, x2, x3))

    ref = _ref_match(params, x1, x2, x3)
    assert jnp.allclose(loss, ref, atol=1e-4, rtol=1e-4), (float(loss), float(ref))

    print("KERNEL_OK")
</pallas_src>

<mosaic_0001>
module attributes {stable_mosaic.version = 11 : i64} {
  func.func @kernel(%arg0: memref<192x32xf32, #tpu.memory_space<vmem>>, %arg1: memref<32x32xf32, #tpu.memory_space<vmem>>, %arg2: memref<1x32xf32, #tpu.memory_space<vmem>>, %arg3: memref<32x32xf32, #tpu.memory_space<vmem>>, %arg4: memref<32x32xf32, #tpu.memory_space<vmem>>, %arg5: memref<1x32xf32, #tpu.memory_space<vmem>>, %arg6: memref<32x32xf32, #tpu.memory_space<vmem>>, %arg7: memref<32x32xf32, #tpu.memory_space<vmem>>, %arg8: memref<32x32xf32, #tpu.memory_space<vmem>>, %arg9: memref<1x32xf32, #tpu.memory_space<vmem>>, %arg10: memref<32x32xf32, #tpu.memory_space<vmem>>, %arg11: memref<32x32xf32, #tpu.memory_space<vmem>>, %arg12: memref<32x32xf32, #tpu.memory_space<vmem>>, %arg13: memref<1x32xf32, #tpu.memory_space<vmem>>, %arg14: memref<32x32xf32, #tpu.memory_space<vmem>>, %arg15: memref<32x32xf32, #tpu.memory_space<vmem>>, %arg16: memref<32x32xf32, #tpu.memory_space<vmem>>, %arg17: memref<1x32xf32, #tpu.memory_space<vmem>>, %arg18: memref<1x1xf32, #tpu.memory_space<vmem>>, %arg19: memref<192x32xf32, #tpu.memory_space<vmem>>, %arg20: memref<192x32xf32, #tpu.memory_space<vmem>>, %arg21: memref<192x32xf32, #tpu.memory_space<vmem>>, %arg22: memref<192x32xf32, #tpu.memory_space<vmem>>) attributes {dimension_semantics = [], scalar_prefetch = 0 : i64, scratch_operands = 4 : i64, tpu.core_type = #tpu.core_type<tc>} {
    %c0 = arith.constant 0 : index
    %c0_0 = arith.constant 0 : index
    %0 = vector.load %arg0[%c0, %c0_0] : memref<192x32xf32, #tpu.memory_space<vmem>>, vector<192x32xf32>
    %c0_1 = arith.constant 0 : index
    %c0_2 = arith.constant 0 : index
    %1 = vector.load %arg1[%c0_1, %c0_2] : memref<32x32xf32, #tpu.memory_space<vmem>>, vector<32x32xf32>
    %cst = arith.constant dense<0.000000e+00> : vector<192x32xf32>
    %2 = tpu.matmul %0, %1, %cst {dimension_numbers = #tpu.dot_dimension_numbers<[1], [0], [0], [1], [0, 0, 1, 1], [], []>} : vector<192x32xf32>, vector<32x32xf32>, vector<192x32xf32> -> vector<192x32xf32>
    %c0_3 = arith.constant 0 : index
    %c0_4 = arith.constant 0 : index
    %3 = vector.load %arg2[%c0_3, %c0_4] : memref<1x32xf32, #tpu.memory_space<vmem>>, vector<1x32xf32>
    %4 = vector.broadcast %3 : vector<1x32xf32> to vector<192x32xf32>
    %5 = arith.addf %2, %4 : vector<192x32xf32>
    %c0_5 = arith.constant 0 : index
    %c0_6 = arith.constant 0 : index
    %6 = vector.load %arg19[%c0_5, %c0_6] : memref<192x32xf32, #tpu.memory_space<vmem>>, vector<192x32xf32>
    tpu.vector_store %arg19[%c0_5, %c0_6], %5 {strides = array<i32>} : memref<192x32xf32, #tpu.memory_space<vmem>>, vector<192x32xf32>,
    %c0_7 = arith.constant 0 : index
    %c0_8 = arith.constant 0 : index
    %7 = vector.load %arg4[%c0_7, %c0_8] : memref<32x32xf32, #tpu.memory_space<vmem>>, vector<32x32xf32>
    %cst_9 = arith.constant dense<0.000000e+00> : vector<192x32xf32>
    %8 = tpu.matmul %0, %7, %cst_9 {dimension_numbers = #tpu.dot_dimension_numbers<[1], [0], [0], [1], [0, 0, 1, 1], [], []>} : vector<192x32xf32>, vector<32x32xf32>, vector<192x32xf32> -> vector<192x32xf32>
    %c0_10 = arith.constant 0 : index
    %c0_11 = arith.constant 0 : index
    %9 = vector.load %arg5[%c0_10, %c0_11] : memref<1x32xf32, #tpu.memory_space<vmem>>, vector<1x32xf32>
    %10 = vector.broadcast %9 : vector<1x32xf32> to vector<192x32xf32>
    %11 = arith.addf %8, %10 : vector<192x32xf32>
    %c0_12 = arith.constant 0 : index
    %c0_13 = arith.constant 0 : index
    %12 = vector.load %arg20[%c0_12, %c0_13] : memref<192x32xf32, #tpu.memory_space<vmem>>, vector<192x32xf32>
    tpu.vector_store %arg20[%c0_12, %c0_13], %11 {strides = array<i32>} : memref<192x32xf32, #tpu.memory_space<vmem>>, vector<192x32xf32>,
    %cst_14 = arith.constant 0.000000e+00 : f32
    %13 = vector.broadcast %cst_14 : f32 to vector<24x32xf32>
    %cst_15 = arith.constant 0.000000e+00 : f32
    %14 = vector.broadcast %cst_15 : f32 to vector<24x32xf32>
    %c0_16 = arith.constant 0 : index
    %c0_17 = arith.constant 0 : index
    %15 = vector.load %arg19[%c0_16, %c0_17] : memref<192x32xf32, #tpu.memory_space<vmem>>, vector<24x32xf32>
    %c0_18 = arith.constant 0 : index
    %c0_19 = arith.constant 0 : index
    %16 = vector.load %arg3[%c0_18, %c0_19] : memref<32x32xf32, #tpu.memory_space<vmem>>, vector<32x32xf32>
    %cst_20 = arith.constant dense<0.000000e+00> : vector<24x32xf32>
    %17 = tpu.matmul %13, %16, %cst_20 {dimension_numbers = #tpu.dot_dimension_numbers<[1], [0], [0], [1], [0, 0, 1, 1], [], []>} : vector<24x32xf32>, vector<32x32xf32>, vector<24x32xf32> -> vector<24x32xf32>
    %18 = arith.addf %15, %17 : vector<24x32xf32>
    %19 = math.tanh %18 : vector<24x32xf32>
    %c168 = arith.constant 168 : index
    %c0_21 = arith.constant 0 : index
    %20 = vector.load %arg20[%c168, %c0_21] : memref<192x32xf32, #tpu.memory_space<vmem>>, vector<24x32xf32>
    %c0_22 = arith.constant 0 : index
    %c0_23 = arith.constant 0 : index
    %21 = vector.load %arg6[%c0_22, %c0_23] : memref<32x32xf32, #tpu.memory_space<vmem>>, vector<32x32xf32>
    %cst_24 = arith.constant dense<0.000000e+00> : vector<24x32xf32>
    %22 = tpu.matmul %14, %21, %cst_24 {dimension_numbers = #tpu.dot_dimension_numbers<[1], [0], [0], [1], [0, 0, 1, 1], [], []>} : vector<24x32xf32>, vector<32x32xf32>, vector<24x32xf32> -> vector<24x32xf32>
    %23 = arith.addf %20, %22 : vector<24x32xf32>
    %24 = math.tanh %23 : vector<24x32xf32>
    %c0_25 = arith.constant 0 : index
    %c0_26 = arith.constant 0 : index
    %25 = vector.load %arg19[%c0_25, %c0_26] : memref<192x32xf32, #tpu.memory_space<vmem>>, vector<24x32xf32>
    tpu.vector_store %arg19[%c0_25, %c0_26], %19 {strides = array<i32>} : memref<192x32xf32, #tpu.memory_space<vmem>>, vector<24x32xf32>,
    %c168_27 = arith.constant 168 : index
    %c0_28 = arith.constant 0 : index
    %26 = vector.load %arg20[%c168_27, %c0_28] : memref<192x32xf32, #tpu.memory_space<vmem>>, vector<24x32xf32>
    tpu.vector_store %arg20[%c168_27, %c0_28], %24 {strides = array<i32>} : memref<192x32xf32, #tpu.memory_space<vmem>>, vector<24x32xf32>,
    %c24 = arith.constant 24 : index
    %c0_29 = arith.constant 0 : index
    %27 = vector.load %arg19[%c24, %c0_29] : memref<192x32xf32, #tpu.memory_space<vmem>>, vector<24x32xf32>
    %c0_30 = arith.constant 0 : index
    %c0_31 = arith.constant 0 : index
    %28 = vector.load %arg3[%c0_30, %c0_31] : memref<32x32xf32, #tpu.memory_space<vmem>>, vector<32x32xf32>
    %cst_32 = arith.constant dense<0.000000e+00> : vector<24x32xf32>
    %29 = tpu.matmul %19, %28, %cst_32 {dimension_numbers = #tpu.dot_dimension_numbers<[1], [0], [0], [1], [0, 0, 1, 1], [], []>} : vector<24x32xf32>, vector<32x32xf32>, vector<24x32xf32> -> vector<24x32xf32>
    %30 = arith.addf %27, %29 : vector<24x32xf32>
    %31 = math.tanh %30 : vector<24x32xf32>
    %c144 = arith.constant 144 : index
    %c0_33 = arith.constant 0 : index
    %32 = vector.load %arg20[%c144, %c0_33] : memref<192x32xf32, #tpu.memory_space<vmem>>, vector<24x32xf32>
    %c0_34 = arith.constant 0 : index
    %c0_35 = arith.constant 0 : index
    %33 = vector.load %arg6[%c0_34, %c0_35] : memref<32x32xf32, #tpu.memory_space<vmem>>, vector<32x32xf32>
    %cst_36 = arith.constant dense<0.000000e+00> : vector<24x32xf32>
    %34 = tpu.matmul %24, %33, %cst_36 {dimension_numbers = #tpu.dot_dimension_numbers<[1], [0], [0], [1], [0, 0, 1, 1], [], []>} : vector<24x32xf32>, vector<32x32xf32>, vector<24x32xf32> -> vector<24x32xf32>
    %35 = arith.addf %32, %34 : vector<24x32xf32>
    %36 = math.tanh %35 : vector<24x32xf32>
    %c24_37 = arith.constant 24 : index
    %c0_38 = arith.constant 0 : index
    %37 = vector.load %arg19[%c24_37, %c0_38] : memref<192x32xf32, #tpu.memory_space<vmem>>, vector<24x32xf32>
    tpu.vector_store %arg19[%c24_37, %c0_38], %31 {strides = array<i32>} : memref<192x32xf32, #tpu.memory_space<vmem>>, vector<24x32xf32>,
    %c144_39 = arith.constant 144 : index
    %c0_40 = arith.constant 0 : index
    %38 = vector.load %arg20[%c144_39, %c0_40] : memref<192x32xf32, #tpu.memory_space<vmem>>, vector<24x32xf32>
    tpu.vector_store %arg20[%c144_39, %c0_40], %36 {strides = array<i32>} : memref<192x32xf32, #tpu.memory_space<vmem>>, vector<24x32xf32>,
    %c48 = arith.constant 48 : index
    %c0_41 = arith.constant 0 : index
    %39 = vector.load %arg19[%c48, %c0_41] : memref<192x32xf32, #tpu.memory_space<vmem>>, vector<24x32xf32>
    %c0_42 = arith.constant 0 : index
    %c0_43 = arith.constant 0 : index
    %40 = vector.load %arg3[%c0_42, %c0_43] : memref<32x32xf32, #tpu.memory_space<vmem>>, vector<32x32xf32>
    %cst_44 = arith.constant dense<0.000000e+00> : vector<24x32xf32>
    %41 = tpu.matmul %31, %40, %cst_44 {dimension_numbers = #tpu.dot_dimension_numbers<[1], [0], [0], [1], [0, 0, 1, 1], [], []>} : vector<24x32xf32>, vector<32x32xf32>, vector<24x32xf32> -> vector<24x32xf32>
    %42 = arith.addf %39, %41 : vector<24x32xf32>
    %43 = math.tanh %42 : vector<24x32xf32>
    %c120 = arith.constant 120 : index
    %c0_45 = arith.constant 0 : index
    %44 = vector.load %arg20[%c120, %c0_45] : memref<192x32xf32, #tpu.memory_space<vmem>>, vector<24x32xf32>
    %c0_46 = arith.constant 0 : index
    %c0_47 = arith.constant 0 : index
    %45 = vector.load %arg6[%c0_46, %c0_47] : memref<32x32xf32, #tpu.memory_space<vmem>>, vector<32x32xf32>
    %cst_48 = arith.constant dense<0.000000e+00> : vector<24x32xf32>
    %46 = tpu.matmul %36, %45, %cst_48 {dimension_numbers = #tpu.dot_dimension_numbers<[1], [0], [0], [1], [0, 0, 1, 1], [], []>} : vector<24x32xf32>, vector<32x32xf32>, vector<24x32xf32> -> vector<24x32xf32>
    %47 = arith.addf %44, %46 : vector<24x32xf32>
    %48 = math.tanh %47 : vector<24x32xf32>
    %c48_49 = arith.constant 48 : index
    %c0_50 = arith.constant 0 : index
    %49 = vector.load %arg19[%c48_49, %c0_50] : memref<192x32xf32, #tpu.memory_space<vmem>>, vector<24x32xf32>
    tpu.vector_store %arg19[%c48_49, %c0_50], %43 {strides = array<i32>} : memref<192x32xf32, #tpu.memory_space<vmem>>, vector<24x32xf32>,
    %c120_51 = arith.constant 120 : index
    %c0_52 = arith.constant 0 : index
    %50 = vector.load %arg20[%c120_51, %c0_52] : memref<192x32xf32, #tpu.memory_space<vmem>>, vector<24x32xf32>
    tpu.vector_store %arg20[%c120_51, %c0_52], %48 {strides = array<i32>} : memref<192x32xf32, #tpu.memory_space<vmem>>, vector<24x32xf32>,
    %c72 = arith.constant 72 : index
    %c0_53 = arith.constant 0 : index
    %51 = vector.load %arg19[%c72, %c0_53] : memref<192x32xf32, #tpu.memory_space<vmem>>, vector<24x32xf32>
    %c0_54 = arith.constant 0 : index
    %c0_55 = arith.constant 0 : index
    %52 = vector.load %arg3[%c0_54, %c0_55] : memref<32x32xf32, #tpu.memory_space<vmem>>, vector<32x32xf32>
    %cst_56 = arith.constant dense<0.000000e+00> : vector<24x32xf32>
    %53 = tpu.matmul %43, %52, %cst_56 {dimension_numbers = #tpu.dot_dimension_numbers<[1], [0], [0], [1], [0, 0, 1, 1], [], []>} : vector<24x32xf32>, vector<32x32xf32>, vector<24x32xf32> -> vector<24x32xf32>
    %54 = arith.addf %51, %53 : vector<24x32xf32>
    %55 = math.tanh %54 : vector<24x32xf32>
    %c96 = arith.constant 96 : index
    %c0_57 = arith.constant 0 : index
    %56 = vector.load %arg20[%c96, %c0_57] : memref<192x32xf32, #tpu.memory_space<vmem>>, vector<24x32xf32>
    %c0_58 = arith.constant 0 : index
    %c0_59 = arith.constant 0 : index
    %57 = vector.load %arg6[%c0_58, %c0_59] : memref<32x32xf32, #tpu.memory_space<vmem>>, vector<32x32xf32>
    %cst_60 = arith.constant dense<0.000000e+00> : vector<24x32xf32>
    %58 = tpu.matmul %48, %57, %cst_60 {dimension_numbers = #tpu.dot_dimension_numbers<[1], [0], [0], [1], [0, 0, 1, 1], [], []>} : vector<24x32xf32>, vector<32x32xf32>, vector<24x32xf32> -> vector<24x32xf32>
    %59 = arith.addf %56, %58 : vector<24x32xf32>
    %60 = math.tanh %59 : vector<24x32xf32>
    %c72_61 = arith.constant 72 : index
    %c0_62 = arith.constant 0 : index
    %61 = vector.load %arg19[%c72_61, %c0_62] : memref<192x32xf32, #tpu.memory_space<vmem>>, vector<24x32xf32>
    tpu.vector_store %arg19[%c72_61, %c0_62], %55 {strides = array<i32>} : memref<192x32xf32, #tpu.memory_space<vmem>>, vector<24x32xf32>,
    %c96_63 = arith.constant 96 : index
    %c0_64 = arith.constant 0 : index
    %62 = vector.load %arg20[%c96_63, %c0_64] : memref<192x32xf32, #tpu.memory_space<vmem>>, vector<24x32xf32>
    tpu.vector_store %arg20[%c96_63, %c0_64], %60 {strides = array<i32>} : memref<192x32xf32, #tpu.memory_space<vmem>>, vector<24x32xf32>,
    %c96_65 = arith.constant 96 : index
    %c0_66 = arith.constant 0 : index
    %63 = vector.load %arg19[%c96_65, %c0_66] : memref<192x32xf32, #tpu.memory_space<vmem>>, vector<24x32xf32>
    %c0_67 = arith.constant 0 : index
    %c0_68 = arith.constant 0 : index
    %64 = vector.load %arg3[%c0_67, %c0_68] : memref<32x32xf32, #tpu.memory_space<vmem>>, vector<32x32xf32>
    %cst_69 = arith.constant dense<0.000000e+00> : vector<24x32xf32>
    %65 = tpu.matmul %55, %64, %cst_69 {dimension_numbers = #tpu.dot_dimension_numbers<[1], [0], [0], [1], [0, 0, 1, 1], [], []>} : vector<24x32xf32>, vector<32x32xf32>, vector<24x32xf32> -> vector<24x32xf32>
    %66 = arith.addf %63, %65 : vector<24x32xf32>
    %67 = math.tanh %66 : vector<24x32xf32>
    %c72_70 = arith.constant 72 : index
    %c0_71 = arith.constant 0 : index
    %68 = vector.load %arg20[%c72_70, %c0_71] : memref<192x32xf32, #tpu.memory_space<vmem>>, vector<24x32xf32>
    %c0_72 = arith.constant 0 : index
    %c0_73 = arith.constant 0 : index
    %69 = vector.load %arg6[%c0_72, %c0_73] : memref<32x32xf32, #tpu.memory_space<vmem>>, vector<32x32xf32>
    %cst_74 = arith.constant dense<0.000000e+00> : vector<24x32xf32>
    %70 = tpu.matmul %60, %69, %cst_74 {dimension_numbers = #tpu.dot_dimension_numbers<[1], [0], [0], [1], [0, 0, 1, 1], [], []>} : vector<24x32xf32>, vector<32x32xf32>, vector<24x32xf32> -> vector<24x32xf32>
    %71 = arith.addf %68, %70 : vector<24x32xf32>
    %72 = math.tanh %71 : vector<24x32xf32>
    %c96_75 = arith.constant 96 : index
    %c0_76 = arith.constant 0 : index
    %73 = vector.load %arg19[%c96_75, %c0_76] : memref<192x32xf32, #tpu.memory_space<vmem>>, vector<24x32xf32>
    tpu.vector_store %arg19[%c96_75, %c0_76], %67 {strides = array<i32>} : memref<192x32xf32, #tpu.memory_space<vmem>>, vector<24x32xf32>,
    %c72_77 = arith.constant 72 : index
    %c0_78 = arith.constant 0 : index
    %74 = vector.load %arg20[%c72_77, %c0_78] : memref<192x32xf32, #tpu.memory_space<vmem>>, vector<24x32xf32>
    tpu.vector_store %arg20[%c72_77, %c0_78], %72 {strides = array<i32>} : memref<192x32xf32, #tpu.memory_space<vmem>>, vector<24x32xf32>,
    %c120_79 = arith.constant 120 : index
    %c0_80 = arith.constant 0 : index
    %75 = vector.load %arg19[%c120_79, %c0_80] : memref<192x32xf32, #tpu.memory_space<vmem>>, vector<24x32xf32>
    %c0_81 = arith.constant 0 : index
    %c0_82 = arith.constant 0 : index
    %76 = vector.load %arg3[%c0_81, %c0_82] : memref<32x32xf32, #tpu.memory_space<vmem>>, vector<32x32xf32>
    %cst_83 = arith.constant dense<0.000000e+00> : vector<24x32xf32>
    %77 = tpu.matmul %67, %76, %cst_83 {dimension_numbers = #tpu.dot_dimension_numbers<[1], [0], [0], [1], [0, 0, 1, 1], [], []>} : vector<24x32xf32>, vector<32x32xf32>, vector<24x32xf32> -> vector<24x32xf32>
    %78 = arith.addf %75, %77 : vector<24x32xf32>
    %79 = math.tanh %78 : vector<24x32xf32>
    %c48_84 = arith.constant 48 : index
    %c0_85 = arith.constant 0 : index
    %80 = vector.load %arg20[%c48_84, %c0_85] : memref<192x32xf32, #tpu.memory_space<vmem>>, vector<24x32xf32>
    %c0_86 = arith.constant 0 : index
    %c0_87 = arith.constant 0 : index
    %81 = vector.load %arg6[%c0_86, %c0_87] : memref<32x32xf32, #tpu.memory_space<vmem>>, vector<32x32xf32>
    %cst_88 = arith.constant dense<0.000000e+00> : vector<24x32xf32>
    %82 = tpu.matmul %72, %81, %cst_88 {dimension_numbers = #tpu.dot_dimension_numbers<[1], [0], [0], [1], [0, 0, 1, 1], [], []>} : vector<24x32xf32>, vector<32x32xf32>, vector<24x32xf32> -> vector<24x32xf32>
    %83 = arith.addf %80, %82 : vector<24x32xf32>
    %84 = math.tanh %83 : vector<24x32xf32>
    %c120_89 = arith.constant 120 : index
    %c0_90 = arith.constant 0 : index
    %85 = vector.load %arg19[%c120_89, %c0_90] : memref<192x32xf32, #tpu.memory_space<vmem>>, vector<24x32xf32>
    tpu.vector_store %arg19[%c120_89, %c0_90], %79 {strides = array<i32>} : memref<192x32xf32, #tpu.memory_space<vmem>>, vector<24x32xf32>,
    %c48_91 = arith.constant 48 : index
    %c0_92 = arith.constant 0 : index
    %86 = vector.load %arg20[%c48_91, %c0_92] : memref<192x32xf32, #tpu.memory_space<vmem>>, vector<24x32xf32>
    tpu.vector_store %arg20[%c48_91, %c0_92], %84 {strides = array<i32>} : memref<192x32xf32, #tpu.memory_space<vmem>>, vector<24x32xf32>,
    %c144_93 = arith.constant 144 : index
    %c0_94 = arith.constant 0 : index
    %87 = vector.load %arg19[%c144_93, %c0_94] : memref<192x32xf32, #tpu.memory_space<vmem>>, vector<24x32xf32>
    %c0_95 = arith.constant 0 : index
    %c0_96 = arith.constant 0 : index
    %88 = vector.load %arg3[%c0_95, %c0_96] : memref<32x32xf32, #tpu.memory_space<vmem>>, vector<32x32xf32>
    %cst_97 = arith.constant dense<0.000000e+00> : vector<24x32xf32>
    %89 = tpu.matmul %79, %88, %cst_97 {dimension_numbers = #tpu.dot_dimension_numbers<[1], [0], [0], [1], [0, 0, 1, 1], [], []>} : vector<24x32xf32>, vector<32x32xf32>, vector<24x32xf32> -> vector<24x32xf32>
    %90 = arith.addf %87, %89 : vector<24x32xf32>
    %91 = math.tanh %90 : vector<24x32xf32>
    %c24_98 = arith.constant 24 : index
    %c0_99 = arith.constant 0 : index
    %92 = vector.load %arg20[%c24_98, %c0_99] : memref<192x32xf32, #tpu.memory_space<vmem>>, vector<24x32xf32>
    %c0_100 = arith.constant 0 : index
    %c0_101 = arith.constant 0 : index
    %93 = vector.load %arg6[%c0_100, %c0_101] : memref<32x32xf32, #tpu.memory_space<vmem>>, vector<32x32xf32>
    %cst_102 = arith.constant dense<0.000000e+00> : vector<24x32xf32>
    %94 = tpu.matmul %84, %93, %cst_102 {dimension_numbers = #tpu.dot_dimension_numbers<[1], [0], [0], [1], [0, 0, 1, 1], [], []>} : vector<24x32xf32>, vector<32x32xf32>, vector<24x32xf32> -> vector<24x32xf32>
    %95 = arith.addf %92, %94 : vector<24x32xf32>
    %96 = math.tanh %95 : vector<24x32xf32>
    %c144_103 = arith.constant 144 : index
    %c0_104 = arith.constant 0 : index
    %97 = vector.load %arg19[%c144_103, %c0_104] : memref<192x32xf32, #tpu.memory_space<vmem>>, vector<24x32xf32>
    tpu.vector_store %arg19[%c144_103, %c0_104], %91 {strides = array<i32>} : memref<192x32xf32, #tpu.memory_space<vmem>>, vector<24x32xf32>,
    %c24_105 = arith.constant 24 : index
    %c0_106 = arith.constant 0 : index
    %98 = vector.load %arg20[%c24_105, %c0_106] : memref<192x32xf32, #tpu.memory_space<vmem>>, vector<24x32xf32>
    tpu.vector_store %arg20[%c24_105, %c0_106], %96 {strides = array<i32>} : memref<192x32xf32, #tpu.memory_space<vmem>>, vector<24x32xf32>,
    %c168_107 = arith.constant 168 : index
    %c0_108 = arith.constant 0 : index
    %99 = vector.load %arg19[%c168_107, %c0_108] : memref<192x32xf32, #tpu.memory_space<vmem>>, vector<24x32xf32>
    %c0_109 = arith.constant 0 : index
    %c0_110 = arith.constant 0 : index
    %100 = vector.load %arg3[%c0_109, %c0_110] : memref<32x32xf32, #tpu.memory_space<vmem>>, vector<32x32xf32>
    %cst_111 = arith.constant dense<0.000000e+00> : vector<24x32xf32>
    %101 = tpu.matmul %91, %100, %cst_111 {dimension_numbers = #tpu.dot_dimension_numbers<[1], [0], [0], [1], [0, 0, 1, 1], [], []>} : vector<24x32xf32>, vector<32x32xf32>, vector<24x32xf32> -> vector<24x32xf32>
    %102 = arith.addf %99, %101 : vector<24x32xf32>
    %103 = math.tanh %102 : vector<24x32xf32>
    %c0_112 = arith.constant 0 : index
    %c0_113 = arith.constant 0 : index
    %104 = vector.load %arg20[%c0_112, %c0_113] : memref<192x32xf32, #tpu.memory_space<vmem>>, vector<24x32xf32>
    %c0_114 = arith.constant 0 : index
    %c0_115 = arith.constant 0 : index
    %105 = vector.load %arg6[%c0_114, %c0_115] : memref<32x32xf32, #tpu.memory_space<vmem>>, vector<32x32xf32>
    %cst_116 = arith.constant dense<0.000000e+00> : vector<24x32xf32>
    %106 = tpu.matmul %96, %105, %cst_116 {dimension_numbers = #tpu.dot_dimension_numbers<[1], [0], [0], [1], [0, 0, 1, 1], [], []>} : vector<24x32xf32>, vector<32x32xf32>, vector<24x32xf32> -> vector<24x32xf32>
    %107 = arith.addf %104, %106 : vector<24x32xf32>
    %108 = math.tanh %107 : vector<24x32xf32>
    %c168_117 = arith.constant 168 : index
    %c0_118 = arith.constant 0 : index
    %109 = vector.load %arg19[%c168_117, %c0_118] : memref<192x32xf32, #tpu.memory_space<vmem>>, vector<24x32xf32>
    tpu.vector_store %arg19[%c168_117, %c0_118], %103 {strides = array<i32>} : memref<192x32xf32, #tpu.memory_space<vmem>>, vector<24x32xf32>,
    %c0_119 = arith.constant 0 : index
    %c0_120 = arith.constant 0 : index
    %110 = vector.load %arg20[%c0_119, %c0_120] : memref<192x32xf32, #tpu.memory_space<vmem>>, vector<24x32xf32>
    tpu.vector_store %arg20[%c0_119, %c0_120], %108 {strides = array<i32>} : memref<192x32xf32, #tpu.memory_space<vmem>>, vector<24x32xf32>,
    %c0_121 = arith.constant 0 : index
    %c0_122 = arith.constant 0 : index
    %111 = vector.load %arg19[%c0_121, %c0_122] : memref<192x32xf32, #tpu.memory_space<vmem>>, vector<192x32xf32>
    %c0_123 = arith.constant 0 : index
    %c0_124 = arith.constant 0 : index
    %112 = vector.load %arg20[%c0_123, %c0_124] : memref<192x32xf32, #tpu.memory_space<vmem>>, vector<192x32xf32>
    %c0_125 = arith.constant 0 : index
    %c0_126 = arith.constant 0 : index
    %113 = vector.load %arg7[%c0_125, %c0_126] : memref<32x32xf32, #tpu.memory_space<vmem>>, vector<32x32xf32>
    %cst_127 = arith.constant dense<0.000000e+00> : vector<192x32xf32>
    %114 = tpu.matmul %111, %113, %cst_127 {dimension_numbers = #tpu.dot_dimension_numbers<[1], [0], [0], [1], [0, 0, 1, 1], [], []>} : vector<192x32xf32>, vector<32x32xf32>, vector<192x32xf32> -> vector<192x32xf32>
    %c0_128 = arith.constant 0 : index
    %c0_129 = arith.constant 0 : index
    %115 = vector.load %arg8[%c0_128, %c0_129] : memref<32x32xf32, #tpu.memory_space<vmem>>, vector<32x32xf32>
    %cst_130 = arith.constant dense<0.000000e+00> : vector<192x32xf32>
    %116 = tpu.matmul %112, %115, %cst_130 {dimension_numbers = #tpu.dot_dimension_numbers<[1], [0], [0], [1], [0, 0, 1, 1], [], []>} : vector<192x32xf32>, vector<32x32xf32>, vector<192x32xf32> -> vector<192x32xf32>
    %117 = arith.addf %114, %116 : vector<192x32xf32>
    %c0_131 = arith.constant 0 : index
    %c0_132 = arith.constant 0 : index
    %118 = vector.load %arg9[%c0_131, %c0_132] : memref<1x32xf32, #tpu.memory_space<vmem>>, vector<1x32xf32>
    %119 = vector.broadcast %118 : vector<1x32xf32> to vector<192x32xf32>
    %120 = arith.addf %117, %119 : vector<192x32xf32>
    %c0_133 = arith.constant 0 : index
    %c0_134 = arith.constant 0 : index
    %121 = vector.load %arg21[%c0_133, %c0_134] : memref<192x32xf32, #tpu.memory_space<vmem>>, vector<192x32xf32>
    tpu.vector_store %arg21[%c0_133, %c0_134], %120 {strides = array<i32>} : memref<192x32xf32, #tpu.memory_space<vmem>>, vector<192x32xf32>,
    %c0_135 = arith.constant 0 : index
    %c0_136 = arith.constant 0 : index
    %122 = vector.load %arg11[%c0_135, %c0_136] : memref<32x32xf32, #tpu.memory_space<vmem>>, vector<32x32xf32>
    %cst_137 = arith.constant dense<0.000000e+00> : vector<192x32xf32>
    %123 = tpu.matmul %111, %122, %cst_137 {dimension_numbers = #tpu.dot_dimension_numbers<[1], [0], [0], [1], [0, 0, 1, 1], [], []>} : vector<192x32xf32>, vector<32x32xf32>, vector<192x32xf32> -> vector<192x32xf32>
    %c0_138 = arith.constant 0 : index
    %c0_139 = arith.constant 0 : index
    %124 = vector.load %arg12[%c0_138, %c0_139] : memref<32x32xf32, #tpu.memory_space<vmem>>, vector<32x32xf32>
    %cst_140 = arith.constant dense<0.000000e+00> : vector<192x32xf32>
    %125 = tpu.matmul %112, %124, %cst_140 {dimension_numbers = #tpu.dot_dimension_numbers<[1], [0], [0], [1], [0, 0, 1, 1], [], []>} : vector<192x32xf32>, vector<32x32xf32>, vector<192x32xf32> -> vector<192x32xf32>
    %126 = arith.addf %123, %125 : vector<192x32xf32>
    %c0_141 = arith.constant 0 : index
    %c0_142 = arith.constant 0 : index
    %127 = vector.load %arg13[%c0_141, %c0_142] : memref<1x32xf32, #tpu.memory_space<vmem>>, vector<1x32xf32>
    %128 = vector.broadcast %127 : vector<1x32xf32> to vector<192x32xf32>
    %129 = arith.addf %126, %128 : vector<192x32xf32>
    %c0_143 = arith.constant 0 : index
    %c0_144 = arith.constant 0 : index
    %130 = vector.load %arg22[%c0_143, %c0_144] : memref<192x32xf32, #tpu.memory_space<vmem>>, vector<192x32xf32>
    tpu.vector_store %arg22[%c0_143, %c0_144], %129 {strides = array<i32>} : memref<192x32xf32, #tpu.memory_space<vmem>>, vector<192x32xf32>,
    %cst_145 = arith.constant 0.000000e+00 : f32
    %131 = vector.broadcast %cst_145 : f32 to vector<24x32xf32>
    %cst_146 = arith.constant 0.000000e+00 : f32
    %132 = vector.broadcast %cst_146 : f32 to vector<24x32xf32>
    %c0_147 = arith.constant 0 : index
    %c0_148 = arith.constant 0 : index
    %133 = vector.load %arg21[%c0_147, %c0_148] : memref<192x32xf32, #tpu.memory_space<vmem>>, vector<24x32xf32>
    %c0_149 = arith.constant 0 : index
    %c0_150 = arith.constant 0 : index
    %134 = vector.load %arg10[%c0_149, %c0_150] : memref<32x32xf32, #tpu.memory_space<vmem>>, vector<32x32xf32>
    %cst_151 = arith.constant dense<0.000000e+00> : vector<24x32xf32>
    %135 = tpu.matmul %131, %134, %cst_151 {dimension_numbers = #tpu.dot_dimension_numbers<[1], [0], [0], [1], [0, 0, 1, 1], [], []>} : vector<24x32xf32>, vector<32x32xf32>, vector<24x32xf32> -> vector<24x32xf32>
    %136 = arith.addf %133, %135 : vector<24x32xf32>
    %137 = math.tanh %136 : vector<24x32xf32>
    %c168_152 = arith.constant 168 : index
    %c0_153 = arith.constant 0 : index
    %138 = vector.load %arg22[%c168_152, %c0_153] : memref<192x32xf32, #tpu.memory_space<vmem>>, vector<24x32xf32>
    %c0_154 = arith.constant 0 : index
    %c0_155 = arith.constant 0 : index
    %139 = vector.load %arg14[%c0_154, %c0_155] : memref<32x32xf32, #tpu.memory_space<vmem>>, vector<32x32xf32>
    %cst_156 = arith.constant dense<0.000000e+00> : vector<24x32xf32>
    %140 = tpu.matmul %132, %139, %cst_156 {dimension_numbers = #tpu.dot_dimension_numbers<[1], [0], [0], [1], [0, 0, 1, 1], [], []>} : vector<24x32xf32>, vector<32x32xf32>, vector<24x32xf32> -> vector<24x32xf32>
    %141 = arith.addf %138, %140 : vector<24x32xf32>
    %142 = math.tanh %141 : vector<24x32xf32>
    %c0_157 = arith.constant 0 : index
    %c0_158 = arith.constant 0 : index
    %143 = vector.load %arg21[%c0_157, %c0_158] : memref<192x32xf32, #tpu.memory_space<vmem>>, vector<24x32xf32>
    tpu.vector_store %arg21[%c0_157, %c0_158], %137 {strides = array<i32>} : memref<192x32xf32, #tpu.memory_space<vmem>>, vector<24x32xf32>,
    %c168_159 = arith.constant 168 : index
    %c0_160 = arith.constant 0 : index
    %144 = vector.load %arg22[%c168_159, %c0_160] : memref<192x32xf32, #tpu.memory_space<vmem>>, vector<24x32xf32>
    tpu.vector_store %arg22[%c168_159, %c0_160], %142 {strides = array<i32>} : memref<192x32xf32, #tpu.memory_space<vmem>>, vector<24x32xf32>,
    %c24_161 = arith.constant 24 : index
    %c0_162 = arith.constant 0 : index
    %145 = vector.load %arg21[%c24_161, %c0_162] : memref<192x32xf32, #tpu.memory_space<vmem>>, vector<24x32xf32>
    %c0_163 = arith.constant 0 : index
    %c0_164 = arith.constant 0 : index
    %146 = vector.load %arg10[%c0_163, %c0_164] : memref<32x32xf32, #tpu.memory_space<vmem>>, vector<32x32xf32>
    %cst_165 = arith.constant dense<0.000000e+00> : vector<24x32xf32>
    %147 = tpu.matmul %137, %146, %cst_165 {dimension_numbers = #tpu.dot_dimension_numbers<[1], [0], [0], [1], [0, 0, 1, 1], [], []>} : vector<24x32xf32>, vector<32x32xf32>, vector<24x32xf32> -> vector<24x32xf32>
    %148 = arith.addf %145, %147 : vector<24x32xf32>
    %149 = math.tanh %148 : vector<24x32xf32>
    %c144_166 = arith.constant 144 : index
    %c0_167 = arith.constant 0 : index
    %150 = vector.load %arg22[%c144_166, %c0_167] : memref<192x32xf32, #tpu.memory_space<vmem>>, vector<24x32xf32>
    %c0_168 = arith.constant 0 : index
    %c0_169 = arith.constant 0 : index
    %151 = vector.load %arg14[%c0_168, %c0_169] : memref<32x32xf32, #tpu.memory_space<vmem>>, vector<32x32xf32>
    %cst_170 = arith.constant dense<0.000000e+00> : vector<24x32xf32>
    %152 = tpu.matmul %142, %151, %cst_170 {dimension_numbers = #tpu.dot_dimension_numbers<[1], [0], [0], [1], [0, 0, 1, 1], [], []>} : vector<24x32xf32>, vector<32x32xf32>, vector<24x32xf32> -> vector<24x32xf32>
    %153 = arith.addf %150, %152 : vector<24x32xf32>
    %154 = math.tanh %153 : vector<24x32xf32>
    %c24_171 = arith.constant 24 : index
    %c0_172 = arith.constant 0 : index
    %155 = vector.load %arg21[%c24_171, %c0_172] : memref<192x32xf32, #tpu.memory_space<vmem>>, vector<24x32xf32>
    tpu.vector_store %arg21[%c24_171, %c0_172], %149 {strides = array<i32>} : memref<192x32xf32, #tpu.memory_space<vmem>>, vector<24x32xf32>,
    %c144_173 = arith.constant 144 : index
    %c0_174 = arith.constant 0 : index
    %156 = vector.load %arg22[%c144_173, %c0_174] : memref<192x32xf32, #tpu.memory_space<vmem>>, vector<24x32xf32>
    tpu.vector_store %arg22[%c144_173, %c0_174], %154 {strides = array<i32>} : memref<192x32xf32, #tpu.memory_space<vmem>>, vector<24x32xf32>,
    %c48_175 = arith.constant 48 : index
    %c0_176 = arith.constant 0 : index
    %157 = vector.load %arg21[%c48_175, %c0_176] : memref<192x32xf32, #tpu.memory_space<vmem>>, vector<24x32xf32>
    %c0_177 = arith.constant 0 : index
    %c0_178 = arith.constant 0 : index
    %158 = vector.load %arg10[%c0_177, %c0_178] : memref<32x32xf32, #tpu.memory_space<vmem>>, vector<32x32xf32>
    %cst_179 = arith.constant dense<0.000000e+00> : vector<24x32xf32>
    %159 = tpu.matmul %149, %158, %cst_179 {dimension_numbers = #tpu.dot_dimension_numbers<[1], [0], [0], [1], [0, 0, 1, 1], [], []>} : vector<24x32xf32>, vector<32x32xf32>, vector<24x32xf32> -> vector<24x32xf32>
    %160 = arith.addf %157, %159 : vector<24x32xf32>
    %161 = math.tanh %160 : vector<24x32xf32>
    %c120_180 = arith.constant 120 : index
    %c0_181 = arith.constant 0 : index
    %162 = vector.load %arg22[%c120_180, %c0_181] : memref<192x32xf32, #tpu.memory_space<vmem>>, vector<24x32xf32>
    %c0_182 = arith.constant 0 : index
    %c0_183 = arith.constant 0 : index
    %163 = vector.load %arg14[%c0_182, %c0_183] : memref<32x32xf32, #tpu.memory_space<vmem>>, vector<32x32xf32>
    %cst_184 = arith.constant dense<0.000000e+00> : vector<24x32xf32>
    %164 = tpu.matmul %154, %163, %cst_184 {dimension_numbers = #tpu.dot_dimension_numbers<[1], [0], [0], [1], [0, 0, 1, 1], [], []>} : vector<24x32xf32>, vector<32x32xf32>, vector<24x32xf32> -> vector<24x32xf32>
    %165 = arith.addf %162, %164 : vector<24x32xf32>
    %166 = math.tanh %165 : vector<24x32xf32>
    %c48_185 = arith.constant 48 : index
    %c0_186 = arith.constant 0 : index
    %167 = vector.load %arg21[%c48_185, %c0_186] : memref<192x32xf32, #tpu.memory_space<vmem>>, vector<24x32xf32>
    tpu.vector_store %arg21[%c48_185, %c0_186], %161 {strides = array<i32>} : memref<192x32xf32, #tpu.memory_space<vmem>>, vector<24x32xf32>,
    %c120_187 = arith.constant 120 : index
    %c0_188 = arith.constant 0 : index
    %168 = vector.load %arg22[%c120_187, %c0_188] : memref<192x32xf32, #tpu.memory_space<vmem>>, vector<24x32xf32>
    tpu.vector_store %arg22[%c120_187, %c0_188], %166 {strides = array<i32>} : memref<192x32xf32, #tpu.memory_space<vmem>>, vector<24x32xf32>,
    %c72_189 = arith.constant 72 : index
    %c0_190 = arith.constant 0 : index
    %169 = vector.load %arg21[%c72_189, %c0_190] : memref<192x32xf32, #tpu.memory_space<vmem>>, vector<24x32xf32>
    %c0_191 = arith.constant 0 : index
    %c0_192 = arith.constant 0 : index
    %170 = vector.load %arg10[%c0_191, %c0_192] : memref<32x32xf32, #tpu.memory_space<vmem>>, vector<32x32xf32>
    %cst_193 = arith.constant dense<0.000000e+00> : vector<24x32xf32>
    %171 = tpu.matmul %161, %170, %cst_193 {dimension_numbers = #tpu.dot_dimension_numbers<[1], [0], [0], [1], [0, 0, 1, 1], [], []>} : vector<24x32xf32>, vector<32x32xf32>, vector<24x32xf32> -> vector<24x32xf32>
    %172 = arith.addf %169, %171 : vector<24x32xf32>
    %173 = math.tanh %172 : vector<24x32xf32>
    %c96_194 = arith.constant 96 : index
    %c0_195 = arith.constant 0 : index
    %174 = vector.load %arg22[%c96_194, %c0_195] : memref<192x32xf32, #tpu.memory_space<vmem>>, vector<24x32xf32>
    %c0_196 = arith.constant 0 : index
    %c0_197 = arith.constant 0 : index
    %175 = vector.load %arg14[%c0_196, %c0_197] : memref<32x32xf32, #tpu.memory_space<vmem>>, vector<32x32xf32>
    %cst_198 = arith.constant dense<0.000000e+00> : vector<24x32xf32>
    %176 = tpu.matmul %166, %175, %cst_198 {dimension_numbers = #tpu.dot_dimension_numbers<[1], [0], [0], [1], [0, 0, 1, 1], [], []>} : vector<24x32xf32>, vector<32x32xf32>, vector<24x32xf32> -> vector<24x32xf32>
    %177 = arith.addf %174, %176 : vector<24x32xf32>
    %178 = math.tanh %177 : vector<24x32xf32>
    %c72_199 = arith.constant 72 : index
    %c0_200 = arith.constant 0 : index
    %179 = vector.load %arg21[%c72_199, %c0_200] : memref<192x32xf32, #tpu.memory_space<vmem>>, vector<24x32xf32>
    tpu.vector_store %arg21[%c72_199, %c0_200], %173 {strides = array<i32>} : memref<192x32xf32, #tpu.memory_space<vmem>>, vector<24x32xf32>,
    %c96_201 = arith.constant 96 : index
    %c0_202 = arith.constant 0 : index
    %180 = vector.load %arg22[%c96_201, %c0_202] : memref<192x32xf32, #tpu.memory_space<vmem>>, vector<24x32xf32>
    tpu.vector_store %arg22[%c96_201, %c0_202], %178 {strides = array<i32>} : memref<192x32xf32, #tpu.memory_space<vmem>>, vector<24x32xf32>,
    %c96_203 = arith.constant 96 : index
    %c0_204 = arith.constant 0 : index
    %181 = vector.load %arg21[%c96_203, %c0_204] : memref<192x32xf32, #tpu.memory_space<vmem>>, vector<24x32xf32>
    %c0_205 = arith.constant 0 : index
    %c0_206 = arith.constant 0 : index
    %182 = vector.load %arg10[%c0_205, %c0_206] : memref<32x32xf32, #tpu.memory_space<vmem>>, vector<32x32xf32>
    %cst_207 = arith.constant dense<0.000000e+00> : vector<24x32xf32>
    %183 = tpu.matmul %173, %182, %cst_207 {dimension_numbers = #tpu.dot_dimension_numbers<[1], [0], [0], [1], [0, 0, 1, 1], [], []>} : vector<24x32xf32>, vector<32x32xf32>, vector<24x32xf32> -> vector<24x32xf32>
    %184 = arith.addf %181, %183 : vector<24x32xf32>
    %185 = math.tanh %184 : vector<24x32xf32>
    %c72_208 = arith.constant 72 : index
    %c0_209 = arith.constant 0 : index
    %186 = vector.load %arg22[%c72_208, %c0_209] : memref<192x32xf32, #tpu.memory_space<vmem>>, vector<24x32xf32>
    %c0_210 = arith.constant 0 : index
    %c0_211 = arith.constant 0 : index
    %187 = vector.load %arg14[%c0_210, %c0_211] : memref<32x32xf32, #tpu.memory_space<vmem>>, vector<32x32xf32>
    %cst_212 = arith.constant dense<0.000000e+00> : vector<24x32xf32>
    %188 = tpu.matmul %178, %187, %cst_212 {dimension_numbers = #tpu.dot_dimension_numbers<[1], [0], [0], [1], [0, 0, 1, 1], [], []>} : vector<24x32xf32>, vector<32x32xf32>, vector<24x32xf32> -> vector<24x32xf32>
    %189 = arith.addf %186, %188 : vector<24x32xf32>
    %190 = math.tanh %189 : vector<24x32xf32>
    %c96_213 = arith.constant 96 : index
    %c0_214 = arith.constant 0 : index
    %191 = vector.load %arg21[%c96_213, %c0_214] : memref<192x32xf32, #tpu.memory_space<vmem>>, vector<24x32xf32>
    tpu.vector_store %arg21[%c96_213, %c0_214], %185 {strides = array<i32>} : memref<192x32xf32, #tpu.memory_space<vmem>>, vector<24x32xf32>,
    %c72_215 = arith.constant 72 : index
    %c0_216 = arith.constant 0 : index
    %192 = vector.load %arg22[%c72_215, %c0_216] : memref<192x32xf32, #tpu.memory_space<vmem>>, vector<24x32xf32>
    tpu.vector_store %arg22[%c72_215, %c0_216], %190 {strides = array<i32>} : memref<192x32xf32, #tpu.memory_space<vmem>>, vector<24x32xf32>,
    %c120_217 = arith.constant 120 : index
    %c0_218 = arith.constant 0 : index
    %193 = vector.load %arg21[%c120_217, %c0_218] : memref<192x32xf32, #tpu.memory_space<vmem>>, vector<24x32xf32>
    %c0_219 = arith.constant 0 : index
    %c0_220 = arith.constant 0 : index
    %194 = vector.load %arg10[%c0_219, %c0_220] : memref<32x32xf32, #tpu.memory_space<vmem>>, vector<32x32xf32>
    %cst_221 = arith.constant dense<0.000000e+00> : vector<24x32xf32>
    %195 = tpu.matmul %185, %194, %cst_221 {dimension_numbers = #tpu.dot_dimension_numbers<[1], [0], [0], [1], [0, 0, 1, 1], [], []>} : vector<24x32xf32>, vector<32x32xf32>, vector<24x32xf32> -> vector<24x32xf32>
    %196 = arith.addf %193, %195 : vector<24x32xf32>
    %197 = math.tanh %196 : vector<24x32xf32>
    %c48_222 = arith.constant 48 : index
    %c0_223 = arith.constant 0 : index
    %198 = vector.load %arg22[%c48_222, %c0_223] : memref<192x32xf32, #tpu.memory_space<vmem>>, vector<24x32xf32>
    %c0_224 = arith.constant 0 : index
    %c0_225 = arith.constant 0 : index
    %199 = vector.load %arg14[%c0_224, %c0_225] : memref<32x32xf32, #tpu.memory_space<vmem>>, vector<32x32xf32>
    %cst_226 = arith.constant dense<0.000000e+00> : vector<24x32xf32>
    %200 = tpu.matmul %190, %199, %cst_226 {dimension_numbers = #tpu.dot_dimension_numbers<[1], [0], [0], [1], [0, 0, 1, 1], [], []>} : vector<24x32xf32>, vector<32x32xf32>, vector<24x32xf32> -> vector<24x32xf32>
    %201 = arith.addf %198, %200 : vector<24x32xf32>
    %202 = math.tanh %201 : vector<24x32xf32>
    %c120_227 = arith.constant 120 : index
    %c0_228 = arith.constant 0 : index
    %203 = vector.load %arg21[%c120_227, %c0_228] : memref<192x32xf32, #tpu.memory_space<vmem>>, vector<24x32xf32>
    tpu.vector_store %arg21[%c120_227, %c0_228], %197 {strides = array<i32>} : memref<192x32xf32, #tpu.memory_space<vmem>>, vector<24x32xf32>,
    %c48_229 = arith.constant 48 : index
    %c0_230 = arith.constant 0 : index
    %204 = vector.load %arg22[%c48_229, %c0_230] : memref<192x32xf32, #tpu.memory_space<vmem>>, vector<24x32xf32>
    tpu.vector_store %arg22[%c48_229, %c0_230], %202 {strides = array<i32>} : memref<192x32xf32, #tpu.memory_space<vmem>>, vector<24x32xf32>,
    %c144_231 = arith.constant 144 : index
    %c0_232 = arith.constant 0 : index
    %205 = vector.load %arg21[%c144_231, %c0_232] : memref<192x32xf32, #tpu.memory_space<vmem>>, vector<24x32xf32>
    %c0_233 = arith.constant 0 : index
    %c0_234 = arith.constant 0 : index
    %206 = vector.load %arg10[%c0_233, %c0_234] : memref<32x32xf32, #tpu.memory_space<vmem>>, vector<32x32xf32>
    %cst_235 = arith.constant dense<0.000000e+00> : vector<24x32xf32>
    %207 = tpu.matmul %197, %206, %cst_235 {dimension_numbers = #tpu.dot_dimension_numbers<[1], [0], [0], [1], [0, 0, 1, 1], [], []>} : vector<24x32xf32>, vector<32x32xf32>, vector<24x32xf32> -> vector<24x32xf32>
    %208 = arith.addf %205, %207 : vector<24x32xf32>
    %209 = math.tanh %208 : vector<24x32xf32>
    %c24_236 = arith.constant 24 : index
    %c0_237 = arith.constant 0 : index
    %210 = vector.load %arg22[%c24_236, %c0_237] : memref<192x32xf32, #tpu.memory_space<vmem>>, vector<24x32xf32>
    %c0_238 = arith.constant 0 : index
    %c0_239 = arith.constant 0 : index
    %211 = vector.load %arg14[%c0_238, %c0_239] : memref<32x32xf32, #tpu.memory_space<vmem>>, vector<32x32xf32>
    %cst_240 = arith.constant dense<0.000000e+00> : vector<24x32xf32>
    %212 = tpu.matmul %202, %211, %cst_240 {dimension_numbers = #tpu.dot_dimension_numbers<[1], [0], [0], [1], [0, 0, 1, 1], [], []>} : vector<24x32xf32>, vector<32x32xf32>, vector<24x32xf32> -> vector<24x32xf32>
    %213 = arith.addf %210, %212 : vector<24x32xf32>
    %214 = math.tanh %213 : vector<24x32xf32>
    %c144_241 = arith.constant 144 : index
    %c0_242 = arith.constant 0 : index
    %215 = vector.load %arg21[%c144_241, %c0_242] : memref<192x32xf32, #tpu.memory_space<vmem>>, vector<24x32xf32>
    tpu.vector_store %arg21[%c144_241, %c0_242], %209 {strides = array<i32>} : memref<192x32xf32, #tpu.memory_space<vmem>>, vector<24x32xf32>,
    %c24_243 = arith.constant 24 : index
    %c0_244 = arith.constant 0 : index
    %216 = vector.load %arg22[%c24_243, %c0_244] : memref<192x32xf32, #tpu.memory_space<vmem>>, vector<24x32xf32>
    tpu.vector_store %arg22[%c24_243, %c0_244], %214 {strides = array<i32>} : memref<192x32xf32, #tpu.memory_space<vmem>>, vector<24x32xf32>,
    %c168_245 = arith.constant 168 : index
    %c0_246 = arith.constant 0 : index
    %217 = vector.load %arg21[%c168_245, %c0_246] : memref<192x32xf32, #tpu.memory_space<vmem>>, vector<24x32xf32>
    %c0_247 = arith.constant 0 : index
    %c0_248 = arith.constant 0 : index
    %218 = vector.load %arg10[%c0_247, %c0_248] : memref<32x32xf32, #tpu.memory_space<vmem>>, vector<32x32xf32>
    %cst_249 = arith.constant dense<0.000000e+00> : vector<24x32xf32>
    %219 = tpu.matmul %209, %218, %cst_249 {dimension_numbers = #tpu.dot_dimension_numbers<[1], [0], [0], [1], [0, 0, 1, 1], [], []>} : vector<24x32xf32>, vector<32x32xf32>, vector<24x32xf32> -> vector<24x32xf32>
    %220 = arith.addf %217, %219 : vector<24x32xf32>
    %221 = math.tanh %220 : vector<24x32xf32>
    %c0_250 = arith.constant 0 : index
    %c0_251 = arith.constant 0 : index
    %222 = vector.load %arg22[%c0_250, %c0_251] : memref<192x32xf32, #tpu.memory_space<vmem>>, vector<24x32xf32>
    %c0_252 = arith.constant 0 : index
    %c0_253 = arith.constant 0 : index
    %223 = vector.load %arg14[%c0_252, %c0_253] : memref<32x32xf32, #tpu.memory_space<vmem>>, vector<32x32xf32>
    %cst_254 = arith.constant dense<0.000000e+00> : vector<24x32xf32>
    %224 = tpu.matmul %214, %223, %cst_254 {dimension_numbers = #tpu.dot_dimension_numbers<[1], [0], [0], [1], [0, 0, 1, 1], [], []>} : vector<24x32xf32>, vector<32x32xf32>, vector<24x32xf32> -> vector<24x32xf32>
    %225 = arith.addf %222, %224 : vector<24x32xf32>
    %226 = math.tanh %225 : vector<24x32xf32>
    %c168_255 = arith.constant 168 : index
    %c0_256 = arith.constant 0 : index
    %227 = vector.load %arg21[%c168_255, %c0_256] : memref<192x32xf32, #tpu.memory_space<vmem>>, vector<24x32xf32>
    tpu.vector_store %arg21[%c168_255, %c0_256], %221 {strides = array<i32>} : memref<192x32xf32, #tpu.memory_space<vmem>>, vector<24x32xf32>,
    %c0_257 = arith.constant 0 : index
    %c0_258 = arith.constant 0 : index
    %228 = vector.load %arg22[%c0_257, %c0_258] : memref<192x32xf32, #tpu.memory_space<vmem>>, vector<24x32xf32>
    tpu.vector_store %arg22[%c0_257, %c0_258], %226 {strides = array<i32>} : memref<192x32xf32, #tpu.memory_space<vmem>>, vector<24x32xf32>,
    %c0_259 = arith.constant 0 : index
    %c0_260 = arith.constant 0 : index
    %229 = vector.load %arg21[%c0_259, %c0_260] : memref<192x32xf32, #tpu.memory_space<vmem>>, vector<192x32xf32>
    %c0_261 = arith.constant 0 : index
    %c0_262 = arith.constant 0 : index
    %230 = vector.load %arg15[%c0_261, %c0_262] : memref<32x32xf32, #tpu.memory_space<vmem>>, vector<32x32xf32>
    %cst_263 = arith.constant dense<0.000000e+00> : vector<192x32xf32>
    %231 = tpu.matmul %229, %230, %cst_263 {dimension_numbers = #tpu.dot_dimension_numbers<[1], [0], [0], [1], [0, 0, 1, 1], [], []>} : vector<192x32xf32>, vector<32x32xf32>, vector<192x32xf32> -> vector<192x32xf32>
    %c0_264 = arith.constant 0 : index
    %c0_265 = arith.constant 0 : index
    %232 = vector.load %arg22[%c0_264, %c0_265] : memref<192x32xf32, #tpu.memory_space<vmem>>, vector<192x32xf32>
    %c0_266 = arith.constant 0 : index
    %c0_267 = arith.constant 0 : index
    %233 = vector.load %arg16[%c0_266, %c0_267] : memref<32x32xf32, #tpu.memory_space<vmem>>, vector<32x32xf32>
    %cst_268 = arith.constant dense<0.000000e+00> : vector<192x32xf32>
    %234 = tpu.matmul %232, %233, %cst_268 {dimension_numbers = #tpu.dot_dimension_numbers<[1], [0], [0], [1], [0, 0, 1, 1], [], []>} : vector<192x32xf32>, vector<32x32xf32>, vector<192x32xf32> -> vector<192x32xf32>
    %235 = arith.addf %231, %234 : vector<192x32xf32>
    %c0_269 = arith.constant 0 : index
    %c0_270 = arith.constant 0 : index
    %236 = vector.load %arg17[%c0_269, %c0_270] : memref<1x32xf32, #tpu.memory_space<vmem>>, vector<1x32xf32>
    %237 = vector.broadcast %236 : vector<1x32xf32> to vector<192x32xf32>
    %238 = arith.addf %235, %237 : vector<192x32xf32>
    %239 = vector.extract_strided_slice %238 {offsets = [0, 0], sizes = [24, 32], strides = [1, 1]} : vector<192x32xf32> to vector<24x32xf32>
    %240 = vector.extract_strided_slice %238 {offsets = [24, 0], sizes = [24, 32], strides = [1, 1]} : vector<192x32xf32> to vector<24x32xf32>
    %241 = arith.maximumf %239, %240 : vector<24x32xf32>
    %242 = vector.extract_strided_slice %238 {offsets = [48, 0], sizes = [24, 32], strides = [1, 1]} : vector<192x32xf32> to vector<24x32xf32>
    %243 = arith.maximumf %241, %242 : vector<24x32xf32>
    %244 = vector.extract_strided_slice %238 {offsets = [72, 0], sizes = [24, 32], strides = [1, 1]} : vector<192x32xf32> to vector<24x32xf32>
    %245 = arith.maximumf %243, %244 : vector<24x32xf32>
    %246 = vector.extract_strided_slice %238 {offsets = [96, 0], sizes = [24, 32], strides = [1, 1]} : vector<192x32xf32> to vector<24x32xf32>
    %247 = arith.maximumf %245, %246 : vector<24x32xf32>
    %248 = vector.extract_strided_slice %238 {offsets = [120, 0], sizes = [24, 32], strides = [1, 1]} : vector<192x32xf32> to vector<24x32xf32>
    %249 = arith.maximumf %247, %248 : vector<24x32xf32>
    %250 = vector.extract_strided_slice %238 {offsets = [144, 0], sizes = [24, 32], strides = [1, 1]} : vector<192x32xf32> to vector<24x32xf32>
    %251 = arith.maximumf %249, %250 : vector<24x32xf32>
    %252 = vector.extract_strided_slice %238 {offsets = [168, 0], sizes = [24, 32], strides = [1, 1]} : vector<192x32xf32> to vector<24x32xf32>
    %253 = arith.maximumf %251, %252 : vector<24x32xf32>
    %254 = vector.extract_strided_slice %253 {offsets = [0, 0], sizes = [8, 32], strides = [1, 1]} : vector<24x32xf32> to vector<8x32xf32>
    %255 = arith.mulf %254, %254 : vector<8x32xf32>
    %cst_271 = arith.constant dense<0.000000e+00> : vector<8xf32>
    %256 = vector.multi_reduction <add>, %255, %cst_271 [1] : vector<8x32xf32> to vector<8xf32>
    %257 = vector.shape_cast %256 : vector<8xf32> to vector<8x1xf32>
    %258 = math.sqrt %257 : vector<8x1xf32>
    %cst_272 = arith.constant 9.99999996E-13 : f32
    %259 = vector.broadcast %cst_272 : f32 to vector<8x1xf32>
    %260 = arith.maximumf %258, %259 : vector<8x1xf32>
    %261 = vector.broadcast %260 : vector<8x1xf32> to vector<8x32xf32>
    %262 = arith.divf %254, %261 : vector<8x32xf32>
    %263 = vector.extract_strided_slice %253 {offsets = [8, 0], sizes = [8, 32], strides = [1, 1]} : vector<24x32xf32> to vector<8x32xf32>
    %264 = arith.mulf %263, %263 : vector<8x32xf32>
    %cst_273 = arith.constant dense<0.000000e+00> : vector<8xf32>
    %265 = vector.multi_reduction <add>, %264, %cst_273 [1] : vector<8x32xf32> to vector<8xf32>
    %266 = vector.shape_cast %265 : vector<8xf32> to vector<8x1xf32>
    %267 = math.sqrt %266 : vector<8x1xf32>
    %cst_274 = arith.constant 9.99999996E-13 : f32
    %268 = vector.broadcast %cst_274 : f32 to vector<8x1xf32>
    %269 = arith.maximumf %267, %268 : vector<8x1xf32>
    %270 = vector.broadcast %269 : vector<8x1xf32> to vector<8x32xf32>
    %271 = arith.divf %263, %270 : vector<8x32xf32>
    %272 = vector.extract_strided_slice %253 {offsets = [16, 0], sizes = [8, 32], strides = [1, 1]} : vector<24x32xf32> to vector<8x32xf32>
    %273 = arith.mulf %272, %272 : vector<8x32xf32>
    %cst_275 = arith.constant dense<0.000000e+00> : vector<8xf32>
    %274 = vector.multi_reduction <add>, %273, %cst_275 [1] : vector<8x32xf32> to vector<8xf32>
    %275 = vector.shape_cast %274 : vector<8xf32> to vector<8x1xf32>
    %276 = math.sqrt %275 : vector<8x1xf32>
    %cst_276 = arith.constant 9.99999996E-13 : f32
    %277 = vector.broadcast %cst_276 : f32 to vector<8x1xf32>
    %278 = arith.maximumf %276, %277 : vector<8x1xf32>
    %279 = vector.broadcast %278 : vector<8x1xf32> to vector<8x32xf32>
    %280 = arith.divf %272, %279 : vector<8x32xf32>
    %281 = arith.mulf %262, %271 : vector<8x32xf32>
    %cst_277 = arith.constant dense<0.000000e+00> : vector<8xf32>
    %282 = vector.multi_reduction <add>, %281, %cst_277 [1] : vector<8x32xf32> to vector<8xf32>
    %283 = vector.shape_cast %282 : vector<8xf32> to vector<8x1xf32>
    %cst_278 = arith.constant 1.000000e+00 : f32
    %284 = vector.broadcast %cst_278 : f32 to vector<8x1xf32>
    %285 = arith.subf %284, %283 : vector<8x1xf32>
    %286 = arith.mulf %262, %280 : vector<8x32xf32>
    %cst_279 = arith.constant dense<0.000000e+00> : vector<8xf32>
    %287 = vector.multi_reduction <add>, %286, %cst_279 [1] : vector<8x32xf32> to vector<8xf32>
    %288 = vector.shape_cast %287 : vector<8xf32> to vector<8x1xf32>
    %cst_280 = arith.constant 1.000000e+00 : f32
    %289 = vector.broadcast %cst_280 : f32 to vector<8x1xf32>
    %290 = arith.subf %289, %288 : vector<8x1xf32>
    %291 = arith.subf %285, %290 : vector<8x1xf32>
    %cst_281 = arith.constant 1.000000e-01 : f32
    %292 = vector.broadcast %cst_281 : f32 to vector<8x1xf32>
    %293 = arith.addf %291, %292 : vector<8x1xf32>
    %294 = tpu.iota {dimensions = array<i32: 0>} : vector<8x1xi32>
    %c2_i32 = arith.constant 2 : i32
    %295 = vector.broadcast %c2_i32 : i32 to vector<8x1xi32>
    %296 = arith.cmpi slt, %294, %295 : vector<8x1xi32>
    %cst_282 = arith.constant 0.000000e+00 : f32
    %297 = vector.broadcast %cst_282 : f32 to vector<8x1xf32>
    %298 = arith.cmpf ogt, %293, %297 : vector<8x1xf32>
    %299 = arith.andi %298, %296 : vector<8x1xi1>
    %cst_283 = arith.constant 0.000000e+00 : f32
    %300 = vector.broadcast %cst_283 : f32 to vector<8x1xf32>
    %301 = arith.select %299, %293, %300 : vector<8x1xi1>, vector<8x1xf32>
    %cst_284 = arith.constant dense<0.000000e+00> : vector<1xf32>
    %302 = vector.multi_reduction <add>, %301, %cst_284 [0] : vector<8x1xf32> to vector<1xf32>
    %303 = vector.shape_cast %302 : vector<1xf32> to vector<1x1xf32>
    %304 = arith.extui %299 : vector<8x1xi1> to vector<8x1xi32>
    %305 = arith.sitofp %304 : vector<8x1xi32> to vector<8x1xf32>
    %cst_285 = arith.constant dense<0.000000e+00> : vector<1xf32>
    %306 = vector.multi_reduction <add>, %305, %cst_285 [0] : vector<8x1xf32> to vector<1xf32>
    %307 = vector.shape_cast %306 : vector<1xf32> to vector<1x1xf32>
    %cst_286 = arith.constant 0.000000e+00 : f32
    %308 = vector.broadcast %cst_286 : f32 to vector<1x1xf32>
    %309 = arith.cmpf ogt, %307, %308 : vector<1x1xf32>
    %cst_287 = arith.constant 1.000000e+00 : f32
    %310 = vector.broadcast %cst_287 : f32 to vector<1x1xf32>
    %311 = arith.maximumf %307, %310 : vector<1x1xf32>
    %312 = arith.divf %303, %311 : vector<1x1xf32>
    %cst_288 = arith.constant 0.000000e+00 : f32
    %313 = vector.broadcast %cst_288 : f32 to vector<1x1xf32>
    %314 = arith.select %309, %312, %313 : vector<1x1xi1>, vector<1x1xf32>
    %c0_289 = arith.constant 0 : index
    %c0_290 = arith.constant 0 : index
    %315 = vector.load %arg18[%c0_289, %c0_290] : memref<1x1xf32, #tpu.memory_space<vmem>>, vector<1x1xf32>
    tpu.vector_store %arg18[%c0_289, %c0_290], %314 {strides = array<i32>} : memref<1x1xf32, #tpu.memory_space<vmem>>, vector<1x1xf32>,
    return
  }
}

</mosaic_0001>

<bundles_post_ra>
// kernel: _lambda_.1
= control target key start
LH: loop header
LB: loop body
LE: loop exit
PB: predicated region body
PF: predicated region fallthrough
CT: control target
= control target key end

     0   :  { %s9249_s0 = inlined_call_operand.vmem [shape: f32[192,32], index: 0, kind: input, shape index: {}]   ;;  %s9250_s1 = inlined_call_operand.vmem [shape: f32[32,32], index: 1, kind: input, shape index: {}]   ;;  %s9251_s2 = inlined_call_operand.vmem [shape: f32[1,32], index: 2, kind: input, shape index: {}]   ;;  %s9252_s3 = inlined_call_operand.vmem [shape: f32[32,32], index: 3, kind: input, shape index: {}]   ;;  %s9253_s4 = inlined_call_operand.vmem [shape: f32[32,32], index: 4, kind: input, shape index: {}]   ;;  %s9254_s5 = inlined_call_operand.vmem [shape: f32[1,32], index: 5, kind: input, shape index: {}]   ;;  %s9255_s6 = inlined_call_operand.vmem [shape: f32[32,32], index: 6, kind: input, shape index: {}]   ;;  %s9256_s7 = inlined_call_operand.vmem [shape: f32[32,32], index: 7, kind: input, shape index: {}]   ;;  %s9257_s8 = inlined_call_operand.vmem [shape: f32[32,32], index: 8, kind: input, shape index: {}]   ;;  %s9258_s9 = inlined_call_operand.vmem [shape: f32[1,32], index: 9, kind: input, shape index: {}]   ;;  %s9259_s10 = inlined_call_operand.vmem [shape: f32[32,32], index: 10, kind: input, shape index: {}]   ;;  %s9260_s11 = inlined_call_operand.vmem [shape: f32[32,32], index: 11, kind: input, shape index: {}]   ;;  %s9261_s12 = inlined_call_operand.vmem [shape: f32[32,32], index: 12, kind: input, shape index: {}]   ;;  %s9262_s13 = inlined_call_operand.vmem [shape: f32[1,32], index: 13, kind: input, shape index: {}]   ;;  %s9263_s14 = inlined_call_operand.vmem [shape: f32[32,32], index: 14, kind: input, shape index: {}]   ;;  %s9264_s15 = inlined_call_operand.vmem [shape: f32[32,32], index: 15, kind: input, shape index: {}]   ;;  %s9265_s16 = inlined_call_operand.vmem [shape: f32[32,32], index: 16, kind: input, shape index: {}]   ;;  %s9266_s17 = inlined_call_operand.vmem [shape: f32[1,32], index: 17, kind: input, shape index: {}]   ;;  %s9267_s18 = inlined_call_operand.hbm [shape: f32[1,1], index: 18, kind: output, shape index: {}]  }
   0x1   :  { %9270 = sst [smem:[#allocation9_spill]] %s9249_s0 }
   0x2   :  { %9271 = sst [smem:[#allocation10_spill]] %s9250_s1 }
   0x3   :  { %9272 = sst [smem:[#allocation11_spill]] %s9251_s2 }
   0x4   :  { %s9273_s29 = sld [smem:[#allocation10_spill]]  ;;  %vm95_vm0 = vcmask 261120   ;;  %s9274_s23 = sld [smem:[#allocation9_spill]]  ;;  %v7887_v6 = vmov 0.0|0.0   ;;  %v377_v8 = vld [vmem:[%s9253_s4] sm:$0xff]  ;;  %v378_v9 = vld [vmem:[%s9253_s4 + $0x8] sm:$0xff] }
   0x5   :  { %7341 = vmatprep.subr.bf16.mxu0 %v7887_v6  ;;  %v600_v10 = vld [vmem:[%s9252_s3] sm:$0xff]  ;;  %vm7888_vm1 = vmmov 0   ;;  %v7889_v11 = vmov 0.0   ;;  %v601_v12 = vld [vmem:[%s9252_s3 + $0x8] sm:$0xff]  ;;  %v602_v14 = vld [vmem:[%s9252_s3 + $0x10] sm:$0xff]  ;;  %v7333_v16 = vpack.c.bf16 %v378_v9, %v377_v8 }
   0x6   :  { %6525 = vmatprep.mubr.msk.f32.mxu0 %vm7888_vm1, %v7889_v11  ;;  %v8020_v13 = vpack.c.bf16 %v601_v12, %v600_v10  ;;  %v603_v15 = vld [vmem:[%s9252_s3 + $0x18] sm:$0xff]  ;;  %v379_v19 = vld [vmem:[%s9253_s4 + $0x10] sm:$0xff] }
   0x7   :  { %v8029_v17 = vpack.c.bf16 %v603_v15, %v602_v14  ;;  %v380_v20 = vld [vmem:[%s9253_s4 + $0x18] sm:$0xff] }
   0x8   :  { %7343 = vmatpush3.bf16.msra.mxu0 %v8020_v13  ;;  %v7337_v22 = vpack.c.bf16 %v380_v20, %v379_v19 }
   0x9   :  { %7344 = vmatprep.subr.bf16.mxu0 %v7887_v6 }
   0xa   :  { %v84_v0 = vld [vmem:[%s9273_s29] sm:$0xff]  ;;  %v85_v1 = vld [vmem:[%s9273_s29 + $0x8] sm:$0xff]  ;;  %v86_v2 = vld [vmem:[%s9273_s29 + $0x10] sm:$0xff] }
   0xb   :  { %v7325_v3 = vpack.c.bf16 %v85_v1, %v84_v0  ;;  %v87_v4 = vld [vmem:[%s9273_s29 + $0x18] sm:$0xff]  ;;  %v8001_v5 = vld [vmem:[%s9274_s23] sm:$0xff]  ;;  %v8035_v18 = vld [vmem:[%s9274_s23 + $0x8] sm:$0xff] }
   0xc   :  { %v7329_v7 = vpack.c.bf16 %v87_v4, %v86_v2  ;;  %6437 = vmatprep.mubr.msk.f32.mxu1 %vm95_vm0, %v8001_v5  ;;  %v8046_v21 = vld [vmem:[%s9274_s23 + $0x10] sm:$0xff]  ;;  %7346 = vmatpush3.bf16.msra.mxu0 %v8029_v17  ;;  %v8057_v23 = vld [vmem:[%s9274_s23 + $0x18] sm:$0xff]  ;;  %v8062_v24 = vld [vmem:[%s9274_s23 + $0x20] sm:$0xff] }
   0xd   :  { %7326 = vmatprep.subr.bf16.mxu1 %v7325_v3  ;;  %7353 = vmatprep.subr.bf16.mxu0 %v7887_v6 }
   0xe   :  { %7328 = vmatpush3.bf16.msra.mxu1 %v7325_v3 }
   0xf   :  { %7330 = vmatprep.subr.bf16.mxu1 %v7329_v7  ;;  %6526 = vmatmul.mubr.f32.vlgmr.msra.gmra.mrb[0].mxu0 %v7889_v11 }
  0x12   :  { %7332 = vmatpush3.bf16.msra.mxu1 %v7329_v7 }
  0x13   :  { %7334 = vmatprep.subr.bf16.mxu1 %v7333_v16 }
  0x15   :  { %6438 = vmatmul.mubr.msk.f32.vlgmr.msra.gmra.mrb[0].mxu1 %vm95_vm0, %v8035_v18 }
  0x16   :  { %7336 = vmatpush3.bf16.msra.mxu1 %v7333_v16  ;;  %6440 = vmatprep.mubr.msk.f32.mxu1 %vm95_vm0, %v8046_v21 }
  0x17   :  { %7338 = vmatprep.subr.bf16.mxu1 %v7337_v22 }
  0x18   :  { %23 = vsyncpa [#allocation7], 0  ;;  %6528 = vmatprep.mubr.msk.f32.mxu0 %vm7888_vm1, %v7889_v11  ;;  %7355 = vmatpush3.bf16.msra.mxu0 %v8020_v13  ;;  %v65_v25 = vld [vmem:[%s9274_s23 + $0x28] sm:$0xff]  ;;  %v66_v26 = vld [vmem:[%s9274_s23 + $0x30] sm:$0xff]  ;;  %s9275_s21 = sld [smem:[#allocation11_spill]]  ;;  %vm5683_vm11 = vcmask 0  }
  0x19   :  { %6441 = vmatmul.mubr.msk.f32.gmra.mrb[2].mxu1 %vm95_vm0, %v8057_v23  ;;  %7356 = vmatprep.subr.bf16.mxu0 %v7887_v6  ;;  %v67_v27 = vld [vmem:[%s9274_s23 + $0x38] sm:$0xff]  ;;  %v68_v28 = vld [vmem:[%s9274_s23 + $0x40] sm:$0xff]  ;;  %v69_v29 = vld [vmem:[%s9274_s23 + $0x48] sm:$0xff] }
  0x1a   :  { %6443 = vmatprep.mubr.msk.f32.mxu1 %vm95_vm0, %v8062_v24  ;;  %7340 = vmatpush3.bf16.msra.mxu1 %v7337_v22  ;;  %v70_v30 = vld [vmem:[%s9274_s23 + $0x50] sm:$0xff]  ;;  %v71_v31 = vld [vmem:[%s9274_s23 + $0x58] sm:$0xff]  ;;  %v72_v32 = vld [vmem:[%s9274_s23 + $0x60] sm:$0xff] }
  0x1b   :  { %6529 = vmatmul.mubr.f32.gmra.mrb[2].mxu0 %v7889_v11  ;;  %7347 = vmatprep.subr.bf16.mxu1 %v7887_v6  ;;  %v73_v33 = vld [vmem:[%s9274_s23 + $0x68] sm:$0xff]  ;;  %v74_v34 = vld [vmem:[%s9274_s23 + $0x70] sm:$0xff]  ;;  %v75_v35 = vld [vmem:[%s9274_s23 + $0x78] sm:$0xff] }
  0x1c   :  { %6531 = vmatprep.mubr.msk.f32.mxu0 %vm7888_vm1, %v7889_v11  ;;  %7358 = vmatpush3.bf16.msra.mxu0 %v8029_v17  ;;  %v76_v36 = vld [vmem:[%s9274_s23 + $0x80] sm:$0xff]  ;;  %v77_v37 = vld [vmem:[%s9274_s23 + $0x88] sm:$0xff]  ;;  %v78_v38 = vld [vmem:[%s9274_s23 + $0x90] sm:$0xff] }
  0x1d   :  { %6444 = vmatmul.mubr.msk.f32.gmra.mrb[4].mxu1 %vm95_vm0, %v65_v25  ;;  %7365 = vmatprep.subr.bf16.mxu0 %v7887_v6  ;;  %v79_v39 = vld [vmem:[%s9274_s23 + $0x98] sm:$0xff]  ;;  %v80_v40 = vld [vmem:[%s9274_s23 + $0xa0] sm:$0xff]  ;;  %v81_v41 = vld [vmem:[%s9274_s23 + $0xa8] sm:$0xff] }
  0x1e   :  { %6446 = vmatprep.mubr.msk.f32.mxu1 %vm95_vm0, %v66_v26  ;;  %v82_v42 = vld [vmem:[%s9274_s23 + $0xb0] sm:$0xff]  ;;  %v83_v43 = vld [vmem:[%s9274_s23 + $0xb8] sm:$0xff]  ;;  %v696_v44 = vld [vmem:[%s9255_s6] sm:$0xff] }
  0x1f   :  { %6532 = vmatmul.mubr.f32.gmra.mrb[4].mxu0 %v7889_v11  ;;  %v697_v45 = vld [vmem:[%s9255_s6 + $0x8] sm:$0xff]  ;;  %v698_v47 = vld [vmem:[%s9255_s6 + $0x10] sm:$0xff]  ;;  %v699_v48 = vld [vmem:[%s9255_s6 + $0x18] sm:$0xff] }
  0x20   :  { %6559 = vmatprep.mubr.msk.f32.mxu0 %vm7888_vm1, %v7889_v11  ;;  %v8166_v46 = vpack.c.bf16 %v697_v45, %v696_v44  ;;  %v8179_v49 = vpack.c.bf16 %v699_v48, %v698_v47  ;;  %v8225_v50 = vld [vmem:[%s9275_s21] ss:$0 sm:$0xff] }
  0x21   :  { %6447 = vmatmul.mubr.msk.f32.gmra.mrb[6].mxu1 %vm95_vm0, %v67_v27 }
  0x22   :  { %6449 = vmatprep.mubr.msk.f32.mxu1 %vm95_vm0, %v68_v28 }
  0x25   :  { %6450 = vmatmul.mubr.msk.f32.gmra.mrb[8].mxu1 %vm95_vm0, %v69_v29 }
  0x26   :  { %6452 = vmatprep.mubr.msk.f32.mxu1 %vm95_vm0, %v70_v30 }
  0x29   :  { %6453 = vmatmul.mubr.msk.f32.gmra.mrb[10].mxu1 %vm95_vm0, %v71_v31 }
  0x2a   :  { %6455 = vmatprep.mubr.msk.f32.mxu1 %vm95_vm0, %v72_v32 }
  0x2d   :  { %6456 = vmatmul.mubr.msk.f32.gmra.mrb[12].mxu1 %vm95_vm0, %v73_v33 }
  0x2e   :  { %6458 = vmatprep.mubr.msk.f32.mxu1 %vm95_vm0, %v74_v34 }
  0x31   :  { %6459 = vmatmul.mubr.msk.f32.gmra.mrb[14].mxu1 %vm95_vm0, %v75_v35 }
  0x32   :  { %6461 = vmatprep.mubr.msk.f32.mxu1 %vm95_vm0, %v76_v36 }
  0x35   :  { %6462 = vmatmul.mubr.msk.f32.gmra.mrb[16].mxu1 %vm95_vm0, %v77_v37 }
  0x36   :  { %6464 = vmatprep.mubr.msk.f32.mxu1 %vm95_vm0, %v78_v38 }
  0x39   :  { %6465 = vmatmul.mubr.msk.f32.gmra.mrb[18].mxu1 %vm95_vm0, %v79_v39 }
  0x3a   :  { %6467 = vmatprep.mubr.msk.f32.mxu1 %vm95_vm0, %v80_v40 }
  0x3d   :  { %6468 = vmatmul.mubr.msk.f32.gmra.mrb[20].mxu1 %vm95_vm0, %v81_v41 }
  0x3e   :  { %6470 = vmatprep.mubr.msk.f32.mxu1 %vm95_vm0, %v82_v42 }
  0x41   :  { %6471 = vmatmul.mubr.msk.f32.gmra.mrb[22].mxu1 %vm95_vm0, %v83_v43 }
  0x42   :  { %6481 = vmatprep.mubr.msk.f32.mxu1 %vm95_vm0, %v8001_v5 }
  0x45   :  { %6482 = vmatmul.mubr.msk.f32.vlgmr.msra.gmra.mrb[24].mxu1 %vm95_vm0, %v8035_v18 }
  0x46   :  { %6484 = vmatprep.mubr.msk.f32.mxu1 %vm95_vm0, %v8046_v21  ;;  %7349 = vmatpush3.bf16.msra.mxu1 %v8166_v46 }
  0x47   :  { %7350 = vmatprep.subr.bf16.mxu1 %v7887_v6 }
  0x49   :  { %6485 = vmatmul.mubr.msk.f32.gmra.mrb[26].mxu1 %vm95_vm0, %v8057_v23 }
  0x4a   :  { %6487 = vmatprep.mubr.msk.f32.mxu1 %vm95_vm0, %v8062_v24  ;;  %7352 = vmatpush3.bf16.msra.mxu1 %v8179_v49 }
  0x4b   :  { %7359 = vmatprep.subr.bf16.mxu1 %v7887_v6 }
  0x4d   :  { %6488 = vmatmul.mubr.msk.f32.gmra.mrb[28].mxu1 %vm95_vm0, %v65_v25 }
  0x4e   :  { %6490 = vmatprep.mubr.msk.f32.mxu1 %vm95_vm0, %v66_v26 }
  0x51   :  { %6491 = vmatmul.mubr.msk.f32.gmra.mrb[30].mxu1 %vm95_vm0, %v67_v27 }
  0x52   :  { %6493 = vmatprep.mubr.msk.f32.mxu1 %vm95_vm0, %v68_v28 }
  0x55   :  { %6494 = vmatmul.mubr.msk.f32.gmra.mrb[32].mxu1 %vm95_vm0, %v69_v29 }
  0x56   :  { %6496 = vmatprep.mubr.msk.f32.mxu1 %vm95_vm0, %v70_v30 }
  0x59   :  { %6497 = vmatmul.mubr.msk.f32.gmra.mrb[34].mxu1 %vm95_vm0, %v71_v31 }
  0x5a   :  { %6499 = vmatprep.mubr.msk.f32.mxu1 %vm95_vm0, %v72_v32 }
  0x5d   :  { %6500 = vmatmul.mubr.msk.f32.gmra.mrb[36].mxu1 %vm95_vm0, %v73_v33 }
  0x5e   :  { %6502 = vmatprep.mubr.msk.f32.mxu1 %vm95_vm0, %v74_v34 }
  0x61   :  { %6503 = vmatmul.mubr.msk.f32.gmra.mrb[38].mxu1 %vm95_vm0, %v75_v35 }
  0x62   :  { %6505 = vmatprep.mubr.msk.f32.mxu1 %vm95_vm0, %v76_v36 }
  0x65   :  { %6506 = vmatmul.mubr.msk.f32.gmra.mrb[40].mxu1 %vm95_vm0, %v77_v37 }
  0x66   :  { %6508 = vmatprep.mubr.msk.f32.mxu1 %vm95_vm0, %v78_v38 }
  0x69   :  { %6509 = vmatmul.mubr.msk.f32.gmra.mrb[42].mxu1 %vm95_vm0, %v79_v39 }
  0x6a   :  { %6511 = vmatprep.mubr.msk.f32.mxu1 %vm95_vm0, %v80_v40 }
  0x6d   :  { %6512 = vmatmul.mubr.msk.f32.gmra.mrb[44].mxu1 %vm95_vm0, %v81_v41 }
  0x6e   :  { %6514 = vmatprep.mubr.msk.f32.mxu1 %vm95_vm0, %v82_v42 }
  0x71   :  { %6515 = vmatmul.mubr.msk.f32.gmra.mrb[46].mxu1 %vm95_vm0, %v83_v43 }
  0x72   :  { %6542 = vmatprep.mubr.msk.f32.mxu1 %vm7888_vm1, %v7889_v11 }
  0x75   :  { %6543 = vmatmul.mubr.f32.vlgmr.msra.gmra.mrb[48].mxu1 %v7889_v11 }
  0x76   :  { %6545 = vmatprep.mubr.msk.f32.mxu1 %vm7888_vm1, %v7889_v11  ;;  %7361 = vmatpush3.bf16.msra.mxu1 %v8166_v46 }
  0x77   :  { %7362 = vmatprep.subr.bf16.mxu1 %v7887_v6 }
  0x79   :  { %6546 = vmatmul.mubr.f32.gmra.mrb[50].mxu1 %v7889_v11 }
  0x7a   :  { %6548 = vmatprep.mubr.msk.f32.mxu1 %vm7888_vm1, %v7889_v11  ;;  %7364 = vmatpush3.bf16.msra.mxu1 %v8179_v49 }
  0x7b   :  { %7371 = vmatprep.subr.bf16.mxu1 %v7887_v6 }
  0x7d   :  { %6549 = vmatmul.mubr.f32.gmra.mrb[52].mxu1 %v7889_v11 }
  0x7e   :  { %6576 = vmatprep.mubr.msk.f32.mxu1 %vm7888_vm1, %v7889_v11 }
  0xe2   :  { %v673_v55 = vpop.f32.mrb[0].mxu0 }
  0xe3   :  { %v6527_v56 = vpop.f32.mrb[1].mxu0 }
  0xe8   :  { %v6439_v51 = vpop.f32.mrb[0].mxu1 }
  0xe9   :  { %v240_v52 = vadd.f32 %v6439_v51, %v8225_v50  ;;  %v234_v53 = vpop.f32.mrb[1].mxu1 }
  0xea   :  { %v235_v54 = vadd.f32 %v8225_v50, %v234_v53 }
  0xeb   :  { %354 = vst.msk [vmem:[#allocation2 + $0x8] sm:$0xff] %vm95_vm0, %v240_v52 }
  0xec   :  { %353 = vst.msk [vmem:[#allocation2] sm:$0xff] %vm95_vm0, %v235_v54  ;;  %v6442_v57 = vpop.f32.mrb[2].mxu1 }
  0xed   :  { %v250_v58 = vadd.f32 %v6442_v57, %v8225_v50  ;;  %v244_v59 = vpop.f32.mrb[3].mxu1  ;;  %v8292_v57 = vld [vmem:[%s9254_s5] ss:$0 sm:$0xff] }
  0xee   :  { %v245_v60 = vadd.f32 %v8225_v50, %v244_v59  ;;  %v678_v61 = vpop.f32.mrb[2].mxu0 }
  0xef   :  { %356 = vst.msk [vmem:[#allocation2 + $0x18] sm:$0xff] %vm95_vm0, %v250_v58  ;;  %v6530_v62 = vpop.f32.mrb[3].mxu0 }
  0xf0   :  { %355 = vst.msk [vmem:[#allocation2 + $0x10] sm:$0xff] %vm95_vm0, %v245_v60  ;;  %v6445_v63 = vpop.f32.mrb[4].mxu1 }
  0xf1   :  { %v260_v0 = vadd.f32 %v6445_v63, %v8225_v50  ;;  %v254_v1 = vpop.f32.mrb[5].mxu1 }
  0xf2   :  { %v255_v2 = vadd.f32 %v8225_v50, %v254_v1  ;;  %v598_v3 = vld [vmem:[#allocation2 + $0x8] sm:$0xff]  ;;  %v683_v4 = vpop.f32.mrb[4].mxu0 }
  0xf3   :  { %358 = vst.msk [vmem:[#allocation2 + $0x28] sm:$0xff] %vm95_vm0, %v260_v0  ;;  %v597_v5 = vld [vmem:[#allocation2] sm:$0xff]  ;;  %v688_v7 = vadd.f32 %v678_v61, %v598_v3  ;;  %v6533_v8 = vpop.f32.mrb[5].mxu0 }
  0xf4   :  { %357 = vst.msk [vmem:[#allocation2 + $0x20] sm:$0xff] %vm95_vm0, %v255_v2  ;;  %v687_v9 = vadd.f32 %v673_v55, %v597_v5  ;;  %v6448_v10 = vpop.f32.mrb[6].mxu1 }
  0xf5   :  { %7657 = vtanh.f32 %v688_v7  ;;  %v270_v12 = vadd.f32 %v6448_v10, %v8225_v50  ;;  %v264_v14 = vpop.f32.mrb[7].mxu1 }
  0xf6   :  { %7659 = vtanh.f32 %v687_v9  ;;  %v265_v15 = vadd.f32 %v8225_v50, %v264_v14 }
  0xf7   :  { %360 = vst.msk [vmem:[#allocation2 + $0x38] sm:$0xff] %vm95_vm0, %v270_v12  ;;  %v599_v16 = vld [vmem:[#allocation2 + $0x10] sm:$0xff] }
  0xf8   :  { %359 = vst.msk [vmem:[#allocation2 + $0x30] sm:$0xff] %vm95_vm0, %v265_v15  ;;  %v689_v18 = vadd.f32 %v683_v4, %v599_v16  ;;  %v6451_v19 = vpop.f32.mrb[8].mxu1 }
  0xf9   :  { %v280_v20 = vadd.f32 %v6451_v19, %v8225_v50  ;;  %v274_v21 = vpop.f32.mrb[9].mxu1 }
  0xfa   :  { %7661 = vtanh.f32 %v689_v18  ;;  %v275_v22 = vadd.f32 %v8225_v50, %v274_v21 }
  0xfb   :  { %362 = vst.msk [vmem:[#allocation2 + $0x48] sm:$0xff] %vm95_vm0, %v280_v20 }
  0xfc   :  { %361 = vst.msk [vmem:[#allocation2 + $0x40] sm:$0xff] %vm95_vm0, %v275_v22  ;;  %v6454_v23 = vpop.f32.mrb[10].mxu1 }
  0xfd   :  { %v290_v24 = vadd.f32 %v6454_v23, %v8225_v50  ;;  %v284_v25 = vpop.f32.mrb[11].mxu1 }
  0xfe   :  { %v285_v26 = vadd.f32 %v8225_v50, %v284_v25 }
  0xff   :  { %v7658_v27 = vpop.eup %7657  ;;  %364 = vst.msk [vmem:[#allocation2 + $0x58] sm:$0xff] %vm95_vm0, %v290_v24 }
 0x100   :  { %v7660_v28 = vpop.eup %7659  ;;  %787 = vst.msk [vmem:[#allocation2 + $0x8] sm:$0xff] %vm95_vm0, %v7658_v27  ;;  %363 = vst.msk [vmem:[#allocation2 + $0x50] sm:$0xff] %vm95_vm0, %v285_v26  ;;  %v6457_v29 = vpop.f32.mrb[12].mxu1 }
 0x101   :  { %786 = vst.msk [vmem:[#allocation2] sm:$0xff] %vm95_vm0, %v7660_v28  ;;  %v300_v30 = vadd.f32 %v6457_v29, %v8225_v50  ;;  %v294_v31 = vpop.f32.mrb[13].mxu1  ;;  %6560 = vmatmul.mubr.msk.f32.vlgmr.msra.gmra.mrb[6].mxu0 %vm95_vm0, %v7660_v28 }
 0x102   :  { %v295_v32 = vadd.f32 %v8225_v50, %v294_v31  ;;  %6562 = vmatprep.mubr.msk.f32.mxu0 %vm7888_vm1, %v7889_v11  ;;  %7367 = vmatpush3.bf16.msra.mxu0 %v8020_v13 }
 0x103   :  { %366 = vst.msk [vmem:[#allocation2 + $0x68] sm:$0xff] %vm95_vm0, %v300_v30  ;;  %7368 = vmatprep.subr.bf16.mxu0 %v7887_v6 }
 0x104   :  { %v7662_v33 = vpop.eup %7661  ;;  %365 = vst.msk [vmem:[#allocation2 + $0x60] sm:$0xff] %vm95_vm0, %v295_v32  ;;  %v6460_v34 = vpop.f32.mrb[14].mxu1 }
 0x105   :  { %788 = vst.msk [vmem:[#allocation2 + $0x10] sm:$0xff] %vm95_vm0, %v7662_v33  ;;  %v310_v35 = vadd.f32 %v6460_v34, %v8225_v50  ;;  %v304_v36 = vpop.f32.mrb[15].mxu1  ;;  %6563 = vmatmul.mubr.msk.f32.gmra.mrb[8].mxu0 %vm95_vm0, %v7658_v27 }
 0x106   :  { %v305_v37 = vadd.f32 %v8225_v50, %v304_v36  ;;  %6565 = vmatprep.mubr.msk.f32.mxu0 %vm7888_vm1, %v7889_v11  ;;  %7370 = vmatpush3.bf16.msra.mxu0 %v8029_v17 }
 0x107   :  { %368 = vst.msk [vmem:[#allocation2 + $0x78] sm:$0xff] %vm95_vm0, %v310_v35  ;;  %7377 = vmatprep.subr.bf16.mxu0 %v7887_v6 }
 0x108   :  { %367 = vst.msk [vmem:[#allocation2 + $0x70] sm:$0xff] %vm95_vm0, %v305_v37  ;;  %v6463_v38 = vpop.f32.mrb[16].mxu1 }
 0x109   :  { %v320_v39 = vadd.f32 %v6463_v38, %v8225_v50  ;;  %v314_v40 = vpop.f32.mrb[17].mxu1  ;;  %6566 = vmatmul.mubr.msk.f32.gmra.mrb[10].mxu0 %vm95_vm0, %v7662_v33 }
 0x10a   :  { %v315_v41 = vadd.f32 %v8225_v50, %v314_v40  ;;  %6593 = vmatprep.mubr.msk.f32.mxu0 %vm7888_vm1, %v7889_v11 }
 0x10b   :  { %370 = vst.msk [vmem:[#allocation2 + $0x88] sm:$0xff] %vm95_vm0, %v320_v39 }
 0x10c   :  { %369 = vst.msk [vmem:[#allocation2 + $0x80] sm:$0xff] %vm95_vm0, %v315_v41  ;;  %v6466_v42 = vpop.f32.mrb[18].mxu1 }
 0x10d   :  { %v330_v43 = vadd.f32 %v6466_v42, %v8225_v50  ;;  %v324_v44 = vpop.f32.mrb[19].mxu1 }
 0x10e   :  { %v325_v45 = vadd.f32 %v8225_v50, %v324_v44 }
 0x10f   :  { %372 = vst.msk [vmem:[#allocation2 + $0x98] sm:$0xff] %vm95_vm0, %v330_v43 }
 0x110   :  { %371 = vst.msk [vmem:[#allocation2 + $0x90] sm:$0xff] %vm95_vm0, %v325_v45  ;;  %v6469_v47 = vpop.f32.mrb[20].mxu1 }
 0x111   :  { %v340_v48 = vadd.f32 %v6469_v47, %v8225_v50  ;;  %v334_v51 = vpop.f32.mrb[21].mxu1 }
 0x112   :  { %v335_v52 = vadd.f32 %v8225_v50, %v334_v51 }
 0x113   :  { %374 = vst.msk [vmem:[#allocation2 + $0xa8] sm:$0xff] %vm95_vm0, %v340_v48 }
 0x114   :  { %373 = vst.msk [vmem:[#allocation2 + $0xa0] sm:$0xff] %vm95_vm0, %v335_v52  ;;  %v6472_v53 = vpop.f32.mrb[22].mxu1 }
 0x115   :  { %v350_v54 = vadd.f32 %v6472_v53, %v8225_v50  ;;  %v344_v55 = vpop.f32.mrb[23].mxu1 }
 0x116   :  { %v345_v56 = vadd.f32 %v8225_v50, %v344_v55 }
 0x117   :  { %376 = vst.msk [vmem:[#allocation2 + $0xb8] sm:$0xff] %vm95_vm0, %v350_v54 }
 0x118   :  { %375 = vst.msk [vmem:[#allocation2 + $0xb0] sm:$0xff] %vm95_vm0, %v345_v56  ;;  %v6483_v58 = vpop.f32.mrb[24].mxu1 }
 0x119   :  { %v460_v59 = vadd.f32 %v6483_v58, %v8292_v57  ;;  %v454_v60 = vpop.f32.mrb[25].mxu1 }
 0x11a   :  { %v455_v61 = vadd.f32 %v8292_v57, %v454_v60 }
 0x11b   :  { %574 = vst.msk [vmem:[#allocation3 + $0x8] sm:$0xff] %vm95_vm0, %v460_v59 }
 0x11c   :  { %573 = vst.msk [vmem:[#allocation3] sm:$0xff] %vm95_vm0, %v455_v61  ;;  %v6486_v50 = vpop.f32.mrb[26].mxu1 }
 0x11d   :  { %v470_v62 = vadd.f32 %v6486_v50, %v8292_v57  ;;  %v464_v63 = vpop.f32.mrb[27].mxu1 }
 0x11e   :  { %v465_v0 = vadd.f32 %v8292_v57, %v464_v63 }
 0x11f   :  { %576 = vst.msk [vmem:[#allocation3 + $0x18] sm:$0xff] %vm95_vm0, %v470_v62  ;;  %v792_v62 = vld [vmem:[#allocation2 + $0x18] sm:$0xff] }
 0x120   :  { %575 = vst.msk [vmem:[#allocation3 + $0x10] sm:$0xff] %vm95_vm0, %v465_v0  ;;  %v6489_v1 = vpop.f32.mrb[28].mxu1 }
 0x121   :  { %v480_v2 = vadd.f32 %v6489_v1, %v8292_v57  ;;  %v474_v3 = vpop.f32.mrb[29].mxu1 }
 0x122   :  { %v475_v4 = vadd.f32 %v8292_v57, %v474_v3 }
 0x123   :  { %578 = vst.msk [vmem:[#allocation3 + $0x28] sm:$0xff] %vm95_vm0, %v480_v2  ;;  %v793_v2 = vld [vmem:[#allocation2 + $0x20] sm:$0xff] }
 0x124   :  { %577 = vst.msk [vmem:[#allocation3 + $0x20] sm:$0xff] %vm95_vm0, %v475_v4  ;;  %v6492_v5 = vpop.f32.mrb[30].mxu1 }
 0x125   :  { %v490_v7 = vadd.f32 %v6492_v5, %v8292_v57  ;;  %v484_v8 = vpop.f32.mrb[31].mxu1 }
 0x126   :  { %v485_v9 = vadd.f32 %v8292_v57, %v484_v8 }
 0x127   :  { %580 = vst.msk [vmem:[#allocation3 + $0x38] sm:$0xff] %vm95_vm0, %v490_v7  ;;  %v794_v7 = vld [vmem:[#allocation2 + $0x28] sm:$0xff] }
 0x128   :  { %579 = vst.msk [vmem:[#allocation3 + $0x30] sm:$0xff] %vm95_vm0, %v485_v9  ;;  %v6495_v10 = vpop.f32.mrb[32].mxu1 }
 0x129   :  { %v500_v12 = vadd.f32 %v6495_v10, %v8292_v57  ;;  %v494_v14 = vpop.f32.mrb[33].mxu1 }
 0x12a   :  { %v495_v15 = vadd.f32 %v8292_v57, %v494_v14 }
 0x12b   :  { %582 = vst.msk [vmem:[#allocation3 + $0x48] sm:$0xff] %vm95_vm0, %v500_v12 }
 0x12c   :  { %581 = vst.msk [vmem:[#allocation3 + $0x40] sm:$0xff] %vm95_vm0, %v495_v15  ;;  %v6498_v16 = vpop.f32.mrb[34].mxu1 }
 0x12d   :  { %v510_v18 = vadd.f32 %v6498_v16, %v8292_v57  ;;  %v504_v19 = vpop.f32.mrb[35].mxu1 }
 0x12e   :  { %v505_v20 = vadd.f32 %v8292_v57, %v504_v19 }
 0x12f   :  { %584 = vst.msk [vmem:[#allocation3 + $0x58] sm:$0xff] %vm95_vm0, %v510_v18 }
 0x130   :  { %583 = vst.msk [vmem:[#allocation3 + $0x50] sm:$0xff] %vm95_vm0, %v505_v20  ;;  %v6501_v21 = vpop.f32.mrb[36].mxu1 }
 0x131   :  { %v520_v22 = vadd.f32 %v6501_v21, %v8292_v57  ;;  %v514_v23 = vpop.f32.mrb[37].mxu1 }
 0x132   :  { %v515_v24 = vadd.f32 %v8292_v57, %v514_v23 }
 0x133   :  { %586 = vst.msk [vmem:[#allocation3 + $0x68] sm:$0xff] %vm95_vm0, %v520_v22 }
 0x134   :  { %585 = vst.msk [vmem:[#allocation3 + $0x60] sm:$0xff] %vm95_vm0, %v515_v24  ;;  %v6504_v25 = vpop.f32.mrb[38].mxu1 }
 0x135   :  { %v530_v26 = vadd.f32 %v6504_v25, %v8292_v57  ;;  %v524_v27 = vpop.f32.mrb[39].mxu1 }
 0x136   :  { %v525_v28 = vadd.f32 %v8292_v57, %v524_v27 }
 0x137   :  { %588 = vst.msk [vmem:[#allocation3 + $0x78] sm:$0xff] %vm95_vm0, %v530_v26 }
 0x138   :  { %587 = vst.msk [vmem:[#allocation3 + $0x70] sm:$0xff] %vm95_vm0, %v525_v28  ;;  %v6507_v29 = vpop.f32.mrb[40].mxu1 }
 0x139   :  { %v540_v30 = vadd.f32 %v6507_v29, %v8292_v57  ;;  %v534_v31 = vpop.f32.mrb[41].mxu1 }
 0x13a   :  { %v535_v32 = vadd.f32 %v8292_v57, %v534_v31 }
 0x13b   :  { %590 = vst.msk [vmem:[#allocation3 + $0x88] sm:$0xff] %vm95_vm0, %v540_v30 }
 0x13c   :  { %589 = vst.msk [vmem:[#allocation3 + $0x80] sm:$0xff] %vm95_vm0, %v535_v32  ;;  %v6510_v33 = vpop.f32.mrb[42].mxu1  ;;  %v1002_v32 = vld [vmem:[#allocation2 + $0x30] sm:$0xff] }
 0x13d   :  { %v550_v34 = vadd.f32 %v6510_v33, %v8292_v57  ;;  %v544_v35 = vpop.f32.mrb[43].mxu1 }
 0x13e   :  { %v545_v36 = vadd.f32 %v8292_v57, %v544_v35 }
 0x13f   :  { %592 = vst.msk [vmem:[#allocation3 + $0x98] sm:$0xff] %vm95_vm0, %v550_v34 }
 0x140   :  { %591 = vst.msk [vmem:[#allocation3 + $0x90] sm:$0xff] %vm95_vm0, %v545_v36  ;;  %v6513_v37 = vpop.f32.mrb[44].mxu1  ;;  %v1003_v36 = vld [vmem:[#allocation2 + $0x38] sm:$0xff] }
 0x141   :  { %v560_v38 = vadd.f32 %v6513_v37, %v8292_v57  ;;  %v554_v39 = vpop.f32.mrb[45].mxu1 }
 0x142   :  { %v555_v40 = vadd.f32 %v8292_v57, %v554_v39 }
 0x143   :  { %594 = vst.msk [vmem:[#allocation3 + $0xa8] sm:$0xff] %vm95_vm0, %v560_v38 }
 0x144   :  { %593 = vst.msk [vmem:[#allocation3 + $0xa0] sm:$0xff] %vm95_vm0, %v555_v40  ;;  %v6516_v41 = vpop.f32.mrb[46].mxu1  ;;  %v1004_v40 = vld [vmem:[#allocation2 + $0x40] sm:$0xff] }
 0x145   :  { %v570_v42 = vadd.f32 %v6516_v41, %v8292_v57  ;;  %v564_v43 = vpop.f32.mrb[47].mxu1 }
 0x146   :  { %v565_v44 = vadd.f32 %v8292_v57, %v564_v43  ;;  %v895_v21 = vld [vmem:[#allocation3 + $0x98] sm:$0xff] }
 0x147   :  { %596 = vst.msk [vmem:[#allocation3 + $0xb8] sm:$0xff] %vm95_vm0, %v570_v42  ;;  %v894_v16 = vld [vmem:[#allocation3 + $0x90] sm:$0xff] }
 0x148   :  { %595 = vst.msk [vmem:[#allocation3 + $0xb0] sm:$0xff] %vm95_vm0, %v565_v44  ;;  %v766_v45 = vpop.f32.mrb[48].mxu1 }
 0x149   :  { %v6544_v47 = vpop.f32.mrb[49].mxu1 }
 0x14a   :  { %v693_v48 = vld [vmem:[#allocation3 + $0xa8] sm:$0xff] }
 0x14b   :  { %v780_v51 = vadd.f32 %v766_v45, %v693_v48  ;;  %v896_v25 = vld [vmem:[#allocation3 + $0xa0] sm:$0xff] }
 0x14c   :  { %v771_v52 = vpop.f32.mrb[50].mxu1 }
 0x14d   :  { %7663 = vtanh.f32 %v780_v51  ;;  %v6547_v53 = vpop.f32.mrb[51].mxu1 }
 0x14e   :  { %v695_v56 = vld [vmem:[#allocation3 + $0xb8] sm:$0xff]  ;;  %v1105_v53 = vld [vmem:[#allocation3 + $0x80] sm:$0xff] }
 0x14f   :  { %v694_v54 = vld [vmem:[#allocation3 + $0xb0] sm:$0xff] }
 0x150   :  { %v781_v55 = vadd.f32 %v771_v52, %v694_v54  ;;  %v776_v58 = vpop.f32.mrb[52].mxu1 }
 0x151   :  { %v782_v59 = vadd.f32 %v776_v58, %v695_v56  ;;  %v6550_v60 = vpop.f32.mrb[53].mxu1 }
 0x152   :  { %7665 = vtanh.f32 %v781_v55 }
 0x153   :  { %7667 = vtanh.f32 %v782_v59 }
 0x157   :  { %v7664_v57 = vpop.eup %7663 }
 0x158   :  { %789 = vst.msk [vmem:[#allocation3 + $0xa8] sm:$0xff] %vm95_vm0, %v7664_v57  ;;  %6577 = vmatmul.mubr.msk.f32.vlgmr.msra.gmra.mrb[54].mxu1 %vm95_vm0, %v7664_v57 }
 0x159   :  { %6579 = vmatprep.mubr.msk.f32.mxu1 %vm7888_vm1, %v7889_v11  ;;  %7373 = vmatpush3.bf16.msra.mxu1 %v8166_v46 }
 0x15a   :  { %7374 = vmatprep.subr.bf16.mxu1 %v7887_v6 }
 0x15c   :  { %v7666_v61 = vpop.eup %7665 }
 0x15d   :  { %v7668_v50 = vpop.eup %7667  ;;  %790 = vst.msk [vmem:[#allocation3 + $0xb0] sm:$0xff] %vm95_vm0, %v7666_v61  ;;  %6580 = vmatmul.mubr.msk.f32.gmra.mrb[56].mxu1 %vm95_vm0, %v7666_v61 }
 0x15e   :  { %791 = vst.msk [vmem:[#allocation3 + $0xb8] sm:$0xff] %vm95_vm0, %v7668_v50  ;;  %6582 = vmatprep.mubr.msk.f32.mxu1 %vm7888_vm1, %v7889_v11  ;;  %7376 = vmatpush3.bf16.msra.mxu1 %v8179_v49 }
 0x15f   :  { %7383 = vmatprep.subr.bf16.mxu1 %v7887_v6 }
 0x161   :  { %6583 = vmatmul.mubr.msk.f32.gmra.mrb[58].mxu1 %vm95_vm0, %v7668_v50 }
 0x162   :  { %6610 = vmatprep.mubr.msk.f32.mxu1 %vm7888_vm1, %v7889_v11 }
 0x1d4   :  { %v874_v63 = vpop.f32.mrb[6].mxu0 }
 0x1d5   :  { %v888_v0 = vadd.f32 %v874_v63, %v792_v62  ;;  %v6561_v1 = vpop.f32.mrb[7].mxu0  ;;  %v1212_v62 = vld [vmem:[#allocation2 + $0x48] sm:$0xff] }
 0x1d7   :  { %7669 = vtanh.f32 %v888_v0 }
 0x1d8   :  { %v879_v3 = vpop.f32.mrb[8].mxu0 }
 0x1d9   :  { %v889_v4 = vadd.f32 %v879_v3, %v793_v2  ;;  %v6564_v5 = vpop.f32.mrb[9].mxu0  ;;  %v1213_v2 = vld [vmem:[#allocation2 + $0x50] sm:$0xff] }
 0x1db   :  { %7671 = vtanh.f32 %v889_v4 }
 0x1dc   :  { %v884_v8 = vpop.f32.mrb[10].mxu0 }
 0x1dd   :  { %v890_v9 = vadd.f32 %v884_v8, %v794_v7  ;;  %v6567_v10 = vpop.f32.mrb[11].mxu0  ;;  %v1214_v7 = vld [vmem:[#allocation2 + $0x58] sm:$0xff] }
 0x1df   :  { %7673 = vtanh.f32 %v890_v9 }
 0x1e1   :  { %v7670_v12 = vpop.eup %7669 }
 0x1e2   :  { %996 = vst.msk [vmem:[#allocation2 + $0x18] sm:$0xff] %vm95_vm0, %v7670_v12  ;;  %6594 = vmatmul.mubr.msk.f32.vlgmr.msra.gmra.mrb[12].mxu0 %vm95_vm0, %v7670_v12 }
 0x1e3   :  { %6596 = vmatprep.mubr.msk.f32.mxu0 %vm7888_vm1, %v7889_v11  ;;  %7379 = vmatpush3.bf16.msra.mxu0 %v8020_v13 }
 0x1e4   :  { %7380 = vmatprep.subr.bf16.mxu0 %v7887_v6 }
 0x1e5   :  { %v7672_v14 = vpop.eup %7671 }
 0x1e6   :  { %997 = vst.msk [vmem:[#allocation2 + $0x20] sm:$0xff] %vm95_vm0, %v7672_v14  ;;  %6597 = vmatmul.mubr.msk.f32.gmra.mrb[14].mxu0 %vm95_vm0, %v7672_v14 }
 0x1e7   :  { %6599 = vmatprep.mubr.msk.f32.mxu0 %vm7888_vm1, %v7889_v11  ;;  %7382 = vmatpush3.bf16.msra.mxu0 %v8029_v17 }
 0x1e8   :  { %7389 = vmatprep.subr.bf16.mxu0 %v7887_v6 }
 0x1e9   :  { %v7674_v15 = vpop.eup %7673 }
 0x1ea   :  { %998 = vst.msk [vmem:[#allocation2 + $0x28] sm:$0xff] %vm95_vm0, %v7674_v15  ;;  %6600 = vmatmul.mubr.msk.f32.gmra.mrb[16].mxu0 %vm95_vm0, %v7674_v15 }
 0x1eb   :  { %6627 = vmatprep.mubr.msk.f32.mxu0 %vm7888_vm1, %v7889_v11 }
 0x22b   :  { %v976_v18 = vpop.f32.mrb[54].mxu1 }
 0x22c   :  { %v990_v19 = vadd.f32 %v976_v18, %v894_v16  ;;  %v6578_v20 = vpop.f32.mrb[55].mxu1  ;;  %v1314_v16 = vld [vmem:[#allocation3 + $0x60] sm:$0xff] }
 0x22e   :  { %7675 = vtanh.f32 %v990_v19 }
 0x230   :  { %v981_v22 = vpop.f32.mrb[56].mxu1 }
 0x231   :  { %v991_v23 = vadd.f32 %v981_v22, %v895_v21  ;;  %v6581_v24 = vpop.f32.mrb[57].mxu1  ;;  %v1315_v21 = vld [vmem:[#allocation3 + $0x68] sm:$0xff] }
 0x233   :  { %7677 = vtanh.f32 %v991_v23 }
 0x234   :  { %v986_v26 = vpop.f32.mrb[58].mxu1 }
 0x235   :  { %v992_v27 = vadd.f32 %v986_v26, %v896_v25  ;;  %v6584_v28 = vpop.f32.mrb[59].mxu1  ;;  %v1316_v25 = vld [vmem:[#allocation3 + $0x70] sm:$0xff] }
 0x237   :  { %7679 = vtanh.f32 %v992_v27 }
 0x238   :  { %v7676_v29 = vpop.eup %7675 }
 0x239   :  { %999 = vst.msk [vmem:[#allocation3 + $0x90] sm:$0xff] %vm95_vm0, %v7676_v29  ;;  %6611 = vmatmul.mubr.msk.f32.vlgmr.msra.gmra.mrb[60].mxu1 %vm95_vm0, %v7676_v29 }
 0x23a   :  { %6613 = vmatprep.mubr.msk.f32.mxu1 %vm7888_vm1, %v7889_v11  ;;  %7385 = vmatpush3.bf16.msra.mxu1 %v8166_v46 }
 0x23b   :  { %7386 = vmatprep.subr.bf16.mxu1 %v7887_v6 }
 0x23d   :  { %v7678_v30 = vpop.eup %7677 }
 0x23e   :  { %1000 = vst.msk [vmem:[#allocation3 + $0x98] sm:$0xff] %vm95_vm0, %v7678_v30  ;;  %6614 = vmatmul.mubr.msk.f32.gmra.mrb[62].mxu1 %vm95_vm0, %v7678_v30  ;;  %v1635_v30 = vld [vmem:[%s9252_s3] sm:$0xff] }
 0x23f   :  { %6616 = vmatprep.mubr.msk.f32.mxu1 %vm7888_vm1, %v7889_v11  ;;  %7388 = vmatpush3.bf16.msra.mxu1 %v8179_v49 }
 0x240   :  { %7395 = vmatprep.subr.bf16.mxu1 %v7887_v6 }
 0x241   :  { %v7680_v31 = vpop.eup %7679 }
 0x242   :  { %1001 = vst.msk [vmem:[#allocation3 + $0xa0] sm:$0xff] %vm95_vm0, %v7680_v31  ;;  %6617 = vmatmul.mubr.msk.f32.gmra.mrb[64].mxu1 %vm95_vm0, %v7680_v31  ;;  %v1636_v31 = vld [vmem:[%s9252_s3 + $0x8] sm:$0xff] }
 0x243   :  { %6644 = vmatprep.mubr.msk.f32.mxu1 %vm7888_vm1, %v7889_v11 }
 0x2b5   :  { %v1084_v33 = vpop.f32.mrb[12].mxu0 }
 0x2b6   :  { %v1098_v34 = vadd.f32 %v1084_v33, %v1002_v32  ;;  %v6595_v35 = vpop.f32.mrb[13].mxu0  ;;  %v8446_v32 = vpack.c.bf16 %v1636_v31, %v1635_v30  ;;  %v1735_v31 = vld [vmem:[#allocation3 + $0x38] sm:$0xff] }
 0x2b7   :  { %v1638_v35 = vld [vmem:[%s9252_s3 + $0x18] sm:$0xff] }
 0x2b8   :  { %7681 = vtanh.f32 %v1098_v34  ;;  %v1637_v34 = vld [vmem:[%s9252_s3 + $0x10] sm:$0xff] }
 0x2b9   :  { %v1089_v37 = vpop.f32.mrb[14].mxu0 }
 0x2ba   :  { %v1099_v38 = vadd.f32 %v1089_v37, %v1003_v36  ;;  %v6598_v39 = vpop.f32.mrb[15].mxu0  ;;  %v1422_v37 = vld [vmem:[#allocation2 + $0x60] sm:$0xff] }
 0x2bc   :  { %7683 = vtanh.f32 %v1099_v38 }
 0x2bd   :  { %v1094_v41 = vpop.f32.mrb[16].mxu0 }
 0x2be   :  { %v1100_v42 = vadd.f32 %v1094_v41, %v1004_v40  ;;  %v6601_v43 = vpop.f32.mrb[17].mxu0 }
 0x2c0   :  { %7685 = vtanh.f32 %v1100_v42 }
 0x2c2   :  { %v7682_v44 = vpop.eup %7681 }
 0x2c3   :  { %1206 = vst.msk [vmem:[#allocation2 + $0x30] sm:$0xff] %vm95_vm0, %v7682_v44  ;;  %6628 = vmatmul.mubr.msk.f32.vlgmr.msra.gmra.mrb[18].mxu0 %vm95_vm0, %v7682_v44  ;;  %v1424_v44 = vld [vmem:[#allocation2 + $0x70] sm:$0xff] }
 0x2c4   :  { %6630 = vmatprep.mubr.msk.f32.mxu0 %vm7888_vm1, %v7889_v11  ;;  %7391 = vmatpush3.bf16.msra.mxu0 %v8020_v13  ;;  %v1104_v13 = vld [vmem:[#allocation3 + $0x78] sm:$0xff] }
 0x2c5   :  { %7392 = vmatprep.subr.bf16.mxu0 %v7887_v6 }
 0x2c6   :  { %v7684_v45 = vpop.eup %7683 }
 0x2c7   :  { %1207 = vst.msk [vmem:[#allocation2 + $0x38] sm:$0xff] %vm95_vm0, %v7684_v45  ;;  %6631 = vmatmul.mubr.msk.f32.gmra.mrb[20].mxu0 %vm95_vm0, %v7684_v45 }
 0x2c8   :  { %6633 = vmatprep.mubr.msk.f32.mxu0 %vm7888_vm1, %v7889_v11  ;;  %7394 = vmatpush3.bf16.msra.mxu0 %v8029_v17  ;;  %v1106_v17 = vld [vmem:[#allocation3 + $0x88] sm:$0xff] }
 0x2c9   :  { %7401 = vmatprep.subr.bf16.mxu0 %v7887_v6 }
 0x2ca   :  { %v7686_v47 = vpop.eup %7685 }
 0x2cb   :  { %1208 = vst.msk [vmem:[#allocation2 + $0x40] sm:$0xff] %vm95_vm0, %v7686_v47  ;;  %6634 = vmatmul.mubr.msk.f32.gmra.mrb[22].mxu0 %vm95_vm0, %v7686_v47 }
 0x2cc   :  { %6661 = vmatprep.mubr.msk.f32.mxu0 %vm7888_vm1, %v7889_v11 }
 0x30c   :  { %v1186_v48 = vpop.f32.mrb[60].mxu1 }
 0x30d   :  { %v1200_v51 = vadd.f32 %v1186_v48, %v1104_v13  ;;  %v6612_v52 = vpop.f32.mrb[61].mxu1 }
 0x30f   :  { %7687 = vtanh.f32 %v1200_v51 }
 0x311   :  { %v1191_v54 = vpop.f32.mrb[62].mxu1 }
 0x312   :  { %v1201_v55 = vadd.f32 %v1191_v54, %v1105_v53  ;;  %v6615_v56 = vpop.f32.mrb[63].mxu1  ;;  %v1524_v53 = vld [vmem:[#allocation3 + $0x48] sm:$0xff] }
 0x314   :  { %7689 = vtanh.f32 %v1201_v55 }
 0x315   :  { %v1196_v58 = vpop.f32.mrb[64].mxu1 }
 0x316   :  { %v1202_v59 = vadd.f32 %v1196_v58, %v1106_v17  ;;  %v6618_v60 = vpop.f32.mrb[65].mxu1  ;;  %v1525_v17 = vld [vmem:[#allocation3 + $0x50] sm:$0xff] }
 0x318   :  { %7691 = vtanh.f32 %v1202_v59 }
 0x319   :  { %v7688_v57 = vpop.eup %7687 }
 0x31a   :  { %1209 = vst.msk [vmem:[#allocation3 + $0x78] sm:$0xff] %vm95_vm0, %v7688_v57  ;;  %6645 = vmatmul.mubr.msk.f32.vlgmr.msra.gmra.mrb[66].mxu1 %vm95_vm0, %v7688_v57  ;;  %v1526_v57 = vld [vmem:[#allocation3 + $0x58] sm:$0xff] }
 0x31b   :  { %6647 = vmatprep.mubr.msk.f32.mxu1 %vm7888_vm1, %v7889_v11  ;;  %7397 = vmatpush3.bf16.msra.mxu1 %v8166_v46 }
 0x31c   :  { %7398 = vmatprep.subr.bf16.mxu1 %v7887_v6 }
 0x31e   :  { %v7690_v61 = vpop.eup %7689 }
 0x31f   :  { %1210 = vst.msk [vmem:[#allocation3 + $0x80] sm:$0xff] %vm95_vm0, %v7690_v61  ;;  %6648 = vmatmul.mubr.msk.f32.gmra.mrb[68].mxu1 %vm95_vm0, %v7690_v61 }
 0x320   :  { %6650 = vmatprep.mubr.msk.f32.mxu1 %vm7888_vm1, %v7889_v11  ;;  %7400 = vmatpush3.bf16.msra.mxu1 %v8179_v49 }
 0x321   :  { %7407 = vmatprep.subr.bf16.mxu1 %v7887_v6 }
 0x322   :  { %v7692_v50 = vpop.eup %7691 }
 0x323   :  { %1211 = vst.msk [vmem:[#allocation3 + $0x88] sm:$0xff] %vm95_vm0, %v7692_v50  ;;  %6651 = vmatmul.mubr.msk.f32.gmra.mrb[70].mxu1 %vm95_vm0, %v7692_v50 }
 0x324   :  { %6678 = vmatprep.mubr.msk.f32.mxu1 %vm7888_vm1, %v7889_v11 }
 0x396   :  { %v1294_v63 = vpop.f32.mrb[18].mxu0 }
 0x397   :  { %v1308_v0 = vadd.f32 %v1294_v63, %v1212_v62  ;;  %v6629_v1 = vpop.f32.mrb[19].mxu0 }
 0x399   :  { %7693 = vtanh.f32 %v1308_v0 }
 0x39a   :  { %v1299_v3 = vpop.f32.mrb[20].mxu0 }
 0x39b   :  { %v1309_v4 = vadd.f32 %v1299_v3, %v1213_v2  ;;  %v6632_v5 = vpop.f32.mrb[21].mxu0  ;;  %v1947_v2 = vld [vmem:[%s9255_s6] sm:$0xff]  ;;  %v1948_v3 = vld [vmem:[%s9255_s6 + $0x8] sm:$0xff] }
 0x39c   :  { %v1949_v5 = vld [vmem:[%s9255_s6 + $0x10] sm:$0xff] }
 0x39d   :  { %7695 = vtanh.f32 %v1309_v4  ;;  %v7420_v4 = vpack.c.bf16 %v1948_v3, %v1947_v2 }
 0x39e   :  { %v1304_v8 = vpop.f32.mrb[22].mxu0 }
 0x39f   :  { %v1310_v9 = vadd.f32 %v1304_v8, %v1214_v7  ;;  %v6635_v10 = vpop.f32.mrb[23].mxu0  ;;  %v1950_v7 = vld [vmem:[%s9255_s6 + $0x18] sm:$0xff] }
 0x3a0   :  { %v7423_v8 = vpack.c.bf16 %v1950_v7, %v1949_v5  ;;  %v2891_v7 = vld [vmem:[%s9261_s12] sm:$0xff] }
 0x3a1   :  { %7697 = vtanh.f32 %v1310_v9  ;;  %v1632_v9 = vld [vmem:[#allocation2 + $0x78] sm:$0xff] }
 0x3a3   :  { %v7694_v12 = vpop.eup %7693 }
 0x3a4   :  { %1416 = vst.msk [vmem:[#allocation2 + $0x48] sm:$0xff] %vm95_vm0, %v7694_v12  ;;  %6662 = vmatmul.mubr.msk.f32.vlgmr.msra.gmra.mrb[24].mxu0 %vm95_vm0, %v7694_v12 }
 0x3a5   :  { %6664 = vmatprep.mubr.msk.f32.mxu0 %vm7888_vm1, %v7889_v11  ;;  %7403 = vmatpush3.bf16.msra.mxu0 %v8446_v32 }
 0x3a6   :  { %7404 = vmatprep.subr.bf16.mxu0 %v7887_v6 }
 0x3a7   :  { %v7696_v14 = vpop.eup %7695 }
 0x3a8   :  { %1417 = vst.msk [vmem:[#allocation2 + $0x50] sm:$0xff] %vm95_vm0, %v7696_v14  ;;  %6665 = vmatmul.mubr.msk.f32.gmra.mrb[26].mxu0 %vm95_vm0, %v7696_v14 }
 0x3a9   :  { %6667 = vmatprep.mubr.msk.f32.mxu0 %vm7888_vm1, %v7889_v11 }
 0x3ab   :  { %v7698_v15 = vpop.eup %7697 }
 0x3ac   :  { %1418 = vst.msk [vmem:[#allocation2 + $0x58] sm:$0xff] %vm95_vm0, %v7698_v15  ;;  %6668 = vmatmul.mubr.msk.f32.gmra.mrb[28].mxu0 %vm95_vm0, %v7698_v15  ;;  %v1633_v15 = vld [vmem:[#allocation2 + $0x80] sm:$0xff] }
 0x3ad   :  { %6695 = vmatprep.mubr.msk.f32.mxu0 %vm7888_vm1, %v7889_v11 }
 0x3ed   :  { %v1396_v18 = vpop.f32.mrb[66].mxu1 }
 0x3ee   :  { %v1410_v19 = vadd.f32 %v1396_v18, %v1314_v16  ;;  %v6646_v20 = vpop.f32.mrb[67].mxu1 }
 0x3ef   :  { %v1634_v20 = vld [vmem:[#allocation2 + $0x88] sm:$0xff] }
 0x3f0   :  { %7699 = vtanh.f32 %v1410_v19 }
 0x3f2   :  { %v1401_v22 = vpop.f32.mrb[68].mxu1 }
 0x3f3   :  { %v1411_v23 = vadd.f32 %v1401_v22, %v1315_v21  ;;  %v6649_v24 = vpop.f32.mrb[69].mxu1 }
 0x3f5   :  { %7701 = vtanh.f32 %v1411_v23 }
 0x3f6   :  { %v1406_v26 = vpop.f32.mrb[70].mxu1 }
 0x3f7   :  { %v1412_v27 = vadd.f32 %v1406_v26, %v1316_v25  ;;  %v6652_v28 = vpop.f32.mrb[71].mxu1 }
 0x3f9   :  { %7703 = vtanh.f32 %v1412_v27  ;;  %v1734_v27 = vld [vmem:[#allocation3 + $0x30] sm:$0xff] }
 0x3fa   :  { %v7700_v29 = vpop.eup %7699 }
 0x3fb   :  { %1419 = vst.msk [vmem:[#allocation3 + $0x60] sm:$0xff] %vm95_vm0, %v7700_v29  ;;  %6679 = vmatmul.mubr.msk.f32.vlgmr.msra.gmra.mrb[72].mxu1 %vm95_vm0, %v7700_v29 }
 0x3fc   :  { %6681 = vmatprep.mubr.msk.f32.mxu1 %vm7888_vm1, %v7889_v11  ;;  %7409 = vmatpush3.bf16.msra.mxu1 %v8166_v46  ;;  %v8460_v46 = vpack.c.bf16 %v1638_v35, %v1637_v34  ;;  %v1736_v35 = vld [vmem:[#allocation3 + $0x40] sm:$0xff] }
 0x3fd   :  { %7410 = vmatprep.subr.bf16.mxu1 %v7887_v6 }
 0x3fe   :  { %7406 = vmatpush3.bf16.msra.mxu0 %v8460_v46 }
 0x3ff   :  { %v7702_v33 = vpop.eup %7701  ;;  %7413 = vmatprep.subr.bf16.mxu0 %v7887_v6 }
 0x400   :  { %1420 = vst.msk [vmem:[#allocation3 + $0x68] sm:$0xff] %vm95_vm0, %v7702_v33  ;;  %6682 = vmatmul.mubr.msk.f32.gmra.mrb[74].mxu1 %vm95_vm0, %v7702_v33 }
 0x401   :  { %6684 = vmatprep.mubr.msk.f32.mxu1 %vm7888_vm1, %v7889_v11  ;;  %7412 = vmatpush3.bf16.msra.mxu1 %v8179_v49  ;;  %v1423_v49 = vld [vmem:[#allocation2 + $0x68] sm:$0xff] }
 0x402   :  { %7419 = vmatprep.subr.bf16.mxu1 %v7887_v6 }
 0x403   :  { %v7704_v36 = vpop.eup %7703 }
 0x404   :  { %1421 = vst.msk [vmem:[#allocation3 + $0x70] sm:$0xff] %vm95_vm0, %v7704_v36  ;;  %6685 = vmatmul.mubr.msk.f32.gmra.mrb[76].mxu1 %vm95_vm0, %v7704_v36 }
 0x405   :  { %6712 = vmatprep.mubr.msk.f32.mxu1 %vm7888_vm1, %v7889_v11 }
 0x477   :  { %v1504_v38 = vpop.f32.mrb[24].mxu0 }
 0x478   :  { %v1518_v39 = vadd.f32 %v1504_v38, %v1422_v37  ;;  %v6663_v40 = vpop.f32.mrb[25].mxu0 }
 0x47a   :  { %7705 = vtanh.f32 %v1518_v39 }
 0x47b   :  { %v1509_v41 = vpop.f32.mrb[26].mxu0 }
 0x47c   :  { %v1519_v42 = vadd.f32 %v1509_v41, %v1423_v49  ;;  %v6666_v43 = vpop.f32.mrb[27].mxu0  ;;  %v1842_v49 = vld [vmem:[#allocation2 + $0x90] sm:$0xff] }
 0x47e   :  { %7707 = vtanh.f32 %v1519_v42 }
 0x47f   :  { %v1514_v45 = vpop.f32.mrb[28].mxu0 }
 0x480   :  { %v1520_v47 = vadd.f32 %v1514_v45, %v1424_v44  ;;  %v6669_v13 = vpop.f32.mrb[29].mxu0  ;;  %v1843_v44 = vld [vmem:[#allocation2 + $0x98] sm:$0xff] }
 0x482   :  { %7709 = vtanh.f32 %v1520_v47 }
 0x484   :  { %v7706_v48 = vpop.eup %7705 }
 0x485   :  { %1626 = vst.msk [vmem:[#allocation2 + $0x60] sm:$0xff] %vm95_vm0, %v7706_v48  ;;  %6696 = vmatmul.mubr.msk.f32.vlgmr.msra.gmra.mrb[30].mxu0 %vm95_vm0, %v7706_v48  ;;  %v1844_v48 = vld [vmem:[#allocation2 + $0xa0] sm:$0xff] }
 0x486   :  { %6698 = vmatprep.mubr.msk.f32.mxu0 %vm7888_vm1, %v7889_v11  ;;  %7415 = vmatpush3.bf16.msra.mxu0 %v8446_v32 }
 0x487   :  { %7416 = vmatprep.subr.bf16.mxu0 %v7887_v6 }
 0x488   :  { %v7708_v51 = vpop.eup %7707 }
 0x489   :  { %1627 = vst.msk [vmem:[#allocation2 + $0x68] sm:$0xff] %vm95_vm0, %v7708_v51  ;;  %6699 = vmatmul.mubr.msk.f32.gmra.mrb[32].mxu0 %vm95_vm0, %v7708_v51 }
 0x48a   :  { %6701 = vmatprep.mubr.msk.f32.mxu0 %vm7888_vm1, %v7889_v11  ;;  %7418 = vmatpush3.bf16.msra.mxu0 %v8460_v46 }
 0x48b   :  { %7425 = vmatprep.subr.bf16.mxu0 %v7887_v6 }
 0x48c   :  { %v7710_v52 = vpop.eup %7709 }
 0x48d   :  { %1628 = vst.msk [vmem:[#allocation2 + $0x70] sm:$0xff] %vm95_vm0, %v7710_v52  ;;  %6702 = vmatmul.mubr.msk.f32.gmra.mrb[34].mxu0 %vm95_vm0, %v7710_v52 }
 0x48e   :  { %6729 = vmatprep.mubr.msk.f32.mxu0 %vm7888_vm1, %v7889_v11 }
 0x4ce   :  { %v1606_v54 = vpop.f32.mrb[72].mxu1 }
 0x4cf   :  { %v1620_v55 = vadd.f32 %v1606_v54, %v1524_v53  ;;  %v6680_v56 = vpop.f32.mrb[73].mxu1 }
 0x4d1   :  { %7711 = vtanh.f32 %v1620_v55 }
 0x4d3   :  { %v1611_v58 = vpop.f32.mrb[74].mxu1 }
 0x4d4   :  { %v1621_v59 = vadd.f32 %v1611_v58, %v1525_v17  ;;  %v6683_v60 = vpop.f32.mrb[75].mxu1  ;;  %v1944_v17 = vld [vmem:[#allocation3 + $0x18] sm:$0xff] }
 0x4d6   :  { %7713 = vtanh.f32 %v1621_v59 }
 0x4d7   :  { %v1616_v61 = vpop.f32.mrb[76].mxu1 }
 0x4d8   :  { %v1622_v50 = vadd.f32 %v1616_v61, %v1526_v57  ;;  %v6686_v62 = vpop.f32.mrb[77].mxu1  ;;  %v1945_v57 = vld [vmem:[#allocation3 + $0x20] sm:$0xff] }
 0x4da   :  { %7715 = vtanh.f32 %v1622_v50 }
 0x4db   :  { %v7712_v63 = vpop.eup %7711 }
 0x4dc   :  { %1629 = vst.msk [vmem:[#allocation3 + $0x48] sm:$0xff] %vm95_vm0, %v7712_v63  ;;  %6713 = vmatmul.mubr.msk.f32.vlgmr.msra.gmra.mrb[78].mxu1 %vm95_vm0, %v7712_v63  ;;  %v1946_v63 = vld [vmem:[#allocation3 + $0x28] sm:$0xff] }
 0x4dd   :  { %6715 = vmatprep.mubr.msk.f32.mxu1 %vm7888_vm1, %v7889_v11  ;;  %7421 = vmatpush3.bf16.msra.mxu1 %v7420_v4 }
 0x4de   :  { %7422 = vmatprep.subr.bf16.mxu1 %v7887_v6 }
 0x4e0   :  { %v7714_v0 = vpop.eup %7713 }
 0x4e1   :  { %1630 = vst.msk [vmem:[#allocation3 + $0x50] sm:$0xff] %vm95_vm0, %v7714_v0  ;;  %6716 = vmatmul.mubr.msk.f32.gmra.mrb[80].mxu1 %vm95_vm0, %v7714_v0 }
 0x4e2   :  { %6718 = vmatprep.mubr.msk.f32.mxu1 %vm7888_vm1, %v7889_v11  ;;  %7424 = vmatpush3.bf16.msra.mxu1 %v7423_v8 }
 0x4e3   :  { %7431 = vmatprep.subr.bf16.mxu1 %v7887_v6 }
 0x4e4   :  { %v7716_v1 = vpop.eup %7715 }
 0x4e5   :  { %1631 = vst.msk [vmem:[#allocation3 + $0x58] sm:$0xff] %vm95_vm0, %v7716_v1  ;;  %6719 = vmatmul.mubr.msk.f32.gmra.mrb[82].mxu1 %vm95_vm0, %v7716_v1 }
 0x4e6   :  { %6746 = vmatprep.mubr.msk.f32.mxu1 %vm7888_vm1, %v7889_v11 }
 0x558   :  { %v1714_v10 = vpop.f32.mrb[30].mxu0 }
 0x559   :  { %v1728_v12 = vadd.f32 %v1714_v10, %v1632_v9  ;;  %v6697_v14 = vpop.f32.mrb[31].mxu0  ;;  %v2314_v9 = vld [vmem:[%s9257_s8] sm:$0xff] }
 0x55b   :  { %7717 = vtanh.f32 %v1728_v12  ;;  %v2315_v12 = vld [vmem:[%s9257_s8 + $0x8] sm:$0xff] }
 0x55c   :  { %v1719_v16 = vpop.f32.mrb[32].mxu0  ;;  %v7437_v14 = vpack.c.bf16 %v2315_v12, %v2314_v9  ;;  %v2296_v9 = vld [vmem:[#allocation3 + $0x50] sm:$0xff]  ;;  %v2298_v12 = vld [vmem:[#allocation3 + $0x60] sm:$0xff] }
 0x55d   :  { %v1729_v18 = vadd.f32 %v1719_v16, %v1633_v15  ;;  %v6700_v19 = vpop.f32.mrb[33].mxu0  ;;  %v2893_v15 = vld [vmem:[%s9261_s12 + $0x10] sm:$0xff]  ;;  %v2894_v16 = vld [vmem:[%s9261_s12 + $0x18] sm:$0xff] }
 0x55e   :  { %v7457_v19 = vpack.c.bf16 %v2894_v16, %v2893_v15  ;;  %v2300_v15 = vld [vmem:[#allocation3 + $0x70] sm:$0xff]  ;;  %v2301_v16 = vld [vmem:[#allocation3 + $0x78] sm:$0xff] }
 0x55f   :  { %7719 = vtanh.f32 %v1729_v18  ;;  %v2316_v18 = vld [vmem:[%s9257_s8 + $0x10] sm:$0xff] }
 0x560   :  { %v1724_v21 = vpop.f32.mrb[34].mxu0 }
 0x561   :  { %v1730_v22 = vadd.f32 %v1724_v21, %v1634_v20  ;;  %v6703_v23 = vpop.f32.mrb[35].mxu0  ;;  %v2317_v20 = vld [vmem:[%s9257_s8 + $0x18] sm:$0xff] }
 0x562   :  { %v7441_v21 = vpack.c.bf16 %v2317_v20, %v2316_v18  ;;  %v2888_v23 = vld [vmem:[%s9260_s11 + $0x8] sm:$0xff]  ;;  %v2302_v18 = vld [vmem:[#allocation3 + $0x80] sm:$0xff]  ;;  %v2304_v20 = vld [vmem:[#allocation3 + $0x90] sm:$0xff] }
 0x563   :  { %7721 = vtanh.f32 %v1730_v22  ;;  %v2887_v22 = vld [vmem:[%s9260_s11] sm:$0xff] }
 0x565   :  { %v7718_v24 = vpop.eup %7717 }
 0x566   :  { %1836 = vst.msk [vmem:[#allocation2 + $0x78] sm:$0xff] %vm95_vm0, %v7718_v24  ;;  %6730 = vmatmul.mubr.msk.f32.vlgmr.msra.gmra.mrb[36].mxu0 %vm95_vm0, %v7718_v24  ;;  %v7461_v24 = vpack.c.bf16 %v2888_v23, %v2887_v22  ;;  %v2306_v22 = vld [vmem:[#allocation3 + $0xa0] sm:$0xff]  ;;  %v2307_v23 = vld [vmem:[#allocation3 + $0xa8] sm:$0xff] }
 0x567   :  { %6732 = vmatprep.mubr.msk.f32.mxu0 %vm7888_vm1, %v7889_v11  ;;  %7427 = vmatpush3.bf16.msra.mxu0 %v8446_v32 }
 0x568   :  { %7428 = vmatprep.subr.bf16.mxu0 %v7887_v6 }
 0x569   :  { %v7720_v25 = vpop.eup %7719 }
 0x56a   :  { %1837 = vst.msk [vmem:[#allocation2 + $0x80] sm:$0xff] %vm95_vm0, %v7720_v25  ;;  %6733 = vmatmul.mubr.msk.f32.gmra.mrb[38].mxu0 %vm95_vm0, %v7720_v25  ;;  %v2052_v25 = vld [vmem:[#allocation2 + $0xa8] sm:$0xff] }
 0x56b   :  { %6735 = vmatprep.mubr.msk.f32.mxu0 %vm7888_vm1, %v7889_v11  ;;  %7430 = vmatpush3.bf16.msra.mxu0 %v8460_v46 }
 0x56c   :  { %7438 = vmatprep.subr.bf16.mxu0 %v7437_v14 }
 0x56d   :  { %v7722_v26 = vpop.eup %7721 }
 0x56e   :  { %1838 = vst.msk [vmem:[#allocation2 + $0x88] sm:$0xff] %vm95_vm0, %v7722_v26  ;;  %6736 = vmatmul.mubr.msk.f32.gmra.mrb[40].mxu0 %vm95_vm0, %v7722_v26 }
 0x56f   :  { %6763 = vmatprep.mubr.msk.f32.mxu0 %vm7888_vm1, %v7889_v11 }
 0x5af   :  { %v1816_v28 = vpop.f32.mrb[78].mxu1 }
 0x5b0   :  { %v1830_v29 = vadd.f32 %v1816_v28, %v1734_v27  ;;  %v6714_v30 = vpop.f32.mrb[79].mxu1 }
 0x5b2   :  { %7723 = vtanh.f32 %v1830_v29  ;;  %v2053_v29 = vld [vmem:[#allocation2 + $0xb0] sm:$0xff] }
 0x5b4   :  { %v1821_v32 = vpop.f32.mrb[80].mxu1 }
 0x5b5   :  { %v1831_v33 = vadd.f32 %v1821_v32, %v1735_v31  ;;  %v6717_v34 = vpop.f32.mrb[81].mxu1 }
 0x5b7   :  { %7725 = vtanh.f32 %v1831_v33  ;;  %v2054_v33 = vld [vmem:[#allocation2 + $0xb8] sm:$0xff] }
 0x5b8   :  { %v1826_v46 = vpop.f32.mrb[82].mxu1 }
 0x5b9   :  { %v1832_v36 = vadd.f32 %v1826_v46, %v1736_v35  ;;  %v6720_v37 = vpop.f32.mrb[83].mxu1 }
 0x5bb   :  { %7727 = vtanh.f32 %v1832_v36 }
 0x5bc   :  { %v7724_v38 = vpop.eup %7723 }
 0x5bd   :  { %1839 = vst.msk [vmem:[#allocation3 + $0x30] sm:$0xff] %vm95_vm0, %v7724_v38  ;;  %6747 = vmatmul.mubr.msk.f32.vlgmr.msra.gmra.mrb[84].mxu1 %vm95_vm0, %v7724_v38 }
 0x5be   :  { %6749 = vmatprep.mubr.msk.f32.mxu1 %vm7888_vm1, %v7889_v11  ;;  %7433 = vmatpush3.bf16.msra.mxu1 %v7420_v4 }
 0x5bf   :  { %7434 = vmatprep.subr.bf16.mxu1 %v7887_v6 }
 0x5c1   :  { %v7726_v39 = vpop.eup %7725 }
 0x5c2   :  { %1840 = vst.msk [vmem:[#allocation3 + $0x38] sm:$0xff] %vm95_vm0, %v7726_v39  ;;  %6750 = vmatmul.mubr.msk.f32.gmra.mrb[86].mxu1 %vm95_vm0, %v7726_v39  ;;  %v2310_v39 = vld [vmem:[%s9256_s7] sm:$0xff] }
 0x5c3   :  { %6752 = vmatprep.mubr.msk.f32.mxu1 %vm7888_vm1, %v7889_v11  ;;  %7436 = vmatpush3.bf16.msra.mxu1 %v7423_v8  ;;  %v2892_v8 = vld [vmem:[%s9261_s12 + $0x8] sm:$0xff] }
 0x5c4   :  { %v7453_v10 = vpack.c.bf16 %v2892_v8, %v2891_v7  ;;  %v2295_v8 = vld [vmem:[#allocation3 + $0x48] sm:$0xff] }
 0x5c5   :  { %v7728_v40 = vpop.eup %7727 }
 0x5c6   :  { %1841 = vst.msk [vmem:[#allocation3 + $0x40] sm:$0xff] %vm95_vm0, %v7728_v40  ;;  %6753 = vmatmul.mubr.msk.f32.gmra.mrb[88].mxu1 %vm95_vm0, %v7728_v40  ;;  %7454 = vmatprep.subr.bf16.mxu1 %v7453_v10  ;;  %v2311_v40 = vld [vmem:[%s9256_s7 + $0x8] sm:$0xff] }
 0x5c7   :  { %6780 = vmatprep.mubr.msk.f32.mxu1 %vm7888_vm1, %v7889_v11 }
 0x5cd   :  { %v2294_v7 = vld [vmem:[#allocation3 + $0x40] sm:$0xff] }
 0x639   :  { %v1924_v41 = vpop.f32.mrb[36].mxu0 }
 0x63a   :  { %v1938_v42 = vadd.f32 %v1924_v41, %v1842_v49  ;;  %v6731_v43 = vpop.f32.mrb[37].mxu0  ;;  %v7445_v49 = vpack.c.bf16 %v2311_v40, %v2310_v39  ;;  %v2154_v41 = vld [vmem:[#allocation3] sm:$0xff]  ;;  %v2265_v40 = vld [vmem:[#allocation2 + $0x18] sm:$0xff] }
 0x63c   :  { %7729 = vtanh.f32 %v1938_v42 }
 0x63d   :  { %v1929_v45 = vpop.f32.mrb[38].mxu0 }
 0x63e   :  { %v1939_v47 = vadd.f32 %v1929_v45, %v1843_v44  ;;  %v6734_v13 = vpop.f32.mrb[39].mxu0  ;;  %v2155_v45 = vld [vmem:[#allocation3 + $0x8] sm:$0xff] }
 0x640   :  { %7731 = vtanh.f32 %v1939_v47 }
 0x641   :  { %v1934_v51 = vpop.f32.mrb[40].mxu0 }
 0x642   :  { %v1940_v52 = vadd.f32 %v1934_v51, %v1844_v48  ;;  %v6737_v53 = vpop.f32.mrb[41].mxu0  ;;  %v2156_v51 = vld [vmem:[#allocation3 + $0x10] sm:$0xff] }
 0x644   :  { %7733 = vtanh.f32 %v1940_v52 }
 0x646   :  { %v7730_v54 = vpop.eup %7729 }
 0x647   :  { %2046 = vst.msk [vmem:[#allocation2 + $0x90] sm:$0xff] %vm95_vm0, %v7730_v54  ;;  %6764 = vmatmul.mubr.msk.f32.vlgmr.msra.gmra.mrb[42].mxu0 %vm95_vm0, %v7730_v54 }
 0x648   :  { %6766 = vmatprep.mubr.msk.f32.mxu0 %vm7888_vm1, %v7889_v11  ;;  %7440 = vmatpush3.bf16.msra.mxu0 %v7437_v14  ;;  %v2299_v14 = vld [vmem:[#allocation3 + $0x68] sm:$0xff] }
 0x649   :  { %7442 = vmatprep.subr.bf16.mxu0 %v7441_v21 }
 0x64a   :  { %v7732_v55 = vpop.eup %7731 }
 0x64b   :  { %2047 = vst.msk [vmem:[#allocation2 + $0x98] sm:$0xff] %vm95_vm0, %v7732_v55  ;;  %6767 = vmatmul.mubr.msk.f32.gmra.mrb[44].mxu0 %vm95_vm0, %v7732_v55 }
 0x64c   :  { %6769 = vmatprep.mubr.msk.f32.mxu0 %vm7888_vm1, %v7889_v11  ;;  %7444 = vmatpush3.bf16.msra.mxu0 %v7441_v21  ;;  %v2305_v21 = vld [vmem:[#allocation3 + $0x98] sm:$0xff] }
 0x64d   :  { %7446 = vmatprep.subr.bf16.mxu0 %v7445_v49 }
 0x64e   :  { %v7734_v56 = vpop.eup %7733 }
 0x64f   :  { %2048 = vst.msk [vmem:[#allocation2 + $0xa0] sm:$0xff] %vm95_vm0, %v7734_v56  ;;  %6770 = vmatmul.mubr.msk.f32.gmra.mrb[46].mxu0 %vm95_vm0, %v7734_v56 }
 0x690   :  { %v2026_v58 = vpop.f32.mrb[84].mxu1 }
 0x691   :  { %v2040_v59 = vadd.f32 %v2026_v58, %v1944_v17  ;;  %v6748_v60 = vpop.f32.mrb[85].mxu1  ;;  %v2889_v58 = vld [vmem:[%s9260_s11 + $0x10] sm:$0xff] }
 0x692   :  { %v2890_v60 = vld [vmem:[%s9260_s11 + $0x18] sm:$0xff] }
 0x693   :  { %7735 = vtanh.f32 %v2040_v59 }
 0x695   :  { %v2031_v61 = vpop.f32.mrb[86].mxu1 }
 0x696   :  { %v2041_v50 = vadd.f32 %v2031_v61, %v1945_v57  ;;  %v6751_v62 = vpop.f32.mrb[87].mxu1  ;;  %v2312_v57 = vld [vmem:[%s9256_s7 + $0x10] sm:$0xff]  ;;  %v2313_v61 = vld [vmem:[%s9256_s7 + $0x18] sm:$0xff] }
 0x697   :  { %v7449_v62 = vpack.c.bf16 %v2313_v61, %v2312_v57  ;;  %v8787_v61 = vld [vmem:[%s9258_s9] ss:$0 sm:$0xff] }
 0x698   :  { %7737 = vtanh.f32 %v2041_v50  ;;  %v7465_v50 = vpack.c.bf16 %v2890_v60, %v2889_v58  ;;  %v2282_v58 = vld [vmem:[#allocation2 + $0xa0] sm:$0xff] }
 0x699   :  { %v2036_v0 = vpop.f32.mrb[88].mxu1 }
 0x69a   :  { %v2042_v1 = vadd.f32 %v2036_v0, %v1946_v63  ;;  %v6754_v2 = vpop.f32.mrb[89].mxu1 }
 0x69c   :  { %7739 = vtanh.f32 %v2042_v1 }
 0x69d   :  { %v7736_v3 = vpop.eup %7735 }
 0x69e   :  { %2049 = vst.msk [vmem:[#allocation3 + $0x18] sm:$0xff] %vm95_vm0, %v7736_v3  ;;  %6781 = vmatmul.mubr.msk.f32.vlgmr.msra.gmra.mrb[90].mxu1 %vm95_vm0, %v7736_v3 }
 0x69f   :  { %6783 = vmatprep.mubr.msk.f32.mxu1 %vm7888_vm1, %v7889_v11  ;;  %7456 = vmatpush3.bf16.msra.mxu1 %v7453_v10  ;;  %v2297_v10 = vld [vmem:[#allocation3 + $0x58] sm:$0xff] }
 0x6a0   :  { %7458 = vmatprep.subr.bf16.mxu1 %v7457_v19 }
 0x6a2   :  { %v7738_v4 = vpop.eup %7737 }
 0x6a3   :  { %2050 = vst.msk [vmem:[#allocation3 + $0x20] sm:$0xff] %vm95_vm0, %v7738_v4  ;;  %6784 = vmatmul.mubr.msk.f32.gmra.mrb[92].mxu1 %vm95_vm0, %v7738_v4  ;;  %v2292_v4 = vld [vmem:[#allocation3 + $0x30] sm:$0xff] }
 0x6a4   :  { %6786 = vmatprep.mubr.msk.f32.mxu1 %vm7888_vm1, %v7889_v11  ;;  %7460 = vmatpush3.bf16.msra.mxu1 %v7457_v19  ;;  %v2303_v19 = vld [vmem:[#allocation3 + $0x88] sm:$0xff] }
 0x6a5   :  { %7462 = vmatprep.subr.bf16.mxu1 %v7461_v24  ;;  %v2289_v1 = vld [vmem:[#allocation3 + $0x18] sm:$0xff] }
 0x6a6   :  { %v7740_v5 = vpop.eup %7739 }
 0x6a7   :  { %2051 = vst.msk [vmem:[#allocation3 + $0x28] sm:$0xff] %vm95_vm0, %v7740_v5  ;;  %6787 = vmatmul.mubr.msk.f32.gmra.mrb[94].mxu1 %vm95_vm0, %v7740_v5  ;;  %v2293_v5 = vld [vmem:[#allocation3 + $0x38] sm:$0xff] }
 0x6aa   :  { %v2290_v2 = vld [vmem:[#allocation3 + $0x20] sm:$0xff] }
 0x6ae   :  { %v2291_v3 = vld [vmem:[#allocation3 + $0x28] sm:$0xff] }
 0x71a   :  { %v2134_v26 = vpop.f32.mrb[42].mxu0 }
 0x71b   :  { %v2148_v27 = vadd.f32 %v2134_v26, %v2052_v25  ;;  %v6765_v28 = vpop.f32.mrb[43].mxu0  ;;  %v2309_v25 = vld [vmem:[#allocation3 + $0xb8] sm:$0xff]  ;;  %v3416_v26 = vld [vmem:[%s9263_s14] sm:$0xff] }
 0x71c   :  { %v3323_v28 = vld [vmem:[%s9259_s10] sm:$0xff] }
 0x71d   :  { %7741 = vtanh.f32 %v2148_v27  ;;  %v3417_v27 = vld [vmem:[%s9263_s14 + $0x8] sm:$0xff] }
 0x71e   :  { %v2139_v30 = vpop.f32.mrb[44].mxu0 }
 0x71f   :  { %v2149_v31 = vadd.f32 %v2139_v30, %v2053_v29  ;;  %v6768_v32 = vpop.f32.mrb[45].mxu0  ;;  %v3324_v29 = vld [vmem:[%s9259_s10 + $0x8] sm:$0xff]  ;;  %v2262_v30 = vld [vmem:[#allocation2] sm:$0xff] }
 0x720   :  { %v8680_v32 = vpack.c.bf16 %v3417_v27, %v3416_v26 }
 0x721   :  { %7743 = vtanh.f32 %v2149_v31  ;;  %v2263_v31 = vld [vmem:[#allocation2 + $0x8] sm:$0xff] }
 0x722   :  { %v2144_v34 = vpop.f32.mrb[46].mxu0 }
 0x723   :  { %v2150_v35 = vadd.f32 %v2144_v34, %v2054_v33  ;;  %v6771_v46 = vpop.f32.mrb[47].mxu0  ;;  %v3418_v33 = vld [vmem:[%s9263_s14 + $0x10] sm:$0xff]  ;;  %v8685_v34 = vpack.c.bf16 %v3324_v29, %v3323_v28 }
 0x724   :  { %v3325_v46 = vld [vmem:[%s9259_s10 + $0x10] sm:$0xff] }
 0x725   :  { %7745 = vtanh.f32 %v2150_v35  ;;  %v3419_v35 = vld [vmem:[%s9263_s14 + $0x18] sm:$0xff] }
 0x727   :  { %v7742_v36 = vpop.eup %7741 }
 0x728   :  { %2256 = vst.msk [vmem:[#allocation2 + $0xa8] sm:$0xff] %vm95_vm0, %v7742_v36  ;;  %v3326_v36 = vld [vmem:[%s9259_s10 + $0x18] sm:$0xff] }
 0x729   :  { %v8704_v39 = vpack.c.bf16 %v3326_v36, %v3325_v46 }
 0x72b   :  { %v7744_v37 = vpop.eup %7743 }
 0x72c   :  { %2257 = vst.msk [vmem:[#allocation2 + $0xb0] sm:$0xff] %vm95_vm0, %v7744_v37  ;;  %v2264_v37 = vld [vmem:[#allocation2 + $0x10] sm:$0xff] }
 0x72f   :  { %v7746_v38 = vpop.eup %7745 }
 0x730   :  { %2258 = vst.msk [vmem:[#allocation2 + $0xb8] sm:$0xff] %vm95_vm0, %v7746_v38  ;;  %v8701_v38 = vpack.c.bf16 %v3419_v35, %v3418_v33 }
 0x733   :  { %v2284_v60 = vld [vmem:[#allocation2 + $0xb0] sm:$0xff] }
 0x737   :  { %v2285_v57 = vld [vmem:[#allocation2 + $0xb8] sm:$0xff] }
 0x771   :  { %v2236_v42 = vpop.f32.mrb[90].mxu1 }
 0x772   :  { %v2250_v43 = vadd.f32 %v2236_v42, %v2154_v41  ;;  %v6782_v44 = vpop.f32.mrb[91].mxu1  ;;  %v2267_v41 = vld [vmem:[#allocation2 + $0x28] sm:$0xff]  ;;  %v2268_v42 = vld [vmem:[#allocation2 + $0x30] sm:$0xff] }
 0x773   :  { %v2270_v44 = vld [vmem:[#allocation2 + $0x40] sm:$0xff] }
 0x774   :  { %7747 = vtanh.f32 %v2250_v43  ;;  %v2269_v43 = vld [vmem:[#allocation2 + $0x38] sm:$0xff] }
 0x776   :  { %v2241_v47 = vpop.f32.mrb[92].mxu1 }
 0x777   :  { %v2251_v13 = vadd.f32 %v2241_v47, %v2155_v45  ;;  %v6785_v48 = vpop.f32.mrb[93].mxu1  ;;  %v2271_v45 = vld [vmem:[#allocation2 + $0x48] sm:$0xff]  ;;  %v2272_v47 = vld [vmem:[#allocation2 + $0x50] sm:$0xff] }
 0x778   :  { %v2274_v48 = vld [vmem:[#allocation2 + $0x60] sm:$0xff] }
 0x779   :  { %7749 = vtanh.f32 %v2251_v13  ;;  %v2273_v13 = vld [vmem:[#allocation2 + $0x58] sm:$0xff] }
 0x77a   :  { %v2246_v52 = vpop.f32.mrb[94].mxu1 }
 0x77b   :  { %v2252_v53 = vadd.f32 %v2246_v52, %v2156_v51  ;;  %v6788_v54 = vpop.f32.mrb[95].mxu1  ;;  %v2275_v51 = vld [vmem:[#allocation2 + $0x68] sm:$0xff]  ;;  %v2276_v52 = vld [vmem:[#allocation2 + $0x70] sm:$0xff] }
 0x77c   :  { %v2278_v54 = vld [vmem:[#allocation2 + $0x80] sm:$0xff] }
 0x77d   :  { %7751 = vtanh.f32 %v2252_v53  ;;  %v2277_v53 = vld [vmem:[#allocation2 + $0x78] sm:$0xff] }
 0x77e   :  { %v7748_v55 = vpop.eup %7747 }
 0x77f   :  { %2259 = vst.msk [vmem:[#allocation3] sm:$0xff] %vm95_vm0, %v7748_v55  ;;  %v2279_v55 = vld [vmem:[#allocation2 + $0x88] sm:$0xff] }
 0x783   :  { %v7750_v56 = vpop.eup %7749 }
 0x784   :  { %2260 = vst.msk [vmem:[#allocation3 + $0x8] sm:$0xff] %vm95_vm0, %v7750_v56  ;;  %v2280_v56 = vld [vmem:[#allocation2 + $0x90] sm:$0xff] }
 0x786   :  { %v2286_v17 = vld [vmem:[#allocation3] sm:$0xff] }
 0x787   :  { %v7752_v59 = vpop.eup %7751  ;;  %6797 = vmatprep.mubr.msk.f32.mxu0 %vm95_vm0, %v2286_v17  ;;  %6885 = vmatprep.mubr.msk.f32.mxu1 %vm95_vm0, %v2286_v17  ;;  %v2281_v17 = vld [vmem:[#allocation2 + $0x98] sm:$0xff] }
 0x788   :  { %2261 = vst.msk [vmem:[#allocation3 + $0x10] sm:$0xff] %vm95_vm0, %v7752_v59  ;;  %v2283_v59 = vld [vmem:[#allocation2 + $0xa8] sm:$0xff] }
 0x78b   :  { %v2287_v63 = vld [vmem:[#allocation3 + $0x8] sm:$0xff] }
 0x78c   :  { %6798 = vmatmul.mubr.msk.f32.vlgmr.msra.gmra.mrb[48].mxu0 %vm95_vm0, %v2287_v63  ;;  %6886 = vmatmul.mubr.msk.f32.vlgmr.msra.gmra.mrb[96].mxu1 %vm95_vm0, %v2287_v63 }
 0x78d   :  { %7464 = vmatpush3.bf16.msra.mxu1 %v7461_v24  ;;  %7448 = vmatpush3.bf16.msra.mxu0 %v7445_v49  ;;  %v2308_v24 = vld [vmem:[#allocation3 + $0xb0] sm:$0xff]  ;;  %v2266_v49 = vld [vmem:[#allocation2 + $0x20] sm:$0xff] }
 0x78e   :  { %7466 = vmatprep.subr.bf16.mxu1 %v7465_v50  ;;  %7450 = vmatprep.subr.bf16.mxu0 %v7449_v62 }
 0x78f   :  { %v2288_v0 = vld [vmem:[#allocation3 + $0x10] sm:$0xff] }
 0x790   :  { %6800 = vmatprep.mubr.msk.f32.mxu0 %vm95_vm0, %v2288_v0  ;;  %6888 = vmatprep.mubr.msk.f32.mxu1 %vm95_vm0, %v2288_v0 }
 0x791   :  { %6801 = vmatmul.mubr.msk.f32.gmra.mrb[50].mxu0 %vm95_vm0, %v2289_v1  ;;  %6889 = vmatmul.mubr.msk.f32.gmra.mrb[98].mxu1 %vm95_vm0, %v2289_v1 }
 0x792   :  { %6803 = vmatprep.mubr.msk.f32.mxu0 %vm95_vm0, %v2290_v2  ;;  %6891 = vmatprep.mubr.msk.f32.mxu1 %vm95_vm0, %v2290_v2 }
 0x793   :  { %7468 = vmatpush3.bf16.msra.mxu1 %v7465_v50  ;;  %7452 = vmatpush3.bf16.msra.mxu0 %v7449_v62  ;;  %v8792_v50 = vld [vmem:[%s9262_s13] ss:$0 sm:$0xff] }
 0x794   :  { %7475 = vmatprep.subr.bf16.mxu1 %v7887_v6  ;;  %7469 = vmatprep.subr.bf16.mxu0 %v7887_v6 }
 0x795   :  { %6804 = vmatmul.mubr.msk.f32.gmra.mrb[52].mxu0 %vm95_vm0, %v2291_v3  ;;  %6892 = vmatmul.mubr.msk.f32.gmra.mrb[100].mxu1 %vm95_vm0, %v2291_v3 }
 0x796   :  { %6806 = vmatprep.mubr.msk.f32.mxu0 %vm95_vm0, %v2292_v4  ;;  %6894 = vmatprep.mubr.msk.f32.mxu1 %vm95_vm0, %v2292_v4 }
 0x799   :  { %6807 = vmatmul.mubr.msk.f32.gmra.mrb[54].mxu0 %vm95_vm0, %v2293_v5  ;;  %6895 = vmatmul.mubr.msk.f32.gmra.mrb[102].mxu1 %vm95_vm0, %v2293_v5 }
 0x79a   :  { %6809 = vmatprep.mubr.msk.f32.mxu0 %vm95_vm0, %v2294_v7  ;;  %6897 = vmatprep.mubr.msk.f32.mxu1 %vm95_vm0, %v2294_v7 }
 0x79d   :  { %6810 = vmatmul.mubr.msk.f32.gmra.mrb[56].mxu0 %vm95_vm0, %v2295_v8  ;;  %6898 = vmatmul.mubr.msk.f32.gmra.mrb[104].mxu1 %vm95_vm0, %v2295_v8 }
 0x79e   :  { %6812 = vmatprep.mubr.msk.f32.mxu0 %vm95_vm0, %v2296_v9  ;;  %6900 = vmatprep.mubr.msk.f32.mxu1 %vm95_vm0, %v2296_v9 }
 0x7a1   :  { %6813 = vmatmul.mubr.msk.f32.gmra.mrb[58].mxu0 %vm95_vm0, %v2297_v10  ;;  %6901 = vmatmul.mubr.msk.f32.gmra.mrb[106].mxu1 %vm95_vm0, %v2297_v10 }
 0x7a2   :  { %6815 = vmatprep.mubr.msk.f32.mxu0 %vm95_vm0, %v2298_v12  ;;  %6903 = vmatprep.mubr.msk.f32.mxu1 %vm95_vm0, %v2298_v12 }
 0x7a5   :  { %6816 = vmatmul.mubr.msk.f32.gmra.mrb[60].mxu0 %vm95_vm0, %v2299_v14  ;;  %6904 = vmatmul.mubr.msk.f32.gmra.mrb[108].mxu1 %vm95_vm0, %v2299_v14 }
 0x7a6   :  { %6818 = vmatprep.mubr.msk.f32.mxu0 %vm95_vm0, %v2300_v15  ;;  %6906 = vmatprep.mubr.msk.f32.mxu1 %vm95_vm0, %v2300_v15 }
 0x7a9   :  { %6819 = vmatmul.mubr.msk.f32.gmra.mrb[62].mxu0 %vm95_vm0, %v2301_v16  ;;  %6907 = vmatmul.mubr.msk.f32.gmra.mrb[110].mxu1 %vm95_vm0, %v2301_v16 }
 0x7aa   :  { %6821 = vmatprep.mubr.msk.f32.mxu0 %vm95_vm0, %v2302_v18  ;;  %6909 = vmatprep.mubr.msk.f32.mxu1 %vm95_vm0, %v2302_v18 }
 0x7ad   :  { %6822 = vmatmul.mubr.msk.f32.gmra.mrb[64].mxu0 %vm95_vm0, %v2303_v19  ;;  %6910 = vmatmul.mubr.msk.f32.gmra.mrb[112].mxu1 %vm95_vm0, %v2303_v19 }
 0x7ae   :  { %6824 = vmatprep.mubr.msk.f32.mxu0 %vm95_vm0, %v2304_v20  ;;  %6912 = vmatprep.mubr.msk.f32.mxu1 %vm95_vm0, %v2304_v20 }
 0x7b1   :  { %6825 = vmatmul.mubr.msk.f32.gmra.mrb[66].mxu0 %vm95_vm0, %v2305_v21  ;;  %6913 = vmatmul.mubr.msk.f32.gmra.mrb[114].mxu1 %vm95_vm0, %v2305_v21 }
 0x7b2   :  { %6827 = vmatprep.mubr.msk.f32.mxu0 %vm95_vm0, %v2306_v22  ;;  %6915 = vmatprep.mubr.msk.f32.mxu1 %vm95_vm0, %v2306_v22 }
 0x7b5   :  { %6828 = vmatmul.mubr.msk.f32.gmra.mrb[68].mxu0 %vm95_vm0, %v2307_v23  ;;  %6916 = vmatmul.mubr.msk.f32.gmra.mrb[116].mxu1 %vm95_vm0, %v2307_v23 }
 0x7b6   :  { %6830 = vmatprep.mubr.msk.f32.mxu0 %vm95_vm0, %v2308_v24  ;;  %6918 = vmatprep.mubr.msk.f32.mxu1 %vm95_vm0, %v2308_v24 }
 0x7b9   :  { %6831 = vmatmul.mubr.msk.f32.gmra.mrb[70].mxu0 %vm95_vm0, %v2309_v25  ;;  %6919 = vmatmul.mubr.msk.f32.gmra.mrb[118].mxu1 %vm95_vm0, %v2309_v25 }
 0x7ba   :  { %6841 = vmatprep.mubr.msk.f32.mxu0 %vm95_vm0, %v2262_v30  ;;  %6929 = vmatprep.mubr.msk.f32.mxu1 %vm95_vm0, %v2262_v30 }
 0x7bd   :  { %6842 = vmatmul.mubr.msk.f32.vlgmr.msra.gmra.mrb[48].mxu0 %vm95_vm0, %v2263_v31  ;;  %6930 = vmatmul.mubr.msk.f32.vlgmr.msra.gmra.mrb[96].mxu1 %vm95_vm0, %v2263_v31 }
 0x7be   :  { %6844 = vmatprep.mubr.msk.f32.mxu0 %vm95_vm0, %v2264_v37  ;;  %6932 = vmatprep.mubr.msk.f32.mxu1 %vm95_vm0, %v2264_v37 }
 0x7bf   :  { %7477 = vmatpush3.bf16.msra.mxu1 %v8680_v32  ;;  %7471 = vmatpush3.bf16.msra.mxu0 %v8685_v34 }
 0x7c0   :  { %7478 = vmatprep.subr.bf16.mxu1 %v7887_v6  ;;  %7472 = vmatprep.subr.bf16.mxu0 %v7887_v6 }
 0x7c1   :  { %6845 = vmatmul.mubr.msk.f32.gmra.mrb[50].mxu0 %vm95_vm0, %v2265_v40  ;;  %6933 = vmatmul.mubr.msk.f32.gmra.mrb[98].mxu1 %vm95_vm0, %v2265_v40 }
 0x7c2   :  { %6847 = vmatprep.mubr.msk.f32.mxu0 %vm95_vm0, %v2266_v49  ;;  %6935 = vmatprep.mubr.msk.f32.mxu1 %vm95_vm0, %v2266_v49 }
 0x7c3   :  { %7480 = vmatpush3.bf16.msra.mxu1 %v8701_v38  ;;  %7474 = vmatpush3.bf16.msra.mxu0 %v8704_v39 }
 0x7c4   :  { %7487 = vmatprep.subr.bf16.mxu1 %v7887_v6  ;;  %7481 = vmatprep.subr.bf16.mxu0 %v7887_v6 }
 0x7c5   :  { %6848 = vmatmul.mubr.msk.f32.gmra.mrb[52].mxu0 %vm95_vm0, %v2267_v41  ;;  %6936 = vmatmul.mubr.msk.f32.gmra.mrb[100].mxu1 %vm95_vm0, %v2267_v41 }
 0x7c6   :  { %6850 = vmatprep.mubr.msk.f32.mxu0 %vm95_vm0, %v2268_v42  ;;  %6938 = vmatprep.mubr.msk.f32.mxu1 %vm95_vm0, %v2268_v42 }
 0x7c9   :  { %6851 = vmatmul.mubr.msk.f32.gmra.mrb[54].mxu0 %vm95_vm0, %v2269_v43  ;;  %6939 = vmatmul.mubr.msk.f32.gmra.mrb[102].mxu1 %vm95_vm0, %v2269_v43 }
 0x7ca   :  { %6853 = vmatprep.mubr.msk.f32.mxu0 %vm95_vm0, %v2270_v44  ;;  %6941 = vmatprep.mubr.msk.f32.mxu1 %vm95_vm0, %v2270_v44 }
 0x7cd   :  { %6854 = vmatmul.mubr.msk.f32.gmra.mrb[56].mxu0 %vm95_vm0, %v2271_v45  ;;  %6942 = vmatmul.mubr.msk.f32.gmra.mrb[104].mxu1 %vm95_vm0, %v2271_v45 }
 0x7ce   :  { %6856 = vmatprep.mubr.msk.f32.mxu0 %vm95_vm0, %v2272_v47  ;;  %6944 = vmatprep.mubr.msk.f32.mxu1 %vm95_vm0, %v2272_v47 }
 0x7d1   :  { %6857 = vmatmul.mubr.msk.f32.gmra.mrb[58].mxu0 %vm95_vm0, %v2273_v13  ;;  %6945 = vmatmul.mubr.msk.f32.gmra.mrb[106].mxu1 %vm95_vm0, %v2273_v13 }
 0x7d2   :  { %6859 = vmatprep.mubr.msk.f32.mxu0 %vm95_vm0, %v2274_v48  ;;  %6947 = vmatprep.mubr.msk.f32.mxu1 %vm95_vm0, %v2274_v48 }
 0x7d5   :  { %6860 = vmatmul.mubr.msk.f32.gmra.mrb[60].mxu0 %vm95_vm0, %v2275_v51  ;;  %6948 = vmatmul.mubr.msk.f32.gmra.mrb[108].mxu1 %vm95_vm0, %v2275_v51 }
 0x7d6   :  { %6862 = vmatprep.mubr.msk.f32.mxu0 %vm95_vm0, %v2276_v52  ;;  %6950 = vmatprep.mubr.msk.f32.mxu1 %vm95_vm0, %v2276_v52 }
 0x7d9   :  { %6863 = vmatmul.mubr.msk.f32.gmra.mrb[62].mxu0 %vm95_vm0, %v2277_v53  ;;  %6951 = vmatmul.mubr.msk.f32.gmra.mrb[110].mxu1 %vm95_vm0, %v2277_v53 }
 0x7da   :  { %6865 = vmatprep.mubr.msk.f32.mxu0 %vm95_vm0, %v2278_v54  ;;  %6953 = vmatprep.mubr.msk.f32.mxu1 %vm95_vm0, %v2278_v54 }
 0x7dd   :  { %6866 = vmatmul.mubr.msk.f32.gmra.mrb[64].mxu0 %vm95_vm0, %v2279_v55  ;;  %6954 = vmatmul.mubr.msk.f32.gmra.mrb[112].mxu1 %vm95_vm0, %v2279_v55 }
 0x7de   :  { %6868 = vmatprep.mubr.msk.f32.mxu0 %vm95_vm0, %v2280_v56  ;;  %6956 = vmatprep.mubr.msk.f32.mxu1 %vm95_vm0, %v2280_v56 }
 0x7e1   :  { %6869 = vmatmul.mubr.msk.f32.gmra.mrb[66].mxu0 %vm95_vm0, %v2281_v17  ;;  %6957 = vmatmul.mubr.msk.f32.gmra.mrb[114].mxu1 %vm95_vm0, %v2281_v17 }
 0x7e2   :  { %6871 = vmatprep.mubr.msk.f32.mxu0 %vm95_vm0, %v2282_v58  ;;  %6959 = vmatprep.mubr.msk.f32.mxu1 %vm95_vm0, %v2282_v58 }
 0x7e5   :  { %6872 = vmatmul.mubr.msk.f32.gmra.mrb[68].mxu0 %vm95_vm0, %v2283_v59  ;;  %6960 = vmatmul.mubr.msk.f32.gmra.mrb[116].mxu1 %vm95_vm0, %v2283_v59 }
 0x7e6   :  { %6874 = vmatprep.mubr.msk.f32.mxu0 %vm95_vm0, %v2284_v60  ;;  %6962 = vmatprep.mubr.msk.f32.mxu1 %vm95_vm0, %v2284_v60 }
 0x7e9   :  { %6875 = vmatmul.mubr.msk.f32.gmra.mrb[70].mxu0 %vm95_vm0, %v2285_v57  ;;  %6963 = vmatmul.mubr.msk.f32.gmra.mrb[118].mxu1 %vm95_vm0, %v2285_v57 }
 0x7ea   :  { %6973 = vmatprep.mubr.msk.f32.mxu0 %vm7888_vm1, %v7889_v11  ;;  %6990 = vmatprep.mubr.msk.f32.mxu1 %vm7888_vm1, %v7889_v11 }
 0x7ed   :  { %6974 = vmatmul.mubr.f32.vlgmr.msra.gmra.mrb[72].mxu0 %v7889_v11  ;;  %6991 = vmatmul.mubr.f32.vlgmr.msra.gmra.mrb[120].mxu1 %v7889_v11 }
 0x7ee   :  { %6976 = vmatprep.mubr.msk.f32.mxu0 %vm7888_vm1, %v7889_v11  ;;  %6993 = vmatprep.mubr.msk.f32.mxu1 %vm7888_vm1, %v7889_v11 }
 0x7ef   :  { %7489 = vmatpush3.bf16.msra.mxu1 %v8680_v32  ;;  %7483 = vmatpush3.bf16.msra.mxu0 %v8685_v34 }
 0x7f0   :  { %7484 = vmatprep.subr.bf16.mxu0 %v7887_v6  ;;  %7490 = vmatprep.subr.bf16.mxu1 %v7887_v6 }
 0x7f1   :  { %6977 = vmatmul.mubr.f32.gmra.mrb[74].mxu0 %v7889_v11  ;;  %6994 = vmatmul.mubr.f32.gmra.mrb[122].mxu1 %v7889_v11 }
 0x7f2   :  { %6979 = vmatprep.mubr.msk.f32.mxu0 %vm7888_vm1, %v7889_v11  ;;  %6996 = vmatprep.mubr.msk.f32.mxu1 %vm7888_vm1, %v7889_v11 }
 0x7f3   :  { %7486 = vmatpush3.bf16.msra.mxu0 %v8704_v39  ;;  %7492 = vmatpush3.bf16.msra.mxu1 %v8701_v38 }
 0x7f4   :  { %7499 = vmatprep.subr.bf16.mxu1 %v7887_v6  ;;  %7493 = vmatprep.subr.bf16.mxu0 %v7887_v6 }
 0x7f5   :  { %6980 = vmatmul.mubr.f32.gmra.mrb[76].mxu0 %v7889_v11  ;;  %6997 = vmatmul.mubr.f32.gmra.mrb[124].mxu1 %v7889_v11 }
 0x7f6   :  { %7007 = vmatprep.mubr.msk.f32.mxu0 %vm7888_vm1, %v7889_v11  ;;  %7024 = vmatprep.mubr.msk.f32.mxu1 %vm7888_vm1, %v7889_v11 }
 0x890   :  { %v6843_v62 = vpop.f32.mrb[48].mxu0  ;;  %v6931_v63 = vpop.f32.mrb[96].mxu1 }
 0x891   :  { %v2840_v0 = vadd.f32 %v6843_v62, %v8787_v61  ;;  %v3273_v1 = vadd.f32 %v6931_v63, %v8792_v50  ;;  %v2713_v2 = vpop.f32.mrb[49].mxu0  ;;  %v3146_v3 = vpop.f32.mrb[97].mxu1 }
 0x892   :  { %v2839_v4 = vadd.f32 %v8787_v61, %v2713_v2  ;;  %v3272_v5 = vadd.f32 %v8792_v50, %v3146_v3 }
 0x893   :  { %2864 = vst.msk [vmem:[#allocation4 + $0x8] sm:$0xff] %vm95_vm0, %v2840_v0  ;;  %3297 = vst.msk [vmem:[#allocation5 + $0x8] sm:$0xff] %vm95_vm0, %v3273_v1 }
 0x894   :  { %2863 = vst.msk [vmem:[#allocation4] sm:$0xff] %vm95_vm0, %v2839_v4  ;;  %3296 = vst.msk [vmem:[#allocation5] sm:$0xff] %vm95_vm0, %v3272_v5  ;;  %v6846_v7 = vpop.f32.mrb[50].mxu0  ;;  %v6934_v8 = vpop.f32.mrb[98].mxu1 }
 0x895   :  { %v2842_v9 = vadd.f32 %v6846_v7, %v8787_v61  ;;  %v3275_v10 = vadd.f32 %v6934_v8, %v8792_v50  ;;  %v2723_v12 = vpop.f32.mrb[51].mxu0  ;;  %v3156_v14 = vpop.f32.mrb[99].mxu1 }
 0x896   :  { %v2841_v15 = vadd.f32 %v8787_v61, %v2723_v12  ;;  %v3274_v16 = vadd.f32 %v8792_v50, %v3156_v14 }
 0x897   :  { %2866 = vst.msk [vmem:[#allocation4 + $0x18] sm:$0xff] %vm95_vm0, %v2842_v9  ;;  %3299 = vst.msk [vmem:[#allocation5 + $0x18] sm:$0xff] %vm95_vm0, %v3275_v10 }
 0x898   :  { %2865 = vst.msk [vmem:[#allocation4 + $0x10] sm:$0xff] %vm95_vm0, %v2841_v15  ;;  %3298 = vst.msk [vmem:[#allocation5 + $0x10] sm:$0xff] %vm95_vm0, %v3274_v16  ;;  %v6849_v18 = vpop.f32.mrb[52].mxu0  ;;  %v6937_v19 = vpop.f32.mrb[100].mxu1 }
 0x899   :  { %v2844_v20 = vadd.f32 %v6849_v18, %v8787_v61  ;;  %v3277_v21 = vadd.f32 %v6937_v19, %v8792_v50  ;;  %v2733_v22 = vpop.f32.mrb[53].mxu0  ;;  %v3166_v23 = vpop.f32.mrb[101].mxu1 }
 0x89a   :  { %v2843_v24 = vadd.f32 %v8787_v61, %v2733_v22  ;;  %v3276_v25 = vadd.f32 %v8792_v50, %v3166_v23 }
 0x89b   :  { %2868 = vst.msk [vmem:[#allocation4 + $0x28] sm:$0xff] %vm95_vm0, %v2844_v20  ;;  %3301 = vst.msk [vmem:[#allocation5 + $0x28] sm:$0xff] %vm95_vm0, %v3277_v21 }
 0x89c   :  { %2867 = vst.msk [vmem:[#allocation4 + $0x20] sm:$0xff] %vm95_vm0, %v2843_v24  ;;  %3300 = vst.msk [vmem:[#allocation5 + $0x20] sm:$0xff] %vm95_vm0, %v3276_v25  ;;  %v6852_v26 = vpop.f32.mrb[54].mxu0  ;;  %v6940_v27 = vpop.f32.mrb[102].mxu1 }
 0x89d   :  { %v2846_v28 = vadd.f32 %v6852_v26, %v8787_v61  ;;  %v3279_v29 = vadd.f32 %v6940_v27, %v8792_v50  ;;  %v2743_v30 = vpop.f32.mrb[55].mxu0  ;;  %v3176_v31 = vpop.f32.mrb[103].mxu1 }
 0x89e   :  { %v2845_v33 = vadd.f32 %v8787_v61, %v2743_v30  ;;  %v3278_v35 = vadd.f32 %v8792_v50, %v3176_v31 }
 0x89f   :  { %2870 = vst.msk [vmem:[#allocation4 + $0x38] sm:$0xff] %vm95_vm0, %v2846_v28  ;;  %3303 = vst.msk [vmem:[#allocation5 + $0x38] sm:$0xff] %vm95_vm0, %v3279_v29 }
 0x8a0   :  { %2869 = vst.msk [vmem:[#allocation4 + $0x30] sm:$0xff] %vm95_vm0, %v2845_v33  ;;  %3302 = vst.msk [vmem:[#allocation5 + $0x30] sm:$0xff] %vm95_vm0, %v3278_v35  ;;  %v6855_v46 = vpop.f32.mrb[56].mxu0  ;;  %v6943_v36 = vpop.f32.mrb[104].mxu1 }
 0x8a1   :  { %v2848_v37 = vadd.f32 %v6855_v46, %v8787_v61  ;;  %v3281_v40 = vadd.f32 %v6943_v36, %v8792_v50  ;;  %v2753_v49 = vpop.f32.mrb[57].mxu0  ;;  %v3186_v41 = vpop.f32.mrb[105].mxu1 }
 0x8a2   :  { %v2847_v42 = vadd.f32 %v8787_v61, %v2753_v49  ;;  %v3280_v43 = vadd.f32 %v8792_v50, %v3186_v41 }
 0x8a3   :  { %2872 = vst.msk [vmem:[#allocation4 + $0x48] sm:$0xff] %vm95_vm0, %v2848_v37  ;;  %3305 = vst.msk [vmem:[#allocation5 + $0x48] sm:$0xff] %vm95_vm0, %v3281_v40 }
 0x8a4   :  { %2871 = vst.msk [vmem:[#allocation4 + $0x40] sm:$0xff] %vm95_vm0, %v2847_v42  ;;  %3304 = vst.msk [vmem:[#allocation5 + $0x40] sm:$0xff] %vm95_vm0, %v3280_v43  ;;  %v6858_v44 = vpop.f32.mrb[58].mxu0  ;;  %v6946_v45 = vpop.f32.mrb[106].mxu1 }
 0x8a5   :  { %v2850_v47 = vadd.f32 %v6858_v44, %v8787_v61  ;;  %v3283_v13 = vadd.f32 %v6946_v45, %v8792_v50  ;;  %v2763_v48 = vpop.f32.mrb[59].mxu0  ;;  %v3196_v51 = vpop.f32.mrb[107].mxu1  ;;  %v3320_v44 = vld [vmem:[#allocation4] sm:$0xff] }
 0x8a6   :  { %v2849_v52 = vadd.f32 %v8787_v61, %v2763_v48  ;;  %v3282_v53 = vadd.f32 %v8792_v50, %v3196_v51 }
 0x8a7   :  { %2874 = vst.msk [vmem:[#allocation4 + $0x58] sm:$0xff] %vm95_vm0, %v2850_v47  ;;  %3307 = vst.msk [vmem:[#allocation5 + $0x58] sm:$0xff] %vm95_vm0, %v3283_v13 }
 0x8a8   :  { %2873 = vst.msk [vmem:[#allocation4 + $0x50] sm:$0xff] %vm95_vm0, %v2849_v52  ;;  %3306 = vst.msk [vmem:[#allocation5 + $0x50] sm:$0xff] %vm95_vm0, %v3282_v53  ;;  %v6861_v54 = vpop.f32.mrb[60].mxu0  ;;  %v6949_v55 = vpop.f32.mrb[108].mxu1 }
 0x8a9   :  { %v2852_v56 = vadd.f32 %v6861_v54, %v8787_v61  ;;  %v3285_v17 = vadd.f32 %v6949_v55, %v8792_v50  ;;  %v2773_v58 = vpop.f32.mrb[61].mxu0  ;;  %v3206_v59 = vpop.f32.mrb[109].mxu1 }
 0x8aa   :  { %v2851_v60 = vadd.f32 %v8787_v61, %v2773_v58  ;;  %v3284_v57 = vadd.f32 %v8792_v50, %v3206_v59 }
 0x8ab   :  { %2876 = vst.msk [vmem:[#allocation4 + $0x68] sm:$0xff] %vm95_vm0, %v2852_v56  ;;  %3309 = vst.msk [vmem:[#allocation5 + $0x68] sm:$0xff] %vm95_vm0, %v3285_v17 }
 0x8ac   :  { %2875 = vst.msk [vmem:[#allocation4 + $0x60] sm:$0xff] %vm95_vm0, %v2851_v60  ;;  %3308 = vst.msk [vmem:[#allocation5 + $0x60] sm:$0xff] %vm95_vm0, %v3284_v57  ;;  %v6864_v62 = vpop.f32.mrb[62].mxu0  ;;  %v6952_v63 = vpop.f32.mrb[110].mxu1  ;;  %v3322_v60 = vld [vmem:[#allocation4 + $0x10] sm:$0xff] }
 0x8ad   :  { %v2854_v0 = vadd.f32 %v6864_v62, %v8787_v61  ;;  %v3287_v1 = vadd.f32 %v6952_v63, %v8792_v50  ;;  %v2783_v2 = vpop.f32.mrb[63].mxu0  ;;  %v3216_v3 = vpop.f32.mrb[111].mxu1 }
 0x8ae   :  { %v2853_v4 = vadd.f32 %v8787_v61, %v2783_v2  ;;  %v3286_v5 = vadd.f32 %v8792_v50, %v3216_v3 }
 0x8af   :  { %2878 = vst.msk [vmem:[#allocation4 + $0x78] sm:$0xff] %vm95_vm0, %v2854_v0  ;;  %3311 = vst.msk [vmem:[#allocation5 + $0x78] sm:$0xff] %vm95_vm0, %v3287_v1 }
 0x8b0   :  { %2877 = vst.msk [vmem:[#allocation4 + $0x70] sm:$0xff] %vm95_vm0, %v2853_v4  ;;  %3310 = vst.msk [vmem:[#allocation5 + $0x70] sm:$0xff] %vm95_vm0, %v3286_v5  ;;  %v6867_v7 = vpop.f32.mrb[64].mxu0  ;;  %v6955_v8 = vpop.f32.mrb[112].mxu1 }
 0x8b1   :  { %v2856_v9 = vadd.f32 %v6867_v7, %v8787_v61  ;;  %v3289_v10 = vadd.f32 %v6955_v8, %v8792_v50  ;;  %v2793_v12 = vpop.f32.mrb[65].mxu0  ;;  %v3226_v14 = vpop.f32.mrb[113].mxu1 }
 0x8b2   :  { %v2855_v15 = vadd.f32 %v8787_v61, %v2793_v12  ;;  %v3288_v16 = vadd.f32 %v8792_v50, %v3226_v14  ;;  %v3512_v12 = vld [vmem:[#allocation4 + $0x18] sm:$0xff] }
 0x8b3   :  { %2880 = vst.msk [vmem:[#allocation4 + $0x88] sm:$0xff] %vm95_vm0, %v2856_v9  ;;  %3313 = vst.msk [vmem:[#allocation5 + $0x88] sm:$0xff] %vm95_vm0, %v3289_v10 }
 0x8b4   :  { %2879 = vst.msk [vmem:[#allocation4 + $0x80] sm:$0xff] %vm95_vm0, %v2855_v15  ;;  %3312 = vst.msk [vmem:[#allocation5 + $0x80] sm:$0xff] %vm95_vm0, %v3288_v16  ;;  %v6870_v18 = vpop.f32.mrb[66].mxu0  ;;  %v6958_v19 = vpop.f32.mrb[114].mxu1 }
 0x8b5   :  { %v2858_v20 = vadd.f32 %v6870_v18, %v8787_v61  ;;  %v3291_v21 = vadd.f32 %v6958_v19, %v8792_v50  ;;  %v2803_v22 = vpop.f32.mrb[67].mxu0  ;;  %v3236_v23 = vpop.f32.mrb[115].mxu1 }
 0x8b6   :  { %v2857_v24 = vadd.f32 %v8787_v61, %v2803_v22  ;;  %v3290_v25 = vadd.f32 %v8792_v50, %v3236_v23  ;;  %v3513_v22 = vld [vmem:[#allocation4 + $0x20] sm:$0xff] }
 0x8b7   :  { %2882 = vst.msk [vmem:[#allocation4 + $0x98] sm:$0xff] %vm95_vm0, %v2858_v20  ;;  %3315 = vst.msk [vmem:[#allocation5 + $0x98] sm:$0xff] %vm95_vm0, %v3291_v21 }
 0x8b8   :  { %2881 = vst.msk [vmem:[#allocation4 + $0x90] sm:$0xff] %vm95_vm0, %v2857_v24  ;;  %3314 = vst.msk [vmem:[#allocation5 + $0x90] sm:$0xff] %vm95_vm0, %v3290_v25  ;;  %v6873_v26 = vpop.f32.mrb[68].mxu0  ;;  %v6961_v27 = vpop.f32.mrb[116].mxu1 }
 0x8b9   :  { %v2860_v28 = vadd.f32 %v6873_v26, %v8787_v61  ;;  %v3293_v29 = vadd.f32 %v6961_v27, %v8792_v50  ;;  %v2813_v30 = vpop.f32.mrb[69].mxu0  ;;  %v3246_v31 = vpop.f32.mrb[117].mxu1 }
 0x8ba   :  { %v2859_v33 = vadd.f32 %v8787_v61, %v2813_v30  ;;  %v3292_v35 = vadd.f32 %v8792_v50, %v3246_v31 }
 0x8bb   :  { %2884 = vst.msk [vmem:[#allocation4 + $0xa8] sm:$0xff] %vm95_vm0, %v2860_v28  ;;  %3317 = vst.msk [vmem:[#allocation5 + $0xa8] sm:$0xff] %vm95_vm0, %v3293_v29  ;;  %v3514_v29 = vld [vmem:[#allocation4 + $0x28] sm:$0xff] }
 0x8bc   :  { %2883 = vst.msk [vmem:[#allocation4 + $0xa0] sm:$0xff] %vm95_vm0, %v2859_v33  ;;  %3316 = vst.msk [vmem:[#allocation5 + $0xa0] sm:$0xff] %vm95_vm0, %v3292_v35  ;;  %v6876_v46 = vpop.f32.mrb[70].mxu0  ;;  %v6964_v36 = vpop.f32.mrb[118].mxu1 }
 0x8bd   :  { %v2862_v37 = vadd.f32 %v6876_v46, %v8787_v61  ;;  %v3295_v40 = vadd.f32 %v6964_v36, %v8792_v50  ;;  %v2823_v49 = vpop.f32.mrb[71].mxu0  ;;  %v3256_v41 = vpop.f32.mrb[119].mxu1 }
 0x8be   :  { %v2861_v42 = vadd.f32 %v8787_v61, %v2823_v49  ;;  %v3294_v43 = vadd.f32 %v8792_v50, %v3256_v41  ;;  %v3321_v61 = vld [vmem:[#allocation4 + $0x8] sm:$0xff]  ;;  %v3615_v26 = vld [vmem:[#allocation5 + $0x98] sm:$0xff] }
 0x8bf   :  { %2886 = vst.msk [vmem:[#allocation4 + $0xb8] sm:$0xff] %vm95_vm0, %v2862_v37  ;;  %3319 = vst.msk [vmem:[#allocation5 + $0xb8] sm:$0xff] %vm95_vm0, %v3295_v40  ;;  %v3614_v18 = vld [vmem:[#allocation5 + $0x90] sm:$0xff] }
 0x8c0   :  { %2885 = vst.msk [vmem:[#allocation4 + $0xb0] sm:$0xff] %vm95_vm0, %v2861_v42  ;;  %3318 = vst.msk [vmem:[#allocation5 + $0xb0] sm:$0xff] %vm95_vm0, %v3294_v43  ;;  %v3393_v45 = vpop.f32.mrb[72].mxu0  ;;  %v3486_v47 = vpop.f32.mrb[120].mxu1 }
 0x8c1   :  { %v3407_v13 = vadd.f32 %v3393_v45, %v3320_v44  ;;  %v6975_v48 = vpop.f32.mrb[73].mxu0  ;;  %v6992_v51 = vpop.f32.mrb[121].mxu1 }
 0x8c2   :  { %v3413_v52 = vld [vmem:[#allocation5 + $0xa8] sm:$0xff] }
 0x8c3   :  { %7753 = vtanh.f32 %v3407_v13  ;;  %v3500_v53 = vadd.f32 %v3486_v47, %v3413_v52  ;;  %v3616_v46 = vld [vmem:[#allocation5 + $0xa0] sm:$0xff]  ;;  %v3722_v47 = vld [vmem:[#allocation4 + $0x30] sm:$0xff]  ;;  %v3824_v52 = vld [vmem:[#allocation5 + $0x78] sm:$0xff] }
 0x8c4   :  { %v3398_v54 = vpop.f32.mrb[74].mxu0  ;;  %v3491_v50 = vpop.f32.mrb[122].mxu1 }
 0x8c5   :  { %7755 = vtanh.f32 %v3500_v53  ;;  %v3408_v55 = vadd.f32 %v3398_v54, %v3321_v61  ;;  %v6978_v56 = vpop.f32.mrb[75].mxu0  ;;  %v6995_v17 = vpop.f32.mrb[123].mxu1 }
 0x8c6   :  { %v3415_v62 = vld [vmem:[#allocation5 + $0xb8] sm:$0xff] }
 0x8c7   :  { %7757 = vtanh.f32 %v3408_v55  ;;  %v3414_v58 = vld [vmem:[#allocation5 + $0xb0] sm:$0xff] }
 0x8c8   :  { %v3501_v59 = vadd.f32 %v3491_v50, %v3414_v58  ;;  %v3403_v57 = vpop.f32.mrb[76].mxu0  ;;  %v3496_v63 = vpop.f32.mrb[124].mxu1  ;;  %v3723_v50 = vld [vmem:[#allocation4 + $0x38] sm:$0xff]  ;;  %v3825_v58 = vld [vmem:[#allocation5 + $0x80] sm:$0xff] }
 0x8c9   :  { %v3409_v0 = vadd.f32 %v3403_v57, %v3322_v60  ;;  %v3502_v1 = vadd.f32 %v3496_v63, %v3415_v62  ;;  %v6998_v2 = vpop.f32.mrb[125].mxu1  ;;  %v6981_v3 = vpop.f32.mrb[77].mxu0  ;;  %v3724_v57 = vld [vmem:[#allocation4 + $0x40] sm:$0xff] }
 0x8ca   :  { %7759 = vtanh.f32 %v3501_v59  ;;  %v3826_v2 = vld [vmem:[#allocation5 + $0x88] sm:$0xff] }
 0x8cb   :  { %7761 = vtanh.f32 %v3409_v0 }
 0x8cc   :  { %7763 = vtanh.f32 %v3502_v1 }
 0x8cd   :  { %v7754_v4 = vpop.eup %7753 }
 0x8ce   :  { %3506 = vst.msk [vmem:[#allocation4] sm:$0xff] %vm95_vm0, %v7754_v4  ;;  %7008 = vmatmul.mubr.msk.f32.vlgmr.msra.gmra.mrb[78].mxu0 %vm95_vm0, %v7754_v4 }
 0x8cf   :  { %v7756_v5 = vpop.eup %7755  ;;  %7010 = vmatprep.mubr.msk.f32.mxu0 %vm7888_vm1, %v7889_v11  ;;  %7495 = vmatpush3.bf16.msra.mxu0 %v8685_v34 }
 0x8d0   :  { %3509 = vst.msk [vmem:[#allocation5 + $0xa8] sm:$0xff] %vm95_vm0, %v7756_v5  ;;  %7025 = vmatmul.mubr.msk.f32.vlgmr.msra.gmra.mrb[126].mxu1 %vm95_vm0, %v7756_v5  ;;  %7496 = vmatprep.subr.bf16.mxu0 %v7887_v6 }
 0x8d1   :  { %v7758_v7 = vpop.eup %7757  ;;  %7027 = vmatprep.mubr.msk.f32.mxu1 %vm7888_vm1, %v7889_v11  ;;  %7501 = vmatpush3.bf16.msra.mxu1 %v8680_v32 }
 0x8d2   :  { %3507 = vst.msk [vmem:[#allocation4 + $0x8] sm:$0xff] %vm95_vm0, %v7758_v7  ;;  %7011 = vmatmul.mubr.msk.f32.gmra.mrb[80].mxu0 %vm95_vm0, %v7758_v7  ;;  %7502 = vmatprep.subr.bf16.mxu1 %v7887_v6 }
 0x8d3   :  { %7013 = vmatprep.mubr.msk.f32.mxu0 %vm7888_vm1, %v7889_v11  ;;  %7498 = vmatpush3.bf16.msra.mxu0 %v8704_v39 }
 0x8d4   :  { %v7760_v8 = vpop.eup %7759  ;;  %7505 = vmatprep.subr.bf16.mxu0 %v7887_v6 }
 0x8d5   :  { %v7762_v9 = vpop.eup %7761  ;;  %3510 = vst.msk [vmem:[#allocation5 + $0xb0] sm:$0xff] %vm95_vm0, %v7760_v8  ;;  %7028 = vmatmul.mubr.msk.f32.gmra.mrb[128].mxu1 %vm95_vm0, %v7760_v8 }
 0x8d6   :  { %v7764_v10 = vpop.eup %7763  ;;  %3508 = vst.msk [vmem:[#allocation4 + $0x10] sm:$0xff] %vm95_vm0, %v7762_v9  ;;  %7014 = vmatmul.mubr.msk.f32.gmra.mrb[82].mxu0 %vm95_vm0, %v7762_v9  ;;  %7030 = vmatprep.mubr.msk.f32.mxu1 %vm7888_vm1, %v7889_v11 }
 0x8d7   :  { %3511 = vst.msk [vmem:[#allocation5 + $0xb8] sm:$0xff] %vm95_vm0, %v7764_v10  ;;  %7504 = vmatpush3.bf16.msra.mxu1 %v8701_v38  ;;  %7041 = vmatprep.mubr.msk.f32.mxu0 %vm7888_vm1, %v7889_v11 }
 0x8d8   :  { %7511 = vmatprep.subr.bf16.mxu1 %v7887_v6 }
 0x8d9   :  { %7031 = vmatmul.mubr.msk.f32.gmra.mrb[130].mxu1 %vm95_vm0, %v7764_v10 }
 0x8da   :  { %7058 = vmatprep.mubr.msk.f32.mxu1 %vm7888_vm1, %v7889_v11 }
 0x9a1   :  { %v3594_v14 = vpop.f32.mrb[78].mxu0 }
 0x9a2   :  { %v3608_v15 = vadd.f32 %v3594_v14, %v3512_v12  ;;  %v7009_v16 = vpop.f32.mrb[79].mxu0  ;;  %v3932_v14 = vld [vmem:[#allocation4 + $0x48] sm:$0xff] }
 0x9a3   :  { %v3696_v19 = vpop.f32.mrb[126].mxu1 }
 0x9a4   :  { %7765 = vtanh.f32 %v3608_v15  ;;  %v3710_v20 = vadd.f32 %v3696_v19, %v3614_v18  ;;  %v7026_v21 = vpop.f32.mrb[127].mxu1  ;;  %v4034_v19 = vld [vmem:[#allocation5 + $0x60] sm:$0xff] }
 0x9a5   :  { %v3599_v23 = vpop.f32.mrb[80].mxu0 }
 0x9a6   :  { %7767 = vtanh.f32 %v3710_v20  ;;  %v3609_v24 = vadd.f32 %v3599_v23, %v3513_v22  ;;  %v7012_v25 = vpop.f32.mrb[81].mxu0  ;;  %v3933_v22 = vld [vmem:[#allocation4 + $0x50] sm:$0xff] }
 0x9a8   :  { %7769 = vtanh.f32 %v3609_v24  ;;  %v3701_v27 = vpop.f32.mrb[128].mxu1 }
 0x9a9   :  { %v3711_v28 = vadd.f32 %v3701_v27, %v3615_v26  ;;  %v3604_v30 = vpop.f32.mrb[82].mxu0  ;;  %v7029_v31 = vpop.f32.mrb[129].mxu1  ;;  %v4035_v26 = vld [vmem:[#allocation5 + $0x68] sm:$0xff] }
 0x9aa   :  { %v3610_v33 = vadd.f32 %v3604_v30, %v3514_v29  ;;  %v7015_v35 = vpop.f32.mrb[83].mxu0  ;;  %v3934_v29 = vld [vmem:[#allocation4 + $0x58] sm:$0xff] }
 0x9ab   :  { %7771 = vtanh.f32 %v3711_v28 }
 0x9ac   :  { %7773 = vtanh.f32 %v3610_v33  ;;  %v3706_v36 = vpop.f32.mrb[130].mxu1 }
 0x9ad   :  { %v3712_v37 = vadd.f32 %v3706_v36, %v3616_v46  ;;  %v7032_v40 = vpop.f32.mrb[131].mxu1  ;;  %v4036_v46 = vld [vmem:[#allocation5 + $0x70] sm:$0xff] }
 0x9ae   :  { %v7766_v49 = vpop.eup %7765 }
 0x9af   :  { %3716 = vst.msk [vmem:[#allocation4 + $0x18] sm:$0xff] %vm95_vm0, %v7766_v49  ;;  %7775 = vtanh.f32 %v3712_v37  ;;  %7042 = vmatmul.mubr.msk.f32.vlgmr.msra.gmra.mrb[84].mxu0 %vm95_vm0, %v7766_v49 }
 0x9b0   :  { %v7768_v41 = vpop.eup %7767  ;;  %7044 = vmatprep.mubr.msk.f32.mxu0 %vm7888_vm1, %v7889_v11  ;;  %7507 = vmatpush3.bf16.msra.mxu0 %v8685_v34 }
 0x9b1   :  { %3719 = vst.msk [vmem:[#allocation5 + $0x90] sm:$0xff] %vm95_vm0, %v7768_v41  ;;  %7059 = vmatmul.mubr.msk.f32.vlgmr.msra.gmra.mrb[132].mxu1 %vm95_vm0, %v7768_v41  ;;  %7508 = vmatprep.subr.bf16.mxu0 %v7887_v6 }
 0x9b2   :  { %v7770_v42 = vpop.eup %7769  ;;  %7061 = vmatprep.mubr.msk.f32.mxu1 %vm7888_vm1, %v7889_v11  ;;  %7513 = vmatpush3.bf16.msra.mxu1 %v8680_v32 }
 0x9b3   :  { %3717 = vst.msk [vmem:[#allocation4 + $0x20] sm:$0xff] %vm95_vm0, %v7770_v42  ;;  %7045 = vmatmul.mubr.msk.f32.gmra.mrb[86].mxu0 %vm95_vm0, %v7770_v42  ;;  %7514 = vmatprep.subr.bf16.mxu1 %v7887_v6 }
 0x9b4   :  { %7047 = vmatprep.mubr.msk.f32.mxu0 %vm7888_vm1, %v7889_v11  ;;  %7510 = vmatpush3.bf16.msra.mxu0 %v8704_v39 }
 0x9b5   :  { %v7772_v43 = vpop.eup %7771  ;;  %7517 = vmatprep.subr.bf16.mxu0 %v7887_v6 }
 0x9b6   :  { %v7774_v44 = vpop.eup %7773  ;;  %3720 = vst.msk [vmem:[#allocation5 + $0x98] sm:$0xff] %vm95_vm0, %v7772_v43  ;;  %7062 = vmatmul.mubr.msk.f32.gmra.mrb[134].mxu1 %vm95_vm0, %v7772_v43 }
 0x9b7   :  { %3718 = vst.msk [vmem:[#allocation4 + $0x28] sm:$0xff] %vm95_vm0, %v7774_v44  ;;  %7048 = vmatmul.mubr.msk.f32.gmra.mrb[88].mxu0 %vm95_vm0, %v7774_v44  ;;  %7064 = vmatprep.mubr.msk.f32.mxu1 %vm7888_vm1, %v7889_v11 }
 0x9b8   :  { %7516 = vmatpush3.bf16.msra.mxu1 %v8701_v38  ;;  %7075 = vmatprep.mubr.msk.f32.mxu0 %vm7888_vm1, %v7889_v11 }
 0x9b9   :  { %v7776_v45 = vpop.eup %7775  ;;  %7523 = vmatprep.subr.bf16.mxu1 %v7887_v6 }
 0x9ba   :  { %3721 = vst.msk [vmem:[#allocation5 + $0xa0] sm:$0xff] %vm95_vm0, %v7776_v45  ;;  %7065 = vmatmul.mubr.msk.f32.gmra.mrb[136].mxu1 %vm95_vm0, %v7776_v45  ;;  %v4458_v45 = vld [vmem:[%s9263_s14 + $0x8] sm:$0xff] }
 0x9bb   :  { %7092 = vmatprep.mubr.msk.f32.mxu1 %vm7888_vm1, %v7889_v11 }
 0xa82   :  { %v3804_v13 = vpop.f32.mrb[84].mxu0 }
 0xa83   :  { %v3818_v48 = vadd.f32 %v3804_v13, %v3722_v47  ;;  %v7043_v51 = vpop.f32.mrb[85].mxu0  ;;  %v4459_v13 = vld [vmem:[%s9263_s14 + $0x10] sm:$0xff] }
 0xa84   :  { %v3906_v53 = vpop.f32.mrb[132].mxu1 }
 0xa85   :  { %7777 = vtanh.f32 %v3818_v48  ;;  %v3920_v61 = vadd.f32 %v3906_v53, %v3824_v52  ;;  %v7060_v54 = vpop.f32.mrb[133].mxu1  ;;  %v4460_v48 = vld [vmem:[%s9263_s14 + $0x18] sm:$0xff]  ;;  %v4142_v52 = vld [vmem:[#allocation4 + $0x60] sm:$0xff] }
 0xa86   :  { %v3809_v55 = vpop.f32.mrb[86].mxu0  ;;  %v9030_v51 = vpack.c.bf16 %v4460_v48, %v4459_v13 }
 0xa87   :  { %7779 = vtanh.f32 %v3920_v61  ;;  %v3819_v56 = vadd.f32 %v3809_v55, %v3723_v50  ;;  %v7046_v17 = vpop.f32.mrb[87].mxu0  ;;  %v4244_v50 = vld [vmem:[#allocation5 + $0x48] sm:$0xff] }
 0xa89   :  { %7781 = vtanh.f32 %v3819_v56  ;;  %v3911_v59 = vpop.f32.mrb[134].mxu1 }
 0xa8a   :  { %v3921_v60 = vadd.f32 %v3911_v59, %v3825_v58  ;;  %v3814_v62 = vpop.f32.mrb[88].mxu0  ;;  %v7063_v63 = vpop.f32.mrb[135].mxu1  ;;  %v4143_v58 = vld [vmem:[#allocation4 + $0x68] sm:$0xff] }
 0xa8b   :  { %v3820_v0 = vadd.f32 %v3814_v62, %v3724_v57  ;;  %v7049_v1 = vpop.f32.mrb[89].mxu0  ;;  %v4245_v62 = vld [vmem:[#allocation5 + $0x50] sm:$0xff] }
 0xa8c   :  { %7783 = vtanh.f32 %v3921_v60  ;;  %v4144_v1 = vld [vmem:[#allocation4 + $0x70] sm:$0xff] }
 0xa8d   :  { %7785 = vtanh.f32 %v3820_v0  ;;  %v3916_v3 = vpop.f32.mrb[136].mxu1 }
 0xa8e   :  { %v3922_v4 = vadd.f32 %v3916_v3, %v3826_v2  ;;  %v7066_v5 = vpop.f32.mrb[137].mxu1 }
 0xa8f   :  { %v7778_v7 = vpop.eup %7777 }
 0xa90   :  { %3926 = vst.msk [vmem:[#allocation4 + $0x30] sm:$0xff] %vm95_vm0, %v7778_v7  ;;  %7787 = vtanh.f32 %v3922_v4  ;;  %7076 = vmatmul.mubr.msk.f32.vlgmr.msra.gmra.mrb[90].mxu0 %vm95_vm0, %v7778_v7  ;;  %v4246_v7 = vld [vmem:[#allocation5 + $0x58] sm:$0xff] }
 0xa91   :  { %v7780_v8 = vpop.eup %7779  ;;  %7078 = vmatprep.mubr.msk.f32.mxu0 %vm7888_vm1, %v7889_v11  ;;  %7519 = vmatpush3.bf16.msra.mxu0 %v8685_v34 }
 0xa92   :  { %3929 = vst.msk [vmem:[#allocation5 + $0x78] sm:$0xff] %vm95_vm0, %v7780_v8  ;;  %7093 = vmatmul.mubr.msk.f32.vlgmr.msra.gmra.mrb[138].mxu1 %vm95_vm0, %v7780_v8  ;;  %7520 = vmatprep.subr.bf16.mxu0 %v7887_v6 }
 0xa93   :  { %v7782_v9 = vpop.eup %7781  ;;  %7095 = vmatprep.mubr.msk.f32.mxu1 %vm7888_vm1, %v7889_v11  ;;  %7525 = vmatpush3.bf16.msra.mxu1 %v8680_v32 }
 0xa94   :  { %3927 = vst.msk [vmem:[#allocation4 + $0x38] sm:$0xff] %vm95_vm0, %v7782_v9  ;;  %7079 = vmatmul.mubr.msk.f32.gmra.mrb[92].mxu0 %vm95_vm0, %v7782_v9  ;;  %7526 = vmatprep.subr.bf16.mxu1 %v7887_v6 }
 0xa95   :  { %7081 = vmatprep.mubr.msk.f32.mxu0 %vm7888_vm1, %v7889_v11  ;;  %7522 = vmatpush3.bf16.msra.mxu0 %v8704_v39 }
 0xa96   :  { %v7784_v10 = vpop.eup %7783  ;;  %7529 = vmatprep.subr.bf16.mxu0 %v7887_v6 }
 0xa97   :  { %v7786_v12 = vpop.eup %7785  ;;  %3930 = vst.msk [vmem:[#allocation5 + $0x80] sm:$0xff] %vm95_vm0, %v7784_v10  ;;  %7096 = vmatmul.mubr.msk.f32.gmra.mrb[140].mxu1 %vm95_vm0, %v7784_v10 }
 0xa98   :  { %3928 = vst.msk [vmem:[#allocation4 + $0x40] sm:$0xff] %vm95_vm0, %v7786_v12  ;;  %7082 = vmatmul.mubr.msk.f32.gmra.mrb[94].mxu0 %vm95_vm0, %v7786_v12  ;;  %7098 = vmatprep.mubr.msk.f32.mxu1 %vm7888_vm1, %v7889_v11 }
 0xa99   :  { %7528 = vmatpush3.bf16.msra.mxu1 %v8701_v38  ;;  %7109 = vmatprep.mubr.msk.f32.mxu0 %vm7888_vm1, %v7889_v11 }
 0xa9a   :  { %v7788_v32 = vpop.eup %7787  ;;  %7535 = vmatprep.subr.bf16.mxu1 %v7887_v6 }
 0xa9b   :  { %3931 = vst.msk [vmem:[#allocation5 + $0x88] sm:$0xff] %vm95_vm0, %v7788_v32  ;;  %7099 = vmatmul.mubr.msk.f32.gmra.mrb[142].mxu1 %vm95_vm0, %v7788_v32 }
 0xa9c   :  { %7126 = vmatprep.mubr.msk.f32.mxu1 %vm7888_vm1, %v7889_v11 }
 0xb63   :  { %v4014_v15 = vpop.f32.mrb[90].mxu0 }
 0xb64   :  { %v4028_v16 = vadd.f32 %v4014_v15, %v3932_v14  ;;  %v7077_v18 = vpop.f32.mrb[91].mxu0 }
 0xb65   :  { %v4116_v20 = vpop.f32.mrb[138].mxu1 }
 0xb66   :  { %7789 = vtanh.f32 %v4028_v16  ;;  %v4130_v38 = vadd.f32 %v4116_v20, %v4034_v19  ;;  %v7094_v21 = vpop.f32.mrb[139].mxu1  ;;  %v4565_v19 = vld [vmem:[%s9259_s10] sm:$0xff]  ;;  %v4566_v20 = vld [vmem:[%s9259_s10 + $0x8] sm:$0xff] }
 0xb67   :  { %v4019_v23 = vpop.f32.mrb[92].mxu0  ;;  %v4567_v21 = vld [vmem:[%s9259_s10 + $0x10] sm:$0xff] }
 0xb68   :  { %7791 = vtanh.f32 %v4130_v38  ;;  %v4029_v24 = vadd.f32 %v4019_v23, %v3933_v22  ;;  %v7080_v25 = vpop.f32.mrb[93].mxu0  ;;  %v7542_v38 = vpack.c.bf16 %v4566_v20, %v4565_v19  ;;  %v4568_v22 = vld [vmem:[%s9259_s10 + $0x18] sm:$0xff] }
 0xb69   :  { %v7545_v23 = vpack.c.bf16 %v4568_v22, %v4567_v21  ;;  %v5034_v21 = vld [vmem:[%s9265_s16] sm:$0xff]  ;;  %v5035_v22 = vld [vmem:[%s9265_s16 + $0x8] sm:$0xff] }
 0xb6a   :  { %7793 = vtanh.f32 %v4029_v24  ;;  %v4121_v27 = vpop.f32.mrb[140].mxu1  ;;  %v4352_v24 = vld [vmem:[#allocation4 + $0x78] sm:$0xff] }
 0xb6b   :  { %v4131_v28 = vadd.f32 %v4121_v27, %v4035_v26  ;;  %v4024_v30 = vpop.f32.mrb[94].mxu0  ;;  %v7097_v31 = vpop.f32.mrb[141].mxu1 }
 0xb6c   :  { %v4030_v33 = vadd.f32 %v4024_v30, %v3934_v29  ;;  %v7083_v35 = vpop.f32.mrb[95].mxu0 }
 0xb6d   :  { %7795 = vtanh.f32 %v4131_v28  ;;  %v4454_v28 = vld [vmem:[#allocation5 + $0x30] sm:$0xff] }
 0xb6e   :  { %7797 = vtanh.f32 %v4030_v33  ;;  %v4126_v36 = vpop.f32.mrb[142].mxu1  ;;  %v4353_v33 = vld [vmem:[#allocation4 + $0x80] sm:$0xff] }
 0xb6f   :  { %v4132_v37 = vadd.f32 %v4126_v36, %v4036_v46  ;;  %v7100_v40 = vpop.f32.mrb[143].mxu1 }
 0xb70   :  { %v7790_v49 = vpop.eup %7789 }
 0xb71   :  { %4136 = vst.msk [vmem:[#allocation4 + $0x48] sm:$0xff] %vm95_vm0, %v7790_v49  ;;  %7799 = vtanh.f32 %v4132_v37  ;;  %7110 = vmatmul.mubr.msk.f32.vlgmr.msra.gmra.mrb[96].mxu0 %vm95_vm0, %v7790_v49  ;;  %v4455_v37 = vld [vmem:[#allocation5 + $0x38] sm:$0xff] }
 0xb72   :  { %v7792_v41 = vpop.eup %7791  ;;  %7112 = vmatprep.mubr.msk.f32.mxu0 %vm7888_vm1, %v7889_v11  ;;  %7531 = vmatpush3.bf16.msra.mxu0 %v8685_v34 }
 0xb73   :  { %4139 = vst.msk [vmem:[#allocation5 + $0x60] sm:$0xff] %vm95_vm0, %v7792_v41  ;;  %7127 = vmatmul.mubr.msk.f32.vlgmr.msra.gmra.mrb[144].mxu1 %vm95_vm0, %v7792_v41  ;;  %7532 = vmatprep.subr.bf16.mxu0 %v7887_v6  ;;  %v4354_v41 = vld [vmem:[#allocation4 + $0x88] sm:$0xff] }
 0xb74   :  { %v7794_v42 = vpop.eup %7793  ;;  %7129 = vmatprep.mubr.msk.f32.mxu1 %vm7888_vm1, %v7889_v11 }
 0xb75   :  { %4137 = vst.msk [vmem:[#allocation4 + $0x50] sm:$0xff] %vm95_vm0, %v7794_v42  ;;  %7113 = vmatmul.mubr.msk.f32.gmra.mrb[98].mxu0 %vm95_vm0, %v7794_v42 }
 0xb76   :  { %7115 = vmatprep.mubr.msk.f32.mxu0 %vm7888_vm1, %v7889_v11  ;;  %7534 = vmatpush3.bf16.msra.mxu0 %v8704_v39  ;;  %v4457_v39 = vld [vmem:[%s9263_s14] sm:$0xff] }
 0xb77   :  { %v7796_v34 = vpop.eup %7795  ;;  %7541 = vmatprep.subr.bf16.mxu0 %v7887_v6  ;;  %v9020_v47 = vpack.c.bf16 %v4458_v45, %v4457_v39  ;;  %v4456_v39 = vld [vmem:[#allocation5 + $0x40] sm:$0xff] }
 0xb78   :  { %v7798_v43 = vpop.eup %7797  ;;  %4140 = vst.msk [vmem:[#allocation5 + $0x68] sm:$0xff] %vm95_vm0, %v7796_v34  ;;  %7130 = vmatmul.mubr.msk.f32.gmra.mrb[146].mxu1 %vm95_vm0, %v7796_v34 }
 0xb79   :  { %4138 = vst.msk [vmem:[#allocation4 + $0x58] sm:$0xff] %vm95_vm0, %v7798_v43  ;;  %7116 = vmatmul.mubr.msk.f32.gmra.mrb[100].mxu0 %vm95_vm0, %v7798_v43  ;;  %7132 = vmatprep.mubr.msk.f32.mxu1 %vm7888_vm1, %v7889_v11 }
 0xb7a   :  { %7143 = vmatprep.mubr.msk.f32.mxu0 %vm7888_vm1, %v7889_v11  ;;  %7537 = vmatpush3.bf16.msra.mxu1 %v9020_v47 }
 0xb7b   :  { %v7800_v44 = vpop.eup %7799  ;;  %7538 = vmatprep.subr.bf16.mxu1 %v7887_v6 }
 0xb7c   :  { %4141 = vst.msk [vmem:[#allocation5 + $0x70] sm:$0xff] %vm95_vm0, %v7800_v44  ;;  %7133 = vmatmul.mubr.msk.f32.gmra.mrb[148].mxu1 %vm95_vm0, %v7800_v44 }
 0xb7d   :  { %7160 = vmatprep.mubr.msk.f32.mxu1 %vm7888_vm1, %v7889_v11 }
 0xb7e   :  { %7540 = vmatpush3.bf16.msra.mxu1 %v9030_v51 }
 0xb7f   :  { %7547 = vmatprep.subr.bf16.mxu1 %v7887_v6 }
 0xc44   :  { %v4224_v53 = vpop.f32.mrb[96].mxu0 }
 0xc45   :  { %v4238_v61 = vadd.f32 %v4224_v53, %v4142_v52  ;;  %v7111_v54 = vpop.f32.mrb[97].mxu0 }
 0xc46   :  { %v4326_v55 = vpop.f32.mrb[144].mxu1 }
 0xc47   :  { %7801 = vtanh.f32 %v4238_v61  ;;  %v4340_v56 = vadd.f32 %v4326_v55, %v4244_v50  ;;  %v7128_v17 = vpop.f32.mrb[145].mxu1 }
 0xc48   :  { %v4229_v59 = vpop.f32.mrb[98].mxu0 }
 0xc49   :  { %7803 = vtanh.f32 %v4340_v56  ;;  %v4239_v60 = vadd.f32 %v4229_v59, %v4143_v58  ;;  %v7114_v57 = vpop.f32.mrb[99].mxu0  ;;  %v4664_v58 = vld [vmem:[#allocation5 + $0x18] sm:$0xff] }
 0xc4a   :  { %v4563_v57 = vld [vmem:[#allocation4 + $0x98] sm:$0xff] }
 0xc4b   :  { %7805 = vtanh.f32 %v4239_v60  ;;  %v4331_v63 = vpop.f32.mrb[146].mxu1 }
 0xc4c   :  { %v4341_v0 = vadd.f32 %v4331_v63, %v4245_v62  ;;  %v4234_v2 = vpop.f32.mrb[100].mxu0  ;;  %v7131_v3 = vpop.f32.mrb[147].mxu1 }
 0xc4d   :  { %v4240_v4 = vadd.f32 %v4234_v2, %v4144_v1  ;;  %v7117_v5 = vpop.f32.mrb[101].mxu0  ;;  %v4665_v1 = vld [vmem:[#allocation5 + $0x20] sm:$0xff] }
 0xc4e   :  { %7807 = vtanh.f32 %v4341_v0 }
 0xc4f   :  { %7809 = vtanh.f32 %v4240_v4  ;;  %v4336_v8 = vpop.f32.mrb[148].mxu1  ;;  %v4564_v4 = vld [vmem:[#allocation4 + $0xa0] sm:$0xff] }
 0xc50   :  { %v4342_v9 = vadd.f32 %v4336_v8, %v4246_v7  ;;  %v7134_v10 = vpop.f32.mrb[149].mxu1 }
 0xc51   :  { %v7802_v12 = vpop.eup %7801  ;;  %v4666_v10 = vld [vmem:[#allocation5 + $0x28] sm:$0xff] }
 0xc52   :  { %4346 = vst.msk [vmem:[#allocation4 + $0x60] sm:$0xff] %vm95_vm0, %v7802_v12  ;;  %7811 = vtanh.f32 %v4342_v9  ;;  %7144 = vmatmul.mubr.msk.f32.vlgmr.msra.gmra.mrb[102].mxu0 %vm95_vm0, %v7802_v12 }
 0xc53   :  { %v7804_v32 = vpop.eup %7803  ;;  %7146 = vmatprep.mubr.msk.f32.mxu0 %vm7888_vm1, %v7889_v11  ;;  %7543 = vmatpush3.bf16.msra.mxu0 %v7542_v38 }
 0xc54   :  { %4349 = vst.msk [vmem:[#allocation5 + $0x48] sm:$0xff] %vm95_vm0, %v7804_v32  ;;  %7161 = vmatmul.mubr.msk.f32.vlgmr.msra.gmra.mrb[150].mxu1 %vm95_vm0, %v7804_v32  ;;  %7544 = vmatprep.subr.bf16.mxu0 %v7887_v6 }
 0xc55   :  { %v7806_v14 = vpop.eup %7805  ;;  %7163 = vmatprep.mubr.msk.f32.mxu1 %vm7888_vm1, %v7889_v11  ;;  %7549 = vmatpush3.bf16.msra.mxu1 %v9020_v47 }
 0xc56   :  { %4347 = vst.msk [vmem:[#allocation4 + $0x68] sm:$0xff] %vm95_vm0, %v7806_v14  ;;  %7147 = vmatmul.mubr.msk.f32.gmra.mrb[104].mxu0 %vm95_vm0, %v7806_v14  ;;  %7550 = vmatprep.subr.bf16.mxu1 %v7887_v6 }
 0xc57   :  { %7149 = vmatprep.mubr.msk.f32.mxu0 %vm7888_vm1, %v7889_v11  ;;  %7546 = vmatpush3.bf16.msra.mxu0 %v7545_v23 }
 0xc58   :  { %v7808_v15 = vpop.eup %7807  ;;  %7553 = vmatprep.subr.bf16.mxu0 %v7887_v6 }
 0xc59   :  { %v7810_v16 = vpop.eup %7809  ;;  %4350 = vst.msk [vmem:[#allocation5 + $0x50] sm:$0xff] %vm95_vm0, %v7808_v15  ;;  %7164 = vmatmul.mubr.msk.f32.gmra.mrb[152].mxu1 %vm95_vm0, %v7808_v15 }
 0xc5a   :  { %4348 = vst.msk [vmem:[#allocation4 + $0x70] sm:$0xff] %vm95_vm0, %v7810_v16  ;;  %7150 = vmatmul.mubr.msk.f32.gmra.mrb[106].mxu0 %vm95_vm0, %v7810_v16  ;;  %7166 = vmatprep.mubr.msk.f32.mxu1 %vm7888_vm1, %v7889_v11 }
 0xc5b   :  { %7552 = vmatpush3.bf16.msra.mxu1 %v9030_v51  ;;  %7177 = vmatprep.mubr.msk.f32.mxu0 %vm7888_vm1, %v7889_v11 }
 0xc5c   :  { %v7812_v18 = vpop.eup %7811  ;;  %7559 = vmatprep.subr.bf16.mxu1 %v7887_v6 }
 0xc5d   :  { %4351 = vst.msk [vmem:[#allocation5 + $0x58] sm:$0xff] %vm95_vm0, %v7812_v18  ;;  %7167 = vmatmul.mubr.msk.f32.gmra.mrb[154].mxu1 %vm95_vm0, %v7812_v18 }
 0xc5e   :  { %7194 = vmatprep.mubr.msk.f32.mxu1 %vm7888_vm1, %v7889_v11 }
 0xd25   :  { %v4434_v25 = vpop.f32.mrb[102].mxu0 }
 0xd26   :  { %v4448_v26 = vadd.f32 %v4434_v25, %v4352_v24  ;;  %v7145_v27 = vpop.f32.mrb[103].mxu0  ;;  %v5036_v24 = vld [vmem:[%s9265_s16 + $0x10] sm:$0xff]  ;;  %v5037_v25 = vld [vmem:[%s9265_s16 + $0x18] sm:$0xff] }
 0xd27   :  { %v4536_v29 = vpop.f32.mrb[150].mxu1  ;;  %v5006_v27 = vld [vmem:[%s9264_s15] sm:$0xff] }
 0xd28   :  { %7813 = vtanh.f32 %v4448_v26  ;;  %v4550_v30 = vadd.f32 %v4536_v29, %v4454_v28  ;;  %v7162_v31 = vpop.f32.mrb[151].mxu1  ;;  %v7569_v26 = vpack.c.bf16 %v5037_v25, %v5036_v24  ;;  %v5007_v28 = vld [vmem:[%s9264_s15 + $0x8] sm:$0xff]  ;;  %v4982_v24 = vld [vmem:[#allocation4] sm:$0xff] }
 0xd29   :  { %v4439_v35 = vpop.f32.mrb[104].mxu0  ;;  %v7573_v29 = vpack.c.bf16 %v5007_v28, %v5006_v27  ;;  %v4983_v25 = vld [vmem:[#allocation4 + $0x8] sm:$0xff]  ;;  %v4985_v27 = vld [vmem:[#allocation4 + $0x18] sm:$0xff]  ;;  %v4986_v28 = vld [vmem:[#allocation4 + $0x20] sm:$0xff] }
 0xd2a   :  { %7815 = vtanh.f32 %v4550_v30  ;;  %v4449_v46 = vadd.f32 %v4439_v35, %v4353_v33  ;;  %v7148_v36 = vpop.f32.mrb[105].mxu0  ;;  %v4772_v30 = vld [vmem:[#allocation4 + $0xa8] sm:$0xff] }
 0xd2c   :  { %7817 = vtanh.f32 %v4449_v46  ;;  %v4541_v40 = vpop.f32.mrb[152].mxu1  ;;  %v4874_v46 = vld [vmem:[#allocation5] sm:$0xff] }
 0xd2d   :  { %v4551_v49 = vadd.f32 %v4541_v40, %v4455_v37  ;;  %v4444_v42 = vpop.f32.mrb[106].mxu0  ;;  %v7165_v34 = vpop.f32.mrb[153].mxu1 }
 0xd2e   :  { %v4450_v43 = vadd.f32 %v4444_v42, %v4354_v41  ;;  %v7151_v44 = vpop.f32.mrb[107].mxu0 }
 0xd2f   :  { %7819 = vtanh.f32 %v4551_v49  ;;  %v4773_v49 = vld [vmem:[#allocation4 + $0xb0] sm:$0xff] }
 0xd30   :  { %7821 = vtanh.f32 %v4450_v43  ;;  %v4546_v45 = vpop.f32.mrb[154].mxu1  ;;  %v4875_v43 = vld [vmem:[#allocation5 + $0x8] sm:$0xff] }
 0xd31   :  { %v4552_v13 = vadd.f32 %v4546_v45, %v4456_v39  ;;  %v7168_v48 = vpop.f32.mrb[155].mxu1  ;;  %v4774_v45 = vld [vmem:[#allocation4 + $0xb8] sm:$0xff] }
 0xd32   :  { %v7814_v52 = vpop.eup %7813 }
 0xd33   :  { %4556 = vst.msk [vmem:[#allocation4 + $0x78] sm:$0xff] %vm95_vm0, %v7814_v52  ;;  %7823 = vtanh.f32 %v4552_v13  ;;  %7178 = vmatmul.mubr.msk.f32.vlgmr.msra.gmra.mrb[108].mxu0 %vm95_vm0, %v7814_v52 }
 0xd34   :  { %v7816_v53 = vpop.eup %7815  ;;  %7180 = vmatprep.mubr.msk.f32.mxu0 %vm7888_vm1, %v7889_v11  ;;  %7555 = vmatpush3.bf16.msra.mxu0 %v7542_v38 }
 0xd35   :  { %4559 = vst.msk [vmem:[#allocation5 + $0x30] sm:$0xff] %vm95_vm0, %v7816_v53  ;;  %7195 = vmatmul.mubr.msk.f32.vlgmr.msra.gmra.mrb[156].mxu1 %vm95_vm0, %v7816_v53  ;;  %7556 = vmatprep.subr.bf16.mxu0 %v7887_v6 }
 0xd36   :  { %v7818_v61 = vpop.eup %7817  ;;  %7197 = vmatprep.mubr.msk.f32.mxu1 %vm7888_vm1, %v7889_v11  ;;  %7561 = vmatpush3.bf16.msra.mxu1 %v9020_v47  ;;  %v4562_v47 = vld [vmem:[#allocation4 + $0x90] sm:$0xff] }
 0xd37   :  { %4557 = vst.msk [vmem:[#allocation4 + $0x80] sm:$0xff] %vm95_vm0, %v7818_v61  ;;  %7181 = vmatmul.mubr.msk.f32.gmra.mrb[110].mxu0 %vm95_vm0, %v7818_v61  ;;  %7562 = vmatprep.subr.bf16.mxu1 %v7887_v6  ;;  %v4876_v61 = vld [vmem:[#allocation5 + $0x10] sm:$0xff] }
 0xd38   :  { %7183 = vmatprep.mubr.msk.f32.mxu0 %vm7888_vm1, %v7889_v11  ;;  %7558 = vmatpush3.bf16.msra.mxu0 %v7545_v23  ;;  %v7565_v23 = vpack.c.bf16 %v5035_v22, %v5034_v21  ;;  %v5031_v21 = vld [vmem:[#allocation5 + $0xa8] sm:$0xff]  ;;  %v5032_v22 = vld [vmem:[#allocation5 + $0xb0] sm:$0xff] }
 0xd39   :  { %v7820_v54 = vpop.eup %7819 }
 0xd3a   :  { %v7822_v50 = vpop.eup %7821  ;;  %4560 = vst.msk [vmem:[#allocation5 + $0x38] sm:$0xff] %vm95_vm0, %v7820_v54  ;;  %7198 = vmatmul.mubr.msk.f32.gmra.mrb[158].mxu1 %vm95_vm0, %v7820_v54  ;;  %7566 = vmatprep.subr.bf16.mxu0 %v7565_v23 }
 0xd3b   :  { %4558 = vst.msk [vmem:[#allocation4 + $0x88] sm:$0xff] %vm95_vm0, %v7822_v50  ;;  %7184 = vmatmul.mubr.msk.f32.gmra.mrb[112].mxu0 %vm95_vm0, %v7822_v50  ;;  %7200 = vmatprep.mubr.msk.f32.mxu1 %vm7888_vm1, %v7889_v11 }
 0xd3c   :  { %7564 = vmatpush3.bf16.msra.mxu1 %v9030_v51  ;;  %7211 = vmatprep.mubr.msk.f32.mxu0 %vm7888_vm1, %v7889_v11 }
 0xd3d   :  { %v7824_v6 = vpop.eup %7823 }
 0xd3e   :  { %4561 = vst.msk [vmem:[#allocation5 + $0x40] sm:$0xff] %vm95_vm0, %v7824_v6  ;;  %7201 = vmatmul.mubr.msk.f32.gmra.mrb[160].mxu1 %vm95_vm0, %v7824_v6 }
 0xd3f   :  { %7228 = vmatprep.mubr.msk.f32.mxu1 %vm7888_vm1, %v7889_v11 }
 0xe06   :  { %v4644_v55 = vpop.f32.mrb[108].mxu0 }
 0xe07   :  { %v4658_v56 = vadd.f32 %v4644_v55, %v4562_v47  ;;  %v7179_v17 = vpop.f32.mrb[109].mxu0 }
 0xe08   :  { %v4746_v59 = vpop.f32.mrb[156].mxu1 }
 0xe09   :  { %7825 = vtanh.f32 %v4658_v56  ;;  %v4760_v60 = vadd.f32 %v4746_v59, %v4664_v58  ;;  %v7196_v51 = vpop.f32.mrb[157].mxu1 }
 0xe0a   :  { %v4649_v62 = vpop.f32.mrb[110].mxu0  ;;  %v5008_v51 = vld [vmem:[%s9264_s15 + $0x10] sm:$0xff] }
 0xe0b   :  { %7827 = vtanh.f32 %v4760_v60  ;;  %v4659_v63 = vadd.f32 %v4649_v62, %v4563_v57  ;;  %v7182_v0 = vpop.f32.mrb[111].mxu0  ;;  %v5009_v57 = vld [vmem:[%s9264_s15 + $0x18] sm:$0xff] }
 0xe0c   :  { %v7577_v62 = vpack.c.bf16 %v5009_v57, %v5008_v51 }
 0xe0d   :  { %7829 = vtanh.f32 %v4659_v63  ;;  %v4751_v2 = vpop.f32.mrb[158].mxu1 }
 0xe0e   :  { %v4761_v3 = vadd.f32 %v4751_v2, %v4665_v1  ;;  %v4654_v5 = vpop.f32.mrb[112].mxu0  ;;  %v7199_v7 = vpop.f32.mrb[159].mxu1 }
 0xe0f   :  { %v4660_v8 = vadd.f32 %v4654_v5, %v4564_v4  ;;  %v7185_v9 = vpop.f32.mrb[113].mxu0  ;;  %v5016_v4 = vld [vmem:[#allocation5 + $0x30] sm:$0xff]  ;;  %v5017_v5 = vld [vmem:[#allocation5 + $0x38] sm:$0xff]  ;;  %v5018_v7 = vld [vmem:[#allocation5 + $0x40] sm:$0xff] }
 0xe10   :  { %7831 = vtanh.f32 %v4761_v3  ;;  %v5020_v9 = vld [vmem:[#allocation5 + $0x50] sm:$0xff] }
 0xe11   :  { %7833 = vtanh.f32 %v4660_v8  ;;  %v4756_v12 = vpop.f32.mrb[160].mxu1  ;;  %v5019_v8 = vld [vmem:[#allocation5 + $0x48] sm:$0xff] }
 0xe12   :  { %v4762_v32 = vadd.f32 %v4756_v12, %v4666_v10  ;;  %v7202_v14 = vpop.f32.mrb[161].mxu1  ;;  %v5021_v10 = vld [vmem:[#allocation5 + $0x58] sm:$0xff]  ;;  %v5022_v12 = vld [vmem:[#allocation5 + $0x60] sm:$0xff] }
 0xe13   :  { %v7826_v15 = vpop.eup %7825  ;;  %v5024_v14 = vld [vmem:[#allocation5 + $0x70] sm:$0xff] }
 0xe14   :  { %4766 = vst.msk [vmem:[#allocation4 + $0x90] sm:$0xff] %vm95_vm0, %v7826_v15  ;;  %7835 = vtanh.f32 %v4762_v32  ;;  %7212 = vmatmul.mubr.msk.f32.vlgmr.msra.gmra.mrb[114].mxu0 %vm95_vm0, %v7826_v15  ;;  %v5023_v32 = vld [vmem:[#allocation5 + $0x68] sm:$0xff]  ;;  %v5025_v15 = vld [vmem:[#allocation5 + $0x78] sm:$0xff] }
 0xe15   :  { %v7828_v16 = vpop.eup %7827  ;;  %7214 = vmatprep.mubr.msk.f32.mxu0 %vm7888_vm1, %v7889_v11  ;;  %7568 = vmatpush3.bf16.msra.mxu0 %v7565_v23  ;;  %v5033_v23 = vld [vmem:[#allocation5 + $0xb8] sm:$0xff] }
 0xe16   :  { %4769 = vst.msk [vmem:[#allocation5 + $0x18] sm:$0xff] %vm95_vm0, %v7828_v16  ;;  %7229 = vmatmul.mubr.msk.f32.vlgmr.msra.gmra.mrb[162].mxu1 %vm95_vm0, %v7828_v16  ;;  %7570 = vmatprep.subr.bf16.mxu0 %v7569_v26  ;;  %v5026_v16 = vld [vmem:[#allocation5 + $0x80] sm:$0xff] }
 0xe17   :  { %v7830_v18 = vpop.eup %7829  ;;  %7231 = vmatprep.mubr.msk.f32.mxu1 %vm7888_vm1, %v7889_v11 }
 0xe18   :  { %4767 = vst.msk [vmem:[#allocation4 + $0x98] sm:$0xff] %vm95_vm0, %v7830_v18  ;;  %7215 = vmatmul.mubr.msk.f32.gmra.mrb[116].mxu0 %vm95_vm0, %v7830_v18  ;;  %v5027_v18 = vld [vmem:[#allocation5 + $0x88] sm:$0xff] }
 0xe19   :  { %7217 = vmatprep.mubr.msk.f32.mxu0 %vm7888_vm1, %v7889_v11  ;;  %7572 = vmatpush3.bf16.msra.mxu0 %v7569_v26  ;;  %v4984_v26 = vld [vmem:[#allocation4 + $0x10] sm:$0xff] }
 0xe1a   :  { %v7832_v19 = vpop.eup %7831  ;;  %7574 = vmatprep.subr.bf16.mxu0 %v7573_v29 }
 0xe1b   :  { %v7834_v20 = vpop.eup %7833  ;;  %4770 = vst.msk [vmem:[#allocation5 + $0x20] sm:$0xff] %vm95_vm0, %v7832_v19  ;;  %7232 = vmatmul.mubr.msk.f32.gmra.mrb[164].mxu1 %vm95_vm0, %v7832_v19  ;;  %v5028_v19 = vld [vmem:[#allocation5 + $0x90] sm:$0xff] }
 0xe1c   :  { %4768 = vst.msk [vmem:[#allocation4 + $0xa0] sm:$0xff] %vm95_vm0, %v7834_v20  ;;  %7218 = vmatmul.mubr.msk.f32.gmra.mrb[118].mxu0 %vm95_vm0, %v7834_v20  ;;  %7234 = vmatprep.mubr.msk.f32.mxu1 %vm7888_vm1, %v7889_v11  ;;  %v5029_v20 = vld [vmem:[#allocation5 + $0x98] sm:$0xff] }
 0xe1d   :  { %v5013_v1 = vld [vmem:[#allocation5 + $0x18] sm:$0xff] }
 0xe1e   :  { %v7836_v38 = vpop.eup %7835 }
 0xe1f   :  { %4771 = vst.msk [vmem:[#allocation5 + $0x28] sm:$0xff] %vm95_vm0, %v7836_v38  ;;  %7235 = vmatmul.mubr.msk.f32.gmra.mrb[166].mxu1 %vm95_vm0, %v7836_v38  ;;  %v5030_v38 = vld [vmem:[#allocation5 + $0xa0] sm:$0xff] }
 0xe22   :  { %v5014_v2 = vld [vmem:[#allocation5 + $0x20] sm:$0xff] }
 0xe26   :  { %v5015_v3 = vld [vmem:[#allocation5 + $0x28] sm:$0xff] }
 0xee7   :  { %v4854_v31 = vpop.f32.mrb[114].mxu0 }
 0xee8   :  { %v4868_v33 = vadd.f32 %v4854_v31, %v4772_v30  ;;  %v7213_v35 = vpop.f32.mrb[115].mxu0  ;;  %v4988_v30 = vld [vmem:[#allocation4 + $0x30] sm:$0xff]  ;;  %v4989_v31 = vld [vmem:[#allocation4 + $0x38] sm:$0xff] }
 0xee9   :  { %v4956_v36 = vpop.f32.mrb[162].mxu1  ;;  %v4991_v35 = vld [vmem:[#allocation4 + $0x48] sm:$0xff] }
 0xeea   :  { %7837 = vtanh.f32 %v4868_v33  ;;  %v4970_v37 = vadd.f32 %v4956_v36, %v4874_v46  ;;  %v7230_v40 = vpop.f32.mrb[163].mxu1  ;;  %v4990_v33 = vld [vmem:[#allocation4 + $0x40] sm:$0xff]  ;;  %v4992_v46 = vld [vmem:[#allocation4 + $0x50] sm:$0xff]  ;;  %v4993_v36 = vld [vmem:[#allocation4 + $0x58] sm:$0xff] }
 0xeeb   :  { %v4859_v41 = vpop.f32.mrb[116].mxu0  ;;  %v4995_v40 = vld [vmem:[#allocation4 + $0x68] sm:$0xff] }
 0xeec   :  { %7839 = vtanh.f32 %v4970_v37  ;;  %v4869_v42 = vadd.f32 %v4859_v41, %v4773_v49  ;;  %v7216_v34 = vpop.f32.mrb[117].mxu0  ;;  %v4994_v37 = vld [vmem:[#allocation4 + $0x60] sm:$0xff]  ;;  %v4996_v49 = vld [vmem:[#allocation4 + $0x70] sm:$0xff]  ;;  %v4997_v41 = vld [vmem:[#allocation4 + $0x78] sm:$0xff] }
 0xeed   :  { %v4999_v34 = vld [vmem:[#allocation4 + $0x88] sm:$0xff] }
 0xeee   :  { %7841 = vtanh.f32 %v4869_v42  ;;  %v4961_v44 = vpop.f32.mrb[164].mxu1  ;;  %v4998_v42 = vld [vmem:[#allocation4 + $0x80] sm:$0xff] }
 0xeef   :  { %v4971_v39 = vadd.f32 %v4961_v44, %v4875_v43  ;;  %v4864_v13 = vpop.f32.mrb[118].mxu0  ;;  %v7233_v48 = vpop.f32.mrb[165].mxu1  ;;  %v5000_v43 = vld [vmem:[#allocation4 + $0x90] sm:$0xff]  ;;  %v5001_v44 = vld [vmem:[#allocation4 + $0x98] sm:$0xff] }
 0xef0   :  { %v4870_v52 = vadd.f32 %v4864_v13, %v4774_v45  ;;  %v7219_v53 = vpop.f32.mrb[119].mxu0 }
 0xef1   :  { %7843 = vtanh.f32 %v4971_v39  ;;  %v5002_v39 = vld [vmem:[#allocation4 + $0xa0] sm:$0xff] }
 0xef2   :  { %7845 = vtanh.f32 %v4870_v52  ;;  %v4966_v54 = vpop.f32.mrb[166].mxu1 }
 0xef3   :  { %v4972_v50 = vadd.f32 %v4966_v54, %v4876_v61  ;;  %v7236_v6 = vpop.f32.mrb[167].mxu1  ;;  %v9205_v61 = vld [vmem:[%s9266_s17] ss:$0 sm:$0xff]  ;;  %s7890_s17 = smov [#allocation6]  }
 0xef4   :  { %v7838_v47 = vpop.eup %7837  ;;  %s5691_s7 = sshll.u32 %s7890_s17, 4  ;;  %s5692_s7 = int_to_ptr.vmem [resolvable:$true] %s5691_s7 }
 0xef5   :  { %4976 = vst.msk [vmem:[#allocation4 + $0xa8] sm:$0xff] %vm95_vm0, %v7838_v47  ;;  %7847 = vtanh.f32 %v4972_v50  ;;  %s7863_s11 = scalar_lea.vmem %s5692_s7, 16  ;;  %s7867_s3 = scalar_lea.vmem %s5692_s7, 32 }
 0xef6   :  { %v7840_v55 = vpop.eup %7839  ;;  %p7864_p0 = scmp.ne.s32.totalorder %s5692_s7, %s7863_s11  ;;  %p7868_p1 = scmp.lt.s32.totalorder %s5692_s7, %s5692_s7 }
 0xef7   :  { %4979 = vst.msk [vmem:[#allocation5] sm:$0xff] %vm95_vm0, %v7840_v55  ;;  %p7869_p2 = scmp.lt.s32.totalorder %s7867_s3, %s7863_s11 }
 0xef8   :  { %v7842_v56 = vpop.eup %7841 }
 0xef9   :  { %4977 = vst.msk [vmem:[#allocation4 + $0xb0] sm:$0xff] %vm95_vm0, %v7842_v56  ;;  %p7870_p3 = por %p7869_p2, %p7868_p1 }
 0xefb   :  { %v7844_v17 = vpop.eup %7843  ;;  %p7871_p4 = pnand %p7870_p3, %p7864_p0 }
 0xefc   :  { %v7846_v58 = vpop.eup %7845  ;;  %4980 = vst.msk [vmem:[#allocation5 + $0x8] sm:$0xff] %vm95_vm0, %v7844_v17  ;;  %v5003_v45 = vld [vmem:[#allocation4 + $0xa8] sm:$0xff] }
 0xefd   :  { %4978 = vst.msk [vmem:[#allocation4 + $0xb8] sm:$0xff] %vm95_vm0, %v7846_v58 }
 0xefe   :  { %v5010_v59 = vld [vmem:[#allocation5] sm:$0xff] }
 0xeff   :  { %v7848_v60 = vpop.eup %7847  ;;  %7245 = vmatprep.mubr.msk.f32.mxu0 %vm95_vm0, %v5010_v59 }
 0xf00   :  { %4981 = vst.msk [vmem:[#allocation5 + $0x10] sm:$0xff] %vm95_vm0, %v7848_v60  ;;  %v5004_v13 = vld [vmem:[#allocation4 + $0xb0] sm:$0xff] }
 0xf03   :  { %v5011_v63 = vld [vmem:[#allocation5 + $0x8] sm:$0xff] }
 0xf04   :  { %7246 = vmatmul.mubr.msk.f32.vlgmr.msra.gmra.mrb[120].mxu0 %vm95_vm0, %v5011_v63  ;;  %v5005_v48 = vld [vmem:[#allocation4 + $0xb8] sm:$0xff] }
 0xf05   :  { %7576 = vmatpush3.bf16.msra.mxu0 %v7573_v29  ;;  %v4987_v29 = vld [vmem:[#allocation4 + $0x28] sm:$0xff] }
 0xf06   :  { %7578 = vmatprep.subr.bf16.mxu0 %v7577_v62 }
 0xf07   :  { %v5012_v0 = vld [vmem:[#allocation5 + $0x10] sm:$0xff] }
 0xf08   :  { %7248 = vmatprep.mubr.msk.f32.mxu0 %vm95_vm0, %v5012_v0 }
 0xf09   :  { %7249 = vmatmul.mubr.msk.f32.gmra.mrb[122].mxu0 %vm95_vm0, %v5013_v1 }
 0xf0a   :  { %7251 = vmatprep.mubr.msk.f32.mxu0 %vm95_vm0, %v5014_v2  ;;  %7580 = vmatpush3.bf16.msra.mxu0 %v7577_v62 }
 0xf0d   :  { %7252 = vmatmul.mubr.msk.f32.gmra.mrb[124].mxu0 %vm95_vm0, %v5015_v3 }
 0xf0e   :  { %7254 = vmatprep.mubr.msk.f32.mxu0 %vm95_vm0, %v5016_v4 }
 0xf11   :  { %7255 = vmatmul.mubr.msk.f32.gmra.mrb[126].mxu0 %vm95_vm0, %v5017_v5 }
 0xf12   :  { %7257 = vmatprep.mubr.msk.f32.mxu0 %vm95_vm0, %v5018_v7 }
 0xf15   :  { %7258 = vmatmul.mubr.msk.f32.gmra.mrb[128].mxu0 %vm95_vm0, %v5019_v8 }
 0xf16   :  { %7260 = vmatprep.mubr.msk.f32.mxu0 %vm95_vm0, %v5020_v9 }
 0xf19   :  { %7261 = vmatmul.mubr.msk.f32.gmra.mrb[130].mxu0 %vm95_vm0, %v5021_v10 }
 0xf1a   :  { %7263 = vmatprep.mubr.msk.f32.mxu0 %vm95_vm0, %v5022_v12 }
 0xf1d   :  { %7264 = vmatmul.mubr.msk.f32.gmra.mrb[132].mxu0 %vm95_vm0, %v5023_v32 }
 0xf1e   :  { %7266 = vmatprep.mubr.msk.f32.mxu0 %vm95_vm0, %v5024_v14 }
 0xf21   :  { %7267 = vmatmul.mubr.msk.f32.gmra.mrb[134].mxu0 %vm95_vm0, %v5025_v15 }
 0xf22   :  { %7269 = vmatprep.mubr.msk.f32.mxu0 %vm95_vm0, %v5026_v16 }
 0xf25   :  { %7270 = vmatmul.mubr.msk.f32.gmra.mrb[136].mxu0 %vm95_vm0, %v5027_v18 }
 0xf26   :  { %7272 = vmatprep.mubr.msk.f32.mxu0 %vm95_vm0, %v5028_v19 }
 0xf29   :  { %7273 = vmatmul.mubr.msk.f32.gmra.mrb[138].mxu0 %vm95_vm0, %v5029_v20 }
 0xf2a   :  { %7275 = vmatprep.mubr.msk.f32.mxu0 %vm95_vm0, %v5030_v38 }
 0xf2d   :  { %7276 = vmatmul.mubr.msk.f32.gmra.mrb[140].mxu0 %vm95_vm0, %v5031_v21 }
 0xf2e   :  { %7278 = vmatprep.mubr.msk.f32.mxu0 %vm95_vm0, %v5032_v22 }
 0xf31   :  { %7279 = vmatmul.mubr.msk.f32.gmra.mrb[142].mxu0 %vm95_vm0, %v5033_v23 }
 0xf32   :  { %7289 = vmatprep.mubr.msk.f32.mxu0 %vm95_vm0, %v4982_v24 }
 0xf35   :  { %7290 = vmatmul.mubr.msk.f32.vlgmr.msra.gmra.mrb[120].mxu0 %vm95_vm0, %v4983_v25 }
 0xf36   :  { %7292 = vmatprep.mubr.msk.f32.mxu0 %vm95_vm0, %v4984_v26 }
 0xf39   :  { %7293 = vmatmul.mubr.msk.f32.gmra.mrb[122].mxu0 %vm95_vm0, %v4985_v27 }
 0xf3a   :  { %7295 = vmatprep.mubr.msk.f32.mxu0 %vm95_vm0, %v4986_v28 }
 0xf3d   :  { %7296 = vmatmul.mubr.msk.f32.gmra.mrb[124].mxu0 %vm95_vm0, %v4987_v29 }
 0xf3e   :  { %7298 = vmatprep.mubr.msk.f32.mxu0 %vm95_vm0, %v4988_v30 }
 0xf41   :  { %7299 = vmatmul.mubr.msk.f32.gmra.mrb[126].mxu0 %vm95_vm0, %v4989_v31 }
 0xf42   :  { %7301 = vmatprep.mubr.msk.f32.mxu0 %vm95_vm0, %v4990_v33 }
 0xf45   :  { %7302 = vmatmul.mubr.msk.f32.gmra.mrb[128].mxu0 %vm95_vm0, %v4991_v35 }
 0xf46   :  { %7304 = vmatprep.mubr.msk.f32.mxu0 %vm95_vm0, %v4992_v46 }
 0xf49   :  { %7305 = vmatmul.mubr.msk.f32.gmra.mrb[130].mxu0 %vm95_vm0, %v4993_v36 }
 0xf4a   :  { %7307 = vmatprep.mubr.msk.f32.mxu0 %vm95_vm0, %v4994_v37 }
 0xf4d   :  { %7308 = vmatmul.mubr.msk.f32.gmra.mrb[132].mxu0 %vm95_vm0, %v4995_v40 }
 0xf4e   :  { %7310 = vmatprep.mubr.msk.f32.mxu0 %vm95_vm0, %v4996_v49 }
 0xf51   :  { %7311 = vmatmul.mubr.msk.f32.gmra.mrb[134].mxu0 %vm95_vm0, %v4997_v41 }
 0xf52   :  { %7313 = vmatprep.mubr.msk.f32.mxu0 %vm95_vm0, %v4998_v42 }
 0xf55   :  { %7314 = vmatmul.mubr.msk.f32.gmra.mrb[136].mxu0 %vm95_vm0, %v4999_v34 }
 0xf56   :  { %7316 = vmatprep.mubr.msk.f32.mxu0 %vm95_vm0, %v5000_v43 }
 0xf59   :  { %7317 = vmatmul.mubr.msk.f32.gmra.mrb[138].mxu0 %vm95_vm0, %v5001_v44 }
 0xf5a   :  { %7319 = vmatprep.mubr.msk.f32.mxu0 %vm95_vm0, %v5002_v39 }
 0xf5d   :  { %7320 = vmatmul.mubr.msk.f32.gmra.mrb[140].mxu0 %vm95_vm0, %v5003_v45 }
 0xf5e   :  { %7322 = vmatprep.mubr.msk.f32.mxu0 %vm95_vm0, %v5004_v13 }
 0xf61   :  { %7323 = vmatmul.mubr.msk.f32.gmra.mrb[142].mxu0 %vm95_vm0, %v5005_v48 }
0x1008   :  { %v7291_v52 = vpop.f32.mrb[120].mxu0 }
0x1009   :  { %v5433_v53 = vpop.f32.mrb[121].mxu0  ;;  %v5560_v60 = vadd.f32 %v7291_v52, %v9205_v61 }
0x100a   :  { %v5559_v50 = vadd.f32 %v9205_v61, %v5433_v53 }
0x100c   :  { %v7294_v54 = vpop.f32.mrb[122].mxu0 }
0x100d   :  { %v5562_v6 = vadd.f32 %v7294_v54, %v9205_v61  ;;  %v5443_v47 = vpop.f32.mrb[123].mxu0 }
0x100e   :  { %v5561_v17 = vadd.f32 %v9205_v61, %v5443_v47 }
0x100f   :  { %v5583_v55 = vmax.f32 %v5559_v50, %v5562_v6 }
0x1010   :  { %v7297_v56 = vpop.f32.mrb[124].mxu0 }
0x1011   :  { %v5564_v58 = vadd.f32 %v7297_v56, %v9205_v61  ;;  %v5453_v59 = vpop.f32.mrb[125].mxu0 }
0x1012   :  { %v5563_v51 = vadd.f32 %v9205_v61, %v5453_v59 }
0x1013   :  { %v5585_v57 = vmax.f32 %v5561_v17, %v5564_v58 }
0x1014   :  { %v5584_v62 = vmax.f32 %v5560_v60, %v5563_v51  ;;  %v7300_v63 = vpop.f32.mrb[126].mxu0 }
0x1015   :  { %v5566_v0 = vadd.f32 %v7300_v63, %v9205_v61  ;;  %v5463_v1 = vpop.f32.mrb[127].mxu0 }
0x1016   :  { %v5565_v2 = vadd.f32 %v9205_v61, %v5463_v1 }
0x1017   :  { %v5587_v3 = vmax.f32 %v5584_v62, %v5566_v0 }
0x1018   :  { %v5586_v4 = vmax.f32 %v5583_v55, %v5565_v2  ;;  %v7303_v5 = vpop.f32.mrb[128].mxu0 }
0x1019   :  { %v5568_v7 = vadd.f32 %v7303_v5, %v9205_v61  ;;  %v5473_v8 = vpop.f32.mrb[129].mxu0 }
0x101a   :  { %v5567_v9 = vadd.f32 %v9205_v61, %v5473_v8 }
0x101b   :  { %v5589_v10 = vmax.f32 %v5586_v4, %v5568_v7 }
0x101c   :  { %v5588_v12 = vmax.f32 %v5585_v57, %v5567_v9  ;;  %v7306_v32 = vpop.f32.mrb[130].mxu0 }
0x101d   :  { %v5570_v14 = vadd.f32 %v7306_v32, %v9205_v61  ;;  %v5483_v15 = vpop.f32.mrb[131].mxu0 }
0x101e   :  { %v5569_v16 = vadd.f32 %v9205_v61, %v5483_v15 }
0x101f   :  { %v5591_v18 = vmax.f32 %v5588_v12, %v5570_v14 }
0x1020   :  { %v5590_v19 = vmax.f32 %v5587_v3, %v5569_v16  ;;  %v7309_v20 = vpop.f32.mrb[132].mxu0 }
0x1021   :  { %v5572_v38 = vadd.f32 %v7309_v20, %v9205_v61  ;;  %v5493_v21 = vpop.f32.mrb[133].mxu0 }
0x1022   :  { %v5571_v22 = vadd.f32 %v9205_v61, %v5493_v21 }
0x1023   :  { %v5593_v23 = vmax.f32 %v5590_v19, %v5572_v38 }
0x1024   :  { %v5592_v24 = vmax.f32 %v5589_v10, %v5571_v22  ;;  %v7312_v25 = vpop.f32.mrb[134].mxu0 }
0x1025   :  { %v5574_v26 = vadd.f32 %v7312_v25, %v9205_v61  ;;  %v5503_v27 = vpop.f32.mrb[135].mxu0 }
0x1026   :  { %v5573_v28 = vadd.f32 %v9205_v61, %v5503_v27 }
0x1027   :  { %v5595_v29 = vmax.f32 %v5592_v24, %v5574_v26 }
0x1028   :  { %v5594_v30 = vmax.f32 %v5591_v18, %v5573_v28  ;;  %v7315_v31 = vpop.f32.mrb[136].mxu0 }
0x1029   :  { %v5576_v33 = vadd.f32 %v7315_v31, %v9205_v61  ;;  %v5513_v35 = vpop.f32.mrb[137].mxu0 }
0x102a   :  { %v5575_v46 = vadd.f32 %v9205_v61, %v5513_v35 }
0x102b   :  { %v5597_v36 = vmax.f32 %v5594_v30, %v5576_v33 }
0x102c   :  { %v5596_v37 = vmax.f32 %v5593_v23, %v5575_v46  ;;  %v7318_v40 = vpop.f32.mrb[138].mxu0 }
0x102d   :  { %v5578_v49 = vadd.f32 %v7318_v40, %v9205_v61  ;;  %v5523_v41 = vpop.f32.mrb[139].mxu0 }
0x102e   :  { %v5577_v42 = vadd.f32 %v9205_v61, %v5523_v41 }
0x102f   :  { %v5599_v34 = vmax.f32 %v5596_v37, %v5578_v49 }
0x1030   :  { %v5598_v43 = vmax.f32 %v5595_v29, %v5577_v42  ;;  %v7321_v44 = vpop.f32.mrb[140].mxu0  ;;  %v5658_v29 = vlaneseq }
0x1031   :  { %v5580_v39 = vadd.f32 %v7321_v44, %v9205_v61  ;;  %v5533_v45 = vpop.f32.mrb[141].mxu0 }
0x1032   :  { %v5579_v13 = vadd.f32 %v9205_v61, %v5533_v45  ;;  %v5659_v35 = vshrl.u32 %v5658_v29, 7 }
0x1033   :  { %v5601_v48 = vmax.f32 %v5598_v43, %v5580_v39 }
0x1034   :  { %v5600_v52 = vmax.f32 %v5597_v36, %v5579_v13  ;;  %v7324_v53 = vpop.f32.mrb[142].mxu0  ;;  %vm5660_vm8 = vcmp.lt.s32.totalorder %v5659_v35, 2 }
0x1035   :  { %v5582_v54 = vadd.f32 %v7324_v53, %v9205_v61  ;;  %v5543_v50 = vpop.f32.mrb[143].mxu0  ;;  %v5604_v6 = vmul.f32 %v5601_v48, %v5601_v48 }
0x1036   :  { %v5581_v47 = vadd.f32 %v9205_v61, %v5543_v50 }
0x1037   :  { %v5603_v55 = vmax.f32 %v5600_v52, %v5582_v54  ;;  %v5605_v56 = vsel %vm95_vm0, %v5604_v6, 0.0 }
0x1038   :  { %v5602_v17 = vmax.f32 %v5599_v34, %v5581_v47  ;;  %5606 = vadd.xlane.f32.xlu0 %v5605_v56 }
0x1039   :  { %v5632_v58 = vmul.f32 %v5603_v55, %v5603_v55 }
0x103a   :  { %v5618_v59 = vmul.f32 %v5602_v17, %v5602_v17 }
0x103b   :  { %v5633_v60 = vsel %vm95_vm0, %v5632_v58, 0.0 }
0x103c   :  { %5634 = vadd.xlane.f32.xlu1 %v5633_v60  ;;  %v5619_v51 = vsel %vm95_vm0, %v5618_v59, 0.0 }
0x103d   :  { %5620 = vadd.xlane.f32.xlu0 %v5619_v51 }
0x10c5   :  { %v5607_v57 = vpop.xlane.xlu0 %5606 }
0x10c6   :  { %7849 = vrsqrt.f32 %v5607_v57  ;;  %vm5610_vm2 = vcmp.eq.f32.partialorder %v5607_v57, inf  ;;  %v5613_v1 = vand.u32 2147483648, %v5607_v57  ;;  %vm5612_vm3 = vcmp.eq.f32.partialorder %v5607_v57, 0.0 }
0x10c9   :  { %v5635_v62 = vpop.xlane.xlu1 %5634 }
0x10ca   :  { %7851 = vrsqrt.f32 %v5635_v62  ;;  %v5621_v63 = vpop.xlane.xlu0 %5620  ;;  %vm5638_vm4 = vcmp.eq.f32.partialorder %v5635_v62, inf  ;;  %v5641_v9 = vand.u32 2147483648, %v5635_v62  ;;  %vm5640_vm5 = vcmp.eq.f32.partialorder %v5635_v62, 0.0 }
0x10cb   :  { %7853 = vrsqrt.f32 %v5621_v63  ;;  %vm5624_vm6 = vcmp.eq.f32.partialorder %v5621_v63, inf  ;;  %v5627_v32 = vand.u32 2147483648, %v5621_v63  ;;  %vm5626_vm7 = vcmp.eq.f32.partialorder %v5621_v63, 0.0 }
0x10d0   :  { %v7850_v61 = vpop.eup %7849 }
0x10d1   :  { %v5609_v0 = vmul.f32 %v7850_v61, %v5607_v57 }
0x10d3   :  { %v5611_v2 = vsel %vm5610_vm2, %v5607_v57, %v5609_v0 }
0x10d4   :  { %v7852_v3 = vpop.eup %7851  ;;  %v5614_v4 = vsel %vm5612_vm3, %v5613_v1, %v5611_v2 }
0x10d5   :  { %v7854_v5 = vpop.eup %7853  ;;  %v5615_v7 = vmax.f32 %v5614_v4, 1e-12  ;;  %v5637_v8 = vmul.f32 %v7852_v3, %v5635_v62 }
0x10d6   :  { %v5623_v10 = vmul.f32 %v7854_v5, %v5621_v63 }
0x10d7   :  { %v5639_v12 = vsel %vm5638_vm4, %v5635_v62, %v5637_v8  ;;  %7855 = vrcp.f32 %v5615_v7 }
0x10d8   :  { %v5642_v14 = vsel %vm5640_vm5, %v5641_v9, %v5639_v12  ;;  %v5625_v15 = vsel %vm5624_vm6, %v5621_v63, %v5623_v10 }
0x10d9   :  { %v5643_v16 = vmax.f32 %v5642_v14, 1e-12  ;;  %v5628_v18 = vsel %vm5626_vm7, %v5627_v32, %v5625_v15 }
0x10da   :  { %v5629_v19 = vmax.f32 %v5628_v18, 1e-12 }
0x10db   :  { %7857 = vrcp.f32 %v5643_v16 }
0x10dc   :  { %7859 = vrcp.f32 %v5629_v19 }
0x10e1   :  { %v7856_v20 = vpop.eup %7855 }
0x10e2   :  { %v5617_v22 = vmul.f32 %v7856_v20, %v5601_v48 }
0x10e5   :  { %v7858_v38 = vpop.eup %7857 }
0x10e6   :  { %v7860_v21 = vpop.eup %7859  ;;  %v5645_v23 = vmul.f32 %v7858_v38, %v5603_v55 }
0x10e7   :  { %v5631_v24 = vmul.f32 %v7860_v21, %v5602_v17 }
0x10e8   :  { %v5651_v25 = vmul.f32 %v5645_v23, %v5617_v22 }
0x10e9   :  { %v5646_v26 = vmul.f32 %v5631_v24, %v5617_v22 }
0x10ea   :  { %v5652_v27 = vsel %vm95_vm0, %v5651_v25, 0.0 }
0x10eb   :  { %5653 = vadd.xlane.f32.xlu0 %v5652_v27  ;;  %v5647_v28 = vsel %vm95_vm0, %v5646_v26, 0.0 }
0x10ec   :  { %5648 = vadd.xlane.f32.xlu1 %v5647_v28 }
0x1178   :  { %v5654_v30 = vpop.xlane.xlu0 %5653 }
0x1179   :  { %v5655_v31 = vsub.f32 1.0, %v5654_v30  ;;  %v5649_v33 = vpop.xlane.xlu1 %5648 }
0x117a   :  { %v5650_v46 = vsub.f32 1.0, %v5649_v33 }
0x117c   :  { %v5656_v36 = vsub.f32 %v5650_v46, %v5655_v31 }
0x117e   :  { %v5657_v37 = vadd.f32 0.1, %v5656_v36 }
0x1180   :  { %vm5661_vm9 = vcmp.gt.f32.partialorder %v5657_v37, 0.0 }
0x1181   :  { %vm5662_vm10 = vmand %vm5661_vm9, %vm5660_vm8 }
0x1182   :  { %v5980_v40 = vsel %vm5662_vm10, 1.0, %v7889_v11  ;;  %v5663_v49 = vsel %vm5662_vm10, %v5657_v37, 0.0 }
0x1183   :  { %v5672_v41 = vrot.slane %v5980_v40, 4  ;;  %v5664_v34 = vrot.slane %v5663_v49, 4 }
0x1185   :  { %v5673_v42 = vadd.f32 %v5980_v40, %v5672_v41  ;;  %v5665_v39 = vadd.f32 %v5664_v34, %v5663_v49 }
0x1187   :  { %v5674_v43 = vrot.slane %v5673_v42, 2  ;;  %v5666_v48 = vrot.slane %v5665_v39, 2 }
0x1189   :  { %v5675_v44 = vadd.f32 %v5674_v43, %v5673_v42  ;;  %v5667_v53 = vadd.f32 %v5666_v48, %v5665_v39 }
0x118b   :  { %v5676_v45 = vrot.slane %v5675_v44, 1  ;;  %v5668_v54 = vrot.slane %v5667_v53, 1 }
0x118d   :  { %v5677_v13 = vadd.f32 %v5676_v45, %v5675_v44  ;;  %v5669_v50 = vadd.f32 %v5668_v54, %v5667_v53 }
0x118f   :  { %v5679_v52 = vmax.f32 %v5677_v13, 1.0  ;;  %vm5678_vm12 = vcmp.gt.f32.partialorder %v5677_v13, 0.0 }
0x1191   :  { %7861 = vrcp.f32 %v5679_v52 }
0x119b   :  { %v7862_v6 = vpop.eup %7861 }
0x119c   :  { %v5681_v47 = vmul.f32 %v7862_v6, %v5669_v50 }
0x119e   :  { %v5682_v11 = vsel %vm5678_vm12, %v5681_v47, 0.0 }
0x119f   :  { %5684 = vst.msk [vmem:[#allocation6] sm:$0x1] %vm5683_vm11, %v5682_v11 }
0x11a0   :  { %7874 = shalt.err (!%p7871_p4)
}
0x11a1   :  { %s7875_s0 = scalar_lea.hbm %s9267_s18, 16 }
0x11a2   :  { %p7876_p5 = scmp.ne.s32.totalorder %s9267_s18, %s7875_s0  ;;  %p7879_p6 = scmp.lt.u32.totalorder %s7875_s0, %s9267_s18 }
0x11a4   :  { %p7881_p7 = pnand %p7879_p6, %p7876_p5 }
0x11a6   :  { %7884 = shalt.err (!%p7881_p7)
}
0x11a7   :  { %5694 = dma.vmem_to_hbm [thread:$0]  %s5692_s7, 16, %s9267_s18, [#allocation7]  }
0x11a8   :  { %7885 = dma.done.wait [#allocation7], 16  }
0x11a9   :  { %7886 = vsyncadd [#allocation7], 4294967280 }
0x11aa   :  { %5698 = vsyncpa [#allocation7], 1 }

</bundles_post_ra>
